<compile_context>
chip_gen: v5e
topology: v5e:2x2
jax: 0.10.0
libtpu: 0.0.40
codegen_flags: <defaults>
</compile_context>

<pallas_src>
import math
from functools import partial

import jax
import jax.numpy as jnp
from jax import lax
from jax.experimental import pallas as pl
from jax.experimental.pallas import tpu as pltpu


def _round_up(n, m):
    return ((n + m - 1) // m) * m


_N_TILES = (512, 384, 256, 128)            # lane-aligned tiles that divide GPT dims
_M_TILES = (512, 256, 128, 64, 32, 16, 8)  # row tiles (sublane aligned)


def _pick_tile(dim, candidates):
    for c in candidates:
        if c <= dim and dim % c == 0:
            return c
    return dim


def _cparams(dims):
    return pltpu.CompilerParams(
        dimension_semantics=dims,
        vmem_limit_bytes=48 * 1024 * 1024,   # explicit; safe on v7x (64 MiB VMEM)
    )


def _gelu_tanh(x):
    # matches torch.nn.GELU(approximate='tanh'), computed in f32
    c = 0.7978845608028654  # sqrt(2/pi)
    return 0.5 * x * (1.0 + jnp.tanh(c * (x + 0.044715 * x * x * x)))


# ---------------------------------------------------------------------------
# Plain tiled linear: y = x @ w (+ b) (+ GELU) (+ residual), tiled over (M,N,K)
# ---------------------------------------------------------------------------

def _linear_kernel(*refs, act, k_steps, has_bias, has_res):
    x_ref, w_ref = refs[0], refs[1]
    idx = 2
    b_ref = res_ref = None
    if has_bias:
        b_ref = refs[idx]
        idx += 1
    if has_res:
        res_ref = refs[idx]
        idx += 1
    o_ref = refs[idx]
    acc_ref = refs[idx + 1]

    k = pl.program_id(2)

    @pl.when(k == 0)
    def _init():
        acc_ref[...] = jnp.zeros_like(acc_ref)

    # bf16 x bf16 -> f32 accumulate on the MXU
    acc_ref[...] += jnp.dot(x_ref[...], w_ref[...],
                            preferred_element_type=jnp.float32)

    @pl.when(k == k_steps - 1)
    def _finalize():
        y = acc_ref[...]
        if has_bias:
            y = y + b_ref[...]
        if act == "gelu":
            y = _gelu_tanh(y)          # f32 epilogue (EUP tanh)
        if has_res:
            y = y + res_ref[...]       # fused residual add (f32)
        o_ref[...] = y.astype(o_ref.dtype)


def linear(x, w, b=None, *, act="none", residual=None, out_dtype=jnp.float32):
    """y = x @ w (+ b); w is [K, N] bf16 (PyTorch Linear weight, transposed)."""
    M, K = x.shape
    Kw, N = w.shape
    assert K == Kw
    assert M % 8 == 0 and K % 128 == 0 and N % 128 == 0, (M, K, N)
    assert w.dtype == jnp.bfloat16

    xb = x if x.dtype == jnp.bfloat16 else x.astype(jnp.bfloat16)

    tm = _pick_tile(M, _M_TILES)
    tn = _pick_tile(N, _N_TILES)
    tk = _pick_tile(K, _N_TILES)
    gm, gn, gk = M // tm, N // tn, K // tk

    # v7x has 2 TensorCores: guarantee >=2 steps on a parallel axis if possible.
    if gm * gn < 2:
        for c in _N_TILES:
            if c < tn and N % c == 0:
                tn, gn = c, N // c
                break
        else:
            for c in _M_TILES:
                if c < tm and M % c == 0:
                    tm, gm = c, M // c
                    break

    in_specs = [
        pl.BlockSpec((tm, tk), lambda i, j, k: (i, k)),
        pl.BlockSpec((tk, tn), lambda i, j, k: (k, j)),
    ]
    args = [xb, w]

    has_bias = b is not None
    if has_bias:
        in_specs.append(pl.BlockSpec((1, tn), lambda i, j, k: (0, j)))
        args.append(b)

    has_res = residual is not None
    if has_res:
        in_specs.append(pl.BlockSpec((tm, tn), lambda i, j, k: (i, j)))
        args.append(residual)

    return pl.pallas_call(
        partial(_linear_kernel, act=act, k_steps=gk,
                has_bias=has_bias, has_res=has_res),
        out_shape=jax.ShapeDtypeStruct((M, N), out_dtype),
        grid_spec=pltpu.PrefetchScalarGridSpec(
            num_scalar_prefetch=0,
            grid=(gm, gn, gk),
            in_specs=in_specs,
            out_specs=pl.BlockSpec((tm, tn), lambda i, j, k: (i, j)),
            scratch_shapes=[pltpu.VMEM((tm, tn), jnp.float32)],
        ),
        compiler_params=_cparams(("parallel", "parallel", "arbitrary")),
    )(*args)


# ---------------------------------------------------------------------------
# Fused LayerNorm + linear: y = LN(x) @ w (+ b) (+ GELU)
# (tk == C: the whole normalized row is computed in-register; recomputing the
#  cheap LN per N-tile keeps both grid axes "parallel" for megacore.)
# ---------------------------------------------------------------------------

def _ln_linear_kernel(*refs, act, has_bias, ln_eps):
    x_ref, g_ref, beta_ref, w_ref = refs[0], refs[1], refs[2], refs[3]
    idx = 4
    b_ref = None
    if has_bias:
        b_ref = refs[idx]
        idx += 1
    o_ref = refs[idx]

    x = x_ref[...].astype(jnp.float32)
    mu = jnp.mean(x, axis=-1, keepdims=True)
    xc = x - mu
    var = jnp.mean(xc * xc, axis=-1, keepdims=True)
    h = (xc * lax.rsqrt(var + ln_eps) * g_ref[...] + beta_ref[...]
         ).astype(jnp.bfloat16)

    y = jnp.dot(h, w_ref[...], preferred_element_type=jnp.float32)
    if has_bias:
        y = y + b_ref[...]
    if act == "gelu":
        y = _gelu_tanh(y)
    o_ref[...] = y.astype(o_ref.dtype)


def ln_linear(x, gamma, beta, w, b=None, *, act="none", out_dtype=jnp.bfloat16):
    M, C = x.shape
    Cw, N = w.shape
    assert C == Cw
    assert M % 8 == 0 and C % 128 == 0 and N % 128 == 0, (M, C, N)
    assert w.dtype == jnp.bfloat16

    tm = _pick_tile(M, _M_TILES)
    tn = _pick_tile(N, _N_TILES)
    gm, gn = M // tm, N // tn

    if gm * gn < 2:
        for c in _N_TILES:
            if c < tn and N % c == 0:
                tn, gn = c, N // c
                break
        else:
            for c in _M_TILES:
                if c < tm and M % c == 0:
                    tm, gm = c, M // c
                    break

    in_specs = [
        pl.BlockSpec((tm, C), lambda i, j: (i, 0)),
        pl.BlockSpec((1, C), lambda i, j: (0, 0)),
        pl.BlockSpec((1, C), lambda i, j: (0, 0)),
        pl.BlockSpec((C, tn), lambda i, j: (0, j)),
    ]
    args = [x, gamma, beta, w]
    has_bias = b is not None
    if has_bias:
        in_specs.append(pl.BlockSpec((1, tn), lambda i, j: (0, j)))
        args.append(b)

    return pl.pallas_call(
        partial(_ln_linear_kernel, act=act, has_bias=has_bias, ln_eps=1e-5),
        out_shape=jax.ShapeDtypeStruct((M, N), out_dtype),
        grid_spec=pltpu.PrefetchScalarGridSpec(
            num_scalar_prefetch=0,
            grid=(gm, gn),
            in_specs=in_specs,
            out_specs=pl.BlockSpec((tm, tn), lambda i, j: (i, j)),
        ),
        compiler_params=_cparams(("parallel", "parallel")),
    )(*args)


# ---------------------------------------------------------------------------
# Causal self-attention: grid over (batch, head-group); each group is a
# lane-aligned 128-wide q/k/v slab taken straight out of the (T, 3C) qkv slab.
# 1/sqrt(d) is folded into attn_w at init (no bf16 scaling here).
# ---------------------------------------------------------------------------

def _attn_kernel(q_ref, k_ref, v_ref, o_ref, *, heads, d):
    # q/k/v/o blocks: (1, T, heads*d) bf16, heads*d is a multiple of 128.
    T = q_ref.shape[1]
    row = lax.broadcasted_iota(jnp.int32, (T, T), 0)
    col = lax.broadcasted_iota(jnp.int32, (T, T), 1)
    causal = col <= row
    dn = (((1,), (1,)), ((), ()))  # contract head dim: (T,d)x(T,d) -> (T,T)

    q = q_ref[0]
    k = k_ref[0]
    v = v_ref[0]
    outs = []
    for h in range(heads):
        qh = q[:, h * d:(h + 1) * d]
        kh = k[:, h * d:(h + 1) * d]
        vh = v[:, h * d:(h + 1) * d]
        s = lax.dot_general(qh, kh, dn, preferred_element_type=jnp.float32)
        s = jnp.where(causal, s, -1e30)
        m = jnp.max(s, axis=-1, keepdims=True)
        p = jnp.exp(s - m)
        p = p * pl.reciprocal(jnp.sum(p, axis=-1, keepdims=True), approx=True)
        outs.append(jnp.dot(p.astype(vh.dtype), vh,
                            preferred_element_type=jnp.float32))
    # single lane-dense (T, heads*d) store
    o_ref[0] = jnp.concatenate(outs, axis=-1).astype(o_ref.dtype)


def causal_attention(qkv, n_head):
    """qkv: [B, T, 3C] bf16 (scale pre-folded into q) -> [B, T, C] bf16."""
    B, T, C3 = qkv.shape
    C = C3 // 3
    d = C // n_head

    # group heads so every q/k/v block is a lane-aligned slab of >=128 lanes
    heads = n_head
    for cand in range(1, n_head + 1):
        if n_head % cand == 0 and (cand * d) % 128 == 0:
            heads = cand
            break
    G = heads * d
    assert G % 128 == 0 and C % G == 0, (G, C)
    n_groups = C // G

    return pl.pallas_call(
        partial(_attn_kernel, heads=heads, d=d),
        out_shape=jax.ShapeDtypeStruct((B, T, C), jnp.bfloat16),
        grid_spec=pltpu.PrefetchScalarGridSpec(
            num_scalar_prefetch=0,
            grid=(B, n_groups),
            in_specs=[
                pl.BlockSpec((1, T, G), lambda b, g: (b, 0, g)),                 # q
                pl.BlockSpec((1, T, G), lambda b, g: (b, 0, n_groups + g)),      # k
                pl.BlockSpec((1, T, G), lambda b, g: (b, 0, 2 * n_groups + g)),  # v
            ],
            out_specs=pl.BlockSpec((1, T, G), lambda b, g: (b, 0, g)),
        ),
        compiler_params=_cparams(("parallel", "parallel")),
    )(qkv, qkv, qkv)


# ---------------------------------------------------------------------------
# Parameter init (deterministic, matches GPT._init_weights semantics).
# Weights are stored pre-cast (bf16) and pre-shaped so the forward never pads.
# ---------------------------------------------------------------------------

def init_params(key, cfg):
    C = cfg["n_embd"]
    V = cfg["vocab_size"]
    L = cfg["n_layer"]
    H = cfg["n_head"]
    d = C // H
    std = 0.02
    proj_std = 0.02 * (2 * L) ** -0.5      # NANOGPT_SCALE_INIT
    attn_scale = 1.0 / math.sqrt(d)

    def nrm(k, shape, s, dtype=jnp.bfloat16):
        return (jax.random.normal(k, shape, jnp.float32) * s).astype(dtype)

    keys = jax.random.split(key, 2 + cfg["n_layer"])
    wte = nrm(keys[0], (V, C), std, jnp.float32)        # embedding gather in f32
    Vp = _round_up(V, 128)                              # pad vocab once, at init
    wte_T = wte.T.astype(jnp.bfloat16)                  # tied lm_head, pre-transposed
    if Vp != V:
        wte_T = jnp.pad(wte_T, ((0, 0), (0, Vp - V)))

    params = {
        "wte": wte,
        "wte_T": wte_T,
        "wpe": nrm(keys[1], (cfg["block_size"], C), std, jnp.float32),
        "lnf_g": jnp.ones((1, C), jnp.float32),
        "lnf_b": jnp.zeros((1, C), jnp.float32),
        "blocks": [],
    }
    for l in range(L):
        k0, k1, k2, k3 = jax.random.split(keys[2 + l], 4)
        # weights stored as [in, out] (PyTorch Linear weight, transposed), bf16
        attn_w = jax.random.normal(k0, (C, 3 * C), jnp.float32) * std
        # fold the 1/sqrt(d) attention scale into the q output columns
        # (q bias is zero, so forward semantics are identical)
        attn_w = attn_w.at[:, :C].multiply(attn_scale)
        params["blocks"].append(dict(
            ln1_g=jnp.ones((1, C), jnp.float32),
            ln1_b=jnp.zeros((1, C), jnp.float32),
            attn_w=attn_w.astype(jnp.bfloat16),
            attn_b=jnp.zeros((1, 3 * C), jnp.float32),
            attn_proj_w=nrm(k1, (C, C), proj_std),
            attn_proj_b=jnp.zeros((1, C), jnp.float32),
            ln2_g=jnp.ones((1, C), jnp.float32),
            ln2_b=jnp.zeros((1, C), jnp.float32),
            fc_w=nrm(k2, (C, 4 * C), std),
            fc_b=jnp.zeros((1, 4 * C), jnp.float32),
            mlp_proj_w=nrm(k3, (4 * C, C), proj_std),
            mlp_proj_b=jnp.zeros((1, C), jnp.float32),
        ))
    return params


# ---------------------------------------------------------------------------
# GPT forward
# ---------------------------------------------------------------------------

def gpt_forward(params, idx, cfg):
    B, T = idx.shape
    C = cfg["n_embd"]
    H = cfg["n_head"]
    V = cfg["vocab_size"]
    assert T <= cfg["block_size"]
    M = B * T
    assert M % 8 == 0, "B*T must be a multiple of 8 for TPU tiling"

    # embedding gather + positional add (XLA glue, f32 residual stream)
    tok_emb = params["wte"][idx]               # (B, T, C)
    pos_emb = params["wpe"][:T]                # (T, C)
    x = (tok_emb + pos_emb).reshape(M, C)      # (B*T, C) f32

    for blk in params["blocks"]:
        # --- attention: fused LN1+QKV, grouped-head SDPA, fused proj+residual ---
        qkv = ln_linear(x, blk["ln1_g"], blk["ln1_b"], blk["attn_w"],
                        blk["attn_b"], out_dtype=jnp.bfloat16)          # (M, 3C)
        y = causal_attention(qkv.reshape(B, T, 3 * C), H)               # (B, T, C)
        x = linear(y.reshape(M, C), blk["attn_proj_w"], blk["attn_proj_b"],
                   residual=x, out_dtype=jnp.float32)                   # fused residual

        # --- MLP: fused LN2+FC+GELU, fused proj+residual ---
        h = ln_linear(x, blk["ln2_g"], blk["ln2_b"], blk["fc_w"], blk["fc_b"],
                      act="gelu", out_dtype=jnp.bfloat16)               # (M, 4C)
        x = linear(h, blk["mlp_proj_w"], blk["mlp_proj_b"],
                   residual=x, out_dtype=jnp.float32)                   # fused residual

    # fused final LN + tied lm_head (no bias; pre-transposed / vocab-padded weight)
    logits = ln_linear(x, params["lnf_g"], params["lnf_b"], params["wte_T"],
                       None, out_dtype=jnp.float32)                     # (M, Vp)
    Vp = params["wte_T"].shape[1]
    if Vp != V:
        logits = logits[:, :V]
    logits = logits.reshape(B, T, V)
    # TODO(synk): cross-entropy loss path (targets != None) not kernelized here.
    return logits, None


# ---------------------------------------------------------------------------
# Main
# ---------------------------------------------------------------------------

if __name__ == "__main__":
    cfg = dict(vocab_size=256, block_size=64, n_layer=2, n_head=4, n_embd=128)
    B, T = 2, 32

    key = jax.random.PRNGKey(0)
    pkey, ikey = jax.random.split(key)
    params = init_params(pkey, cfg)
    idx = jax.random.randint(ikey, (B, T), 0, cfg["vocab_size"], dtype=jnp.int32)

    fwd = jax.jit(partial(gpt_forward, cfg=cfg))
    logits, loss = fwd(params, idx)
    logits = jax.block_until_ready(logits)
    assert logits.shape == (B, T, cfg["vocab_size"])
    assert jnp.all(jnp.isfinite(logits))
    print("KERNEL_OK")
</pallas_src>

<mosaic_0001>
module attributes {stable_mosaic.version = 11 : i64} {
  func.func @_ln_linear_kernel(%arg0: i32, %arg1: i32, %arg2: memref<64x128xf32, #tpu.memory_space<vmem>>, %arg3: memref<1x128xf32, #tpu.memory_space<vmem>>, %arg4: memref<1x128xf32, #tpu.memory_space<vmem>>, %arg5: memref<128x128xbf16, #tpu.memory_space<vmem>>, %arg6: memref<1x128xf32, #tpu.memory_space<vmem>>, %arg7: memref<64x128xbf16, #tpu.memory_space<vmem>>) attributes {dimension_semantics = [#tpu.dimension_semantics<parallel>, #tpu.dimension_semantics<parallel>], iteration_bounds = array<i64: 1, 3>, scalar_prefetch = 0 : i64, scratch_operands = 0 : i64, tpu.core_type = #tpu.core_type<tc>, window_params = [{transform_indices = @transform_0, window_bounds = array<i64: 64, 128>}, {pipeline_mode = #tpu.pipeline_mode<synchronous>, transform_indices = @transform_1, window_bounds = array<i64: 1, 128>}, {pipeline_mode = #tpu.pipeline_mode<synchronous>, transform_indices = @transform_2, window_bounds = array<i64: 1, 128>}, {transform_indices = @transform_3, window_bounds = array<i64: 128, 128>}, {transform_indices = @transform_4, window_bounds = array<i64: 1, 128>}, {transform_indices = @transform_5, window_bounds = array<i64: 64, 128>}]} {
    %c0 = arith.constant 0 : index
    %c0_0 = arith.constant 0 : index
    %0 = vector.load %arg2[%c0, %c0_0] : memref<64x128xf32, #tpu.memory_space<vmem>>, vector<64x128xf32>
    %cst = arith.constant dense<0.000000e+00> : vector<64xf32>
    %1 = vector.multi_reduction <add>, %0, %cst [1] : vector<64x128xf32> to vector<64xf32>
    %2 = vector.shape_cast %1 : vector<64xf32> to vector<64x1xf32>
    %cst_1 = arith.constant 1.280000e+02 : f32
    %3 = vector.broadcast %cst_1 : f32 to vector<64x1xf32>
    %4 = arith.divf %2, %3 : vector<64x1xf32>
    %5 = vector.broadcast %4 : vector<64x1xf32> to vector<64x128xf32>
    %6 = arith.subf %0, %5 : vector<64x128xf32>
    %7 = arith.mulf %6, %6 : vector<64x128xf32>
    %cst_2 = arith.constant dense<0.000000e+00> : vector<64xf32>
    %8 = vector.multi_reduction <add>, %7, %cst_2 [1] : vector<64x128xf32> to vector<64xf32>
    %9 = vector.shape_cast %8 : vector<64xf32> to vector<64x1xf32>
    %cst_3 = arith.constant 1.280000e+02 : f32
    %10 = vector.broadcast %cst_3 : f32 to vector<64x1xf32>
    %11 = arith.divf %9, %10 : vector<64x1xf32>
    %cst_4 = arith.constant 9.99999974E-6 : f32
    %12 = vector.broadcast %cst_4 : f32 to vector<64x1xf32>
    %13 = arith.addf %11, %12 : vector<64x1xf32>
    %14 = math.rsqrt %13 : vector<64x1xf32>
    %15 = vector.broadcast %14 : vector<64x1xf32> to vector<64x128xf32>
    %16 = arith.mulf %6, %15 : vector<64x128xf32>
    %c0_5 = arith.constant 0 : index
    %c0_6 = arith.constant 0 : index
    %17 = vector.load %arg3[%c0_5, %c0_6] : memref<1x128xf32, #tpu.memory_space<vmem>>, vector<1x128xf32>
    %18 = vector.broadcast %17 : vector<1x128xf32> to vector<64x128xf32>
    %19 = arith.mulf %16, %18 : vector<64x128xf32>
    %c0_7 = arith.constant 0 : index
    %c0_8 = arith.constant 0 : index
    %20 = vector.load %arg4[%c0_7, %c0_8] : memref<1x128xf32, #tpu.memory_space<vmem>>, vector<1x128xf32>
    %21 = vector.broadcast %20 : vector<1x128xf32> to vector<64x128xf32>
    %22 = arith.addf %19, %21 : vector<64x128xf32>
    %23 = arith.truncf %22 : vector<64x128xf32> to vector<64x128xbf16>
    %c0_9 = arith.constant 0 : index
    %c0_10 = arith.constant 0 : index
    %24 = vector.load %arg5[%c0_9, %c0_10] : memref<128x128xbf16, #tpu.memory_space<vmem>>, vector<128x128xbf16>
    %cst_11 = arith.constant dense<0.000000e+00> : vector<64x128xf32>
    %25 = tpu.matmul %23, %24, %cst_11 {dimension_numbers = #tpu.dot_dimension_numbers<[1], [0], [0], [1], [0, 0, 1, 1], [], []>} : vector<64x128xbf16>, vector<128x128xbf16>, vector<64x128xf32> -> vector<64x128xf32>
    %c0_12 = arith.constant 0 : index
    %c0_13 = arith.constant 0 : index
    %26 = vector.load %arg6[%c0_12, %c0_13] : memref<1x128xf32, #tpu.memory_space<vmem>>, vector<1x128xf32>
    %27 = vector.broadcast %26 : vector<1x128xf32> to vector<64x128xf32>
    %28 = arith.addf %25, %27 : vector<64x128xf32>
    %29 = arith.truncf %28 : vector<64x128xf32> to vector<64x128xbf16>
    %c0_14 = arith.constant 0 : index
    %c0_15 = arith.constant 0 : index
    %30 = vector.load %arg7[%c0_14, %c0_15] : memref<64x128xbf16, #tpu.memory_space<vmem>>, vector<64x128xbf16>
    tpu.vector_store %arg7[%c0_14, %c0_15], %29 {strides = array<i32>} : memref<64x128xbf16, #tpu.memory_space<vmem>>, vector<64x128xbf16>,
    return
  }
  func.func @transform_0(%arg0: i32, %arg1: i32) -> (i32, i32) {
    %c0_i32 = arith.constant 0 : i32
    %c0_i32_0 = arith.constant 0 : i32
    return %arg0, %c0_i32 : i32, i32
  }
  func.func @transform_1(%arg0: i32, %arg1: i32) -> (i32, i32) {
    %c0_i32 = arith.constant 0 : i32
    %c0_i32_0 = arith.constant 0 : i32
    %c0_i32_1 = arith.constant 0 : i32
    return %c0_i32, %c0_i32_0 : i32, i32
  }
  func.func @transform_2(%arg0: i32, %arg1: i32) -> (i32, i32) {
    %c0_i32 = arith.constant 0 : i32
    %c0_i32_0 = arith.constant 0 : i32
    %c0_i32_1 = arith.constant 0 : i32
    return %c0_i32, %c0_i32_0 : i32, i32
  }
  func.func @transform_3(%arg0: i32, %arg1: i32) -> (i32, i32) {
    %c0_i32 = arith.constant 0 : i32
    %c0_i32_0 = arith.constant 0 : i32
    return %c0_i32, %arg1 : i32, i32
  }
  func.func @transform_4(%arg0: i32, %arg1: i32) -> (i32, i32) {
    %c0_i32 = arith.constant 0 : i32
    %c0_i32_0 = arith.constant 0 : i32
    return %c0_i32, %arg1 : i32, i32
  }
  func.func @transform_5(%arg0: i32, %arg1: i32) -> (i32, i32) {
    %c0_i32 = arith.constant 0 : i32
    return %arg0, %arg1 : i32, i32
  }
}

module attributes {stable_mosaic.version = 11 : i64} {
  func.func @_attn_kernel(%arg0: i32, %arg1: i32, %arg2: memref<1x32x128xbf16, #tpu.memory_space<vmem>>, %arg3: memref<1x32x128xbf16, #tpu.memory_space<vmem>>, %arg4: memref<1x32x128xbf16, #tpu.memory_space<vmem>>, %arg5: memref<1x32x128xbf16, #tpu.memory_space<vmem>>) attributes {dimension_semantics = [#tpu.dimension_semantics<parallel>, #tpu.dimension_semantics<parallel>], iteration_bounds = array<i64: 2, 1>, scalar_prefetch = 0 : i64, scratch_operands = 0 : i64, tpu.core_type = #tpu.core_type<tc>, window_params = [{transform_indices = @transform_0, window_bounds = array<i64: 1, 32, 128>}, {transform_indices = @transform_1, window_bounds = array<i64: 1, 32, 128>}, {transform_indices = @transform_2, window_bounds = array<i64: 1, 32, 128>}, {transform_indices = @transform_3, window_bounds = array<i64: 1, 32, 128>}]} {
    %0 = tpu.iota {dimensions = array<i32: 0>} : vector<32x32xi32>
    %1 = tpu.iota {dimensions = array<i32: 1>} : vector<32x32xi32>
    %2 = arith.cmpi sle, %1, %0 : vector<32x32xi32>
    %c0 = arith.constant 0 : index
    %c0_0 = arith.constant 0 : index
    %c0_1 = arith.constant 0 : index
    %3 = vector.load %arg2[%c0, %c0_0, %c0_1] : memref<1x32x128xbf16, #tpu.memory_space<vmem>>, vector<1x32x128xbf16>
    %4 = vector.shape_cast %3 : vector<1x32x128xbf16> to vector<32x128xbf16>
    %c0_2 = arith.constant 0 : index
    %c0_3 = arith.constant 0 : index
    %c0_4 = arith.constant 0 : index
    %5 = vector.load %arg3[%c0_2, %c0_3, %c0_4] : memref<1x32x128xbf16, #tpu.memory_space<vmem>>, vector<1x32x128xbf16>
    %6 = vector.shape_cast %5 : vector<1x32x128xbf16> to vector<32x128xbf16>
    %c0_5 = arith.constant 0 : index
    %c0_6 = arith.constant 0 : index
    %c0_7 = arith.constant 0 : index
    %7 = vector.load %arg4[%c0_5, %c0_6, %c0_7] : memref<1x32x128xbf16, #tpu.memory_space<vmem>>, vector<1x32x128xbf16>
    %8 = vector.shape_cast %7 : vector<1x32x128xbf16> to vector<32x128xbf16>
    %9 = vector.extract_strided_slice %4 {offsets = [0, 0], sizes = [32, 32], strides = [1, 1]} : vector<32x128xbf16> to vector<32x32xbf16>
    %10 = vector.extract_strided_slice %6 {offsets = [0, 0], sizes = [32, 32], strides = [1, 1]} : vector<32x128xbf16> to vector<32x32xbf16>
    %11 = vector.extract_strided_slice %8 {offsets = [0, 0], sizes = [32, 32], strides = [1, 1]} : vector<32x128xbf16> to vector<32x32xbf16>
    %cst = arith.constant dense<0.000000e+00> : vector<32x32xf32>
    %12 = tpu.matmul %9, %10, %cst {dimension_numbers = #tpu.dot_dimension_numbers<[1], [1], [0], [0], [0, 0, 1, 0], [], []>} : vector<32x32xbf16>, vector<32x32xbf16>, vector<32x32xf32> -> vector<32x32xf32>
    %cst_8 = arith.constant -1.000000e+30 : f32
    %13 = vector.broadcast %cst_8 : f32 to vector<32x32xf32>
    %14 = arith.select %2, %12, %13 : vector<32x32xi1>, vector<32x32xf32>
    %cst_9 = arith.constant dense<0xFF800000> : vector<32xf32>
    %15 = vector.multi_reduction <maximumf>, %14, %cst_9 [1] : vector<32x32xf32> to vector<32xf32>
    %16 = vector.shape_cast %15 : vector<32xf32> to vector<32x1xf32>
    %17 = vector.broadcast %16 : vector<32x1xf32> to vector<32x32xf32>
    %18 = arith.subf %14, %17 : vector<32x32xf32>
    %19 = math.exp %18 : vector<32x32xf32>
    %cst_10 = arith.constant dense<0.000000e+00> : vector<32xf32>
    %20 = vector.multi_reduction <add>, %19, %cst_10 [1] : vector<32x32xf32> to vector<32xf32>
    %21 = vector.shape_cast %20 : vector<32xf32> to vector<32x1xf32>
    %22 = tpu.reciprocal %21 {approx = true} : vector<32x1xf32> -> vector<32x1xf32>
    %23 = vector.broadcast %22 : vector<32x1xf32> to vector<32x32xf32>
    %24 = arith.mulf %19, %23 : vector<32x32xf32>
    %25 = arith.truncf %24 : vector<32x32xf32> to vector<32x32xbf16>
    %cst_11 = arith.constant dense<0.000000e+00> : vector<32x32xf32>
    %26 = tpu.matmul %25, %11, %cst_11 {dimension_numbers = #tpu.dot_dimension_numbers<[1], [0], [0], [1], [0, 0, 1, 1], [], []>} : vector<32x32xbf16>, vector<32x32xbf16>, vector<32x32xf32> -> vector<32x32xf32>
    %27 = vector.extract_strided_slice %4 {offsets = [0, 32], sizes = [32, 32], strides = [1, 1]} : vector<32x128xbf16> to vector<32x32xbf16>
    %28 = vector.extract_strided_slice %6 {offsets = [0, 32], sizes = [32, 32], strides = [1, 1]} : vector<32x128xbf16> to vector<32x32xbf16>
    %29 = vector.extract_strided_slice %8 {offsets = [0, 32], sizes = [32, 32], strides = [1, 1]} : vector<32x128xbf16> to vector<32x32xbf16>
    %cst_12 = arith.constant dense<0.000000e+00> : vector<32x32xf32>
    %30 = tpu.matmul %27, %28, %cst_12 {dimension_numbers = #tpu.dot_dimension_numbers<[1], [1], [0], [0], [0, 0, 1, 0], [], []>} : vector<32x32xbf16>, vector<32x32xbf16>, vector<32x32xf32> -> vector<32x32xf32>
    %cst_13 = arith.constant -1.000000e+30 : f32
    %31 = vector.broadcast %cst_13 : f32 to vector<32x32xf32>
    %32 = arith.select %2, %30, %31 : vector<32x32xi1>, vector<32x32xf32>
    %cst_14 = arith.constant dense<0xFF800000> : vector<32xf32>
    %33 = vector.multi_reduction <maximumf>, %32, %cst_14 [1] : vector<32x32xf32> to vector<32xf32>
    %34 = vector.shape_cast %33 : vector<32xf32> to vector<32x1xf32>
    %35 = vector.broadcast %34 : vector<32x1xf32> to vector<32x32xf32>
    %36 = arith.subf %32, %35 : vector<32x32xf32>
    %37 = math.exp %36 : vector<32x32xf32>
    %cst_15 = arith.constant dense<0.000000e+00> : vector<32xf32>
    %38 = vector.multi_reduction <add>, %37, %cst_15 [1] : vector<32x32xf32> to vector<32xf32>
    %39 = vector.shape_cast %38 : vector<32xf32> to vector<32x1xf32>
    %40 = tpu.reciprocal %39 {approx = true} : vector<32x1xf32> -> vector<32x1xf32>
    %41 = vector.broadcast %40 : vector<32x1xf32> to vector<32x32xf32>
    %42 = arith.mulf %37, %41 : vector<32x32xf32>
    %43 = arith.truncf %42 : vector<32x32xf32> to vector<32x32xbf16>
    %cst_16 = arith.constant dense<0.000000e+00> : vector<32x32xf32>
    %44 = tpu.matmul %43, %29, %cst_16 {dimension_numbers = #tpu.dot_dimension_numbers<[1], [0], [0], [1], [0, 0, 1, 1], [], []>} : vector<32x32xbf16>, vector<32x32xbf16>, vector<32x32xf32> -> vector<32x32xf32>
    %45 = vector.extract_strided_slice %4 {offsets = [0, 64], sizes = [32, 32], strides = [1, 1]} : vector<32x128xbf16> to vector<32x32xbf16>
    %46 = vector.extract_strided_slice %6 {offsets = [0, 64], sizes = [32, 32], strides = [1, 1]} : vector<32x128xbf16> to vector<32x32xbf16>
    %47 = vector.extract_strided_slice %8 {offsets = [0, 64], sizes = [32, 32], strides = [1, 1]} : vector<32x128xbf16> to vector<32x32xbf16>
    %cst_17 = arith.constant dense<0.000000e+00> : vector<32x32xf32>
    %48 = tpu.matmul %45, %46, %cst_17 {dimension_numbers = #tpu.dot_dimension_numbers<[1], [1], [0], [0], [0, 0, 1, 0], [], []>} : vector<32x32xbf16>, vector<32x32xbf16>, vector<32x32xf32> -> vector<32x32xf32>
    %cst_18 = arith.constant -1.000000e+30 : f32
    %49 = vector.broadcast %cst_18 : f32 to vector<32x32xf32>
    %50 = arith.select %2, %48, %49 : vector<32x32xi1>, vector<32x32xf32>
    %cst_19 = arith.constant dense<0xFF800000> : vector<32xf32>
    %51 = vector.multi_reduction <maximumf>, %50, %cst_19 [1] : vector<32x32xf32> to vector<32xf32>
    %52 = vector.shape_cast %51 : vector<32xf32> to vector<32x1xf32>
    %53 = vector.broadcast %52 : vector<32x1xf32> to vector<32x32xf32>
    %54 = arith.subf %50, %53 : vector<32x32xf32>
    %55 = math.exp %54 : vector<32x32xf32>
    %cst_20 = arith.constant dense<0.000000e+00> : vector<32xf32>
    %56 = vector.multi_reduction <add>, %55, %cst_20 [1] : vector<32x32xf32> to vector<32xf32>
    %57 = vector.shape_cast %56 : vector<32xf32> to vector<32x1xf32>
    %58 = tpu.reciprocal %57 {approx = true} : vector<32x1xf32> -> vector<32x1xf32>
    %59 = vector.broadcast %58 : vector<32x1xf32> to vector<32x32xf32>
    %60 = arith.mulf %55, %59 : vector<32x32xf32>
    %61 = arith.truncf %60 : vector<32x32xf32> to vector<32x32xbf16>
    %cst_21 = arith.constant dense<0.000000e+00> : vector<32x32xf32>
    %62 = tpu.matmul %61, %47, %cst_21 {dimension_numbers = #tpu.dot_dimension_numbers<[1], [0], [0], [1], [0, 0, 1, 1], [], []>} : vector<32x32xbf16>, vector<32x32xbf16>, vector<32x32xf32> -> vector<32x32xf32>
    %63 = vector.extract_strided_slice %4 {offsets = [0, 96], sizes = [32, 32], strides = [1, 1]} : vector<32x128xbf16> to vector<32x32xbf16>
    %64 = vector.extract_strided_slice %6 {offsets = [0, 96], sizes = [32, 32], strides = [1, 1]} : vector<32x128xbf16> to vector<32x32xbf16>
    %65 = vector.extract_strided_slice %8 {offsets = [0, 96], sizes = [32, 32], strides = [1, 1]} : vector<32x128xbf16> to vector<32x32xbf16>
    %cst_22 = arith.constant dense<0.000000e+00> : vector<32x32xf32>
    %66 = tpu.matmul %63, %64, %cst_22 {dimension_numbers = #tpu.dot_dimension_numbers<[1], [1], [0], [0], [0, 0, 1, 0], [], []>} : vector<32x32xbf16>, vector<32x32xbf16>, vector<32x32xf32> -> vector<32x32xf32>
    %cst_23 = arith.constant -1.000000e+30 : f32
    %67 = vector.broadcast %cst_23 : f32 to vector<32x32xf32>
    %68 = arith.select %2, %66, %67 : vector<32x32xi1>, vector<32x32xf32>
    %cst_24 = arith.constant dense<0xFF800000> : vector<32xf32>
    %69 = vector.multi_reduction <maximumf>, %68, %cst_24 [1] : vector<32x32xf32> to vector<32xf32>
    %70 = vector.shape_cast %69 : vector<32xf32> to vector<32x1xf32>
    %71 = vector.broadcast %70 : vector<32x1xf32> to vector<32x32xf32>
    %72 = arith.subf %68, %71 : vector<32x32xf32>
    %73 = math.exp %72 : vector<32x32xf32>
    %cst_25 = arith.constant dense<0.000000e+00> : vector<32xf32>
    %74 = vector.multi_reduction <add>, %73, %cst_25 [1] : vector<32x32xf32> to vector<32xf32>
    %75 = vector.shape_cast %74 : vector<32xf32> to vector<32x1xf32>
    %76 = tpu.reciprocal %75 {approx = true} : vector<32x1xf32> -> vector<32x1xf32>
    %77 = vector.broadcast %76 : vector<32x1xf32> to vector<32x32xf32>
    %78 = arith.mulf %73, %77 : vector<32x32xf32>
    %79 = arith.truncf %78 : vector<32x32xf32> to vector<32x32xbf16>
    %cst_26 = arith.constant dense<0.000000e+00> : vector<32x32xf32>
    %80 = tpu.matmul %79, %65, %cst_26 {dimension_numbers = #tpu.dot_dimension_numbers<[1], [0], [0], [1], [0, 0, 1, 1], [], []>} : vector<32x32xbf16>, vector<32x32xbf16>, vector<32x32xf32> -> vector<32x32xf32>
    %81 = tpu.concatenate %26, %44, %62, %80 in 1 : vector<32x32xf32>, vector<32x32xf32>, vector<32x32xf32>, vector<32x32xf32> -> vector<32x128xf32>
    %82 = arith.truncf %81 : vector<32x128xf32> to vector<32x128xbf16>
    %c0_27 = arith.constant 0 : index
    %c0_28 = arith.constant 0 : index
    %c0_29 = arith.constant 0 : index
    %83 = vector.load %arg5[%c0_27, %c0_28, %c0_29] : memref<1x32x128xbf16, #tpu.memory_space<vmem>>, vector<1x32x128xbf16>
    %84 = vector.shape_cast %83 : vector<1x32x128xbf16> to vector<32x128xbf16>
    %85 = vector.shape_cast %82 : vector<32x128xbf16> to vector<1x32x128xbf16>
    tpu.vector_store %arg5[%c0_27, %c0_28, %c0_29], %85 {strides = array<i32>} : memref<1x32x128xbf16, #tpu.memory_space<vmem>>, vector<1x32x128xbf16>,
    return
  }
  func.func @transform_0(%arg0: i32, %arg1: i32) -> (i32, i32, i32) {
    %c0_i32 = arith.constant 0 : i32
    %c0_i32_0 = arith.constant 0 : i32
    return %arg0, %c0_i32, %arg1 : i32, i32, i32
  }
  func.func @transform_1(%arg0: i32, %arg1: i32) -> (i32, i32, i32) {
    %c1_i32 = arith.constant 1 : i32
    %0 = arith.addi %c1_i32, %arg1 : i32
    %c0_i32 = arith.constant 0 : i32
    %c0_i32_0 = arith.constant 0 : i32
    return %arg0, %c0_i32, %0 : i32, i32, i32
  }
  func.func @transform_2(%arg0: i32, %arg1: i32) -> (i32, i32, i32) {
    %c2_i32 = arith.constant 2 : i32
    %0 = arith.addi %c2_i32, %arg1 : i32
    %c0_i32 = arith.constant 0 : i32
    %c0_i32_0 = arith.constant 0 : i32
    return %arg0, %c0_i32, %0 : i32, i32, i32
  }
  func.func @transform_3(%arg0: i32, %arg1: i32) -> (i32, i32, i32) {
    %c0_i32 = arith.constant 0 : i32
    %c0_i32_0 = arith.constant 0 : i32
    return %arg0, %c0_i32, %arg1 : i32, i32, i32
  }
}

module attributes {stable_mosaic.version = 11 : i64} {
  func.func @_linear_kernel(%arg0: i32, %arg1: i32, %arg2: i32, %arg3: memref<32x128xbf16, #tpu.memory_space<vmem>>, %arg4: memref<128x128xbf16, #tpu.memory_space<vmem>>, %arg5: memref<1x128xf32, #tpu.memory_space<vmem>>, %arg6: memref<32x128xf32, #tpu.memory_space<vmem>>, %arg7: memref<32x128xf32, #tpu.memory_space<vmem>>, %arg8: memref<32x128xf32, #tpu.memory_space<vmem>>) attributes {dimension_semantics = [#tpu.dimension_semantics<parallel>, #tpu.dimension_semantics<parallel>, #tpu.dimension_semantics<arbitrary>], iteration_bounds = array<i64: 2, 1, 1>, scalar_prefetch = 0 : i64, scratch_operands = 1 : i64, tpu.core_type = #tpu.core_type<tc>, window_params = [{transform_indices = @transform_0, window_bounds = array<i64: 32, 128>}, {transform_indices = @transform_1, window_bounds = array<i64: 128, 128>}, {transform_indices = @transform_2, window_bounds = array<i64: 1, 128>}, {transform_indices = @transform_3, window_bounds = array<i64: 32, 128>}, {transform_indices = @transform_4, window_bounds = array<i64: 32, 128>}]} {
    %c0_i32 = arith.constant 0 : i32
    %0 = arith.cmpi eq, %arg2, %c0_i32 : i32
    %1 = arith.extui %0 : i1 to i32
    %c0_i32_0 = arith.constant 0 : i32
    %2 = arith.cmpi ne, %1, %c0_i32_0 : i32
    scf.if %2 {
      %cst_10 = arith.constant 0.000000e+00 : f32
      %12 = vector.broadcast %cst_10 : f32 to vector<32x128xf32>
      %c0_11 = arith.constant 0 : index
      %c0_12 = arith.constant 0 : index
      %13 = vector.load %arg8[%c0_11, %c0_12] : memref<32x128xf32, #tpu.memory_space<vmem>>, vector<32x128xf32>
      tpu.vector_store %arg8[%c0_11, %c0_12], %12 {strides = array<i32>} : memref<32x128xf32, #tpu.memory_space<vmem>>, vector<32x128xf32>,
    } else {
    }
    %c0 = arith.constant 0 : index
    %c0_1 = arith.constant 0 : index
    %3 = vector.load %arg8[%c0, %c0_1] : memref<32x128xf32, #tpu.memory_space<vmem>>, vector<32x128xf32>
    %c0_2 = arith.constant 0 : index
    %c0_3 = arith.constant 0 : index
    %4 = vector.load %arg3[%c0_2, %c0_3] : memref<32x128xbf16, #tpu.memory_space<vmem>>, vector<32x128xbf16>
    %c0_4 = arith.constant 0 : index
    %c0_5 = arith.constant 0 : index
    %5 = vector.load %arg4[%c0_4, %c0_5] : memref<128x128xbf16, #tpu.memory_space<vmem>>, vector<128x128xbf16>
    %cst = arith.constant dense<0.000000e+00> : vector<32x128xf32>
    %6 = tpu.matmul %4, %5, %cst {dimension_numbers = #tpu.dot_dimension_numbers<[1], [0], [0], [1], [0, 0, 1, 1], [], []>} : vector<32x128xbf16>, vector<128x128xbf16>, vector<32x128xf32> -> vector<32x128xf32>
    %7 = arith.addf %3, %6 : vector<32x128xf32>
    %c0_6 = arith.constant 0 : index
    %c0_7 = arith.constant 0 : index
    %8 = vector.load %arg8[%c0_6, %c0_7] : memref<32x128xf32, #tpu.memory_space<vmem>>, vector<32x128xf32>
    tpu.vector_store %arg8[%c0_6, %c0_7], %7 {strides = array<i32>} : memref<32x128xf32, #tpu.memory_space<vmem>>, vector<32x128xf32>,
    %c0_i32_8 = arith.constant 0 : i32
    %9 = arith.cmpi eq, %arg2, %c0_i32_8 : i32
    %10 = arith.extui %9 : i1 to i32
    %c0_i32_9 = arith.constant 0 : i32
    %11 = arith.cmpi ne, %10, %c0_i32_9 : i32
    scf.if %11 {
      %c0_10 = arith.constant 0 : index
      %c0_11 = arith.constant 0 : index
      %12 = vector.load %arg8[%c0_10, %c0_11] : memref<32x128xf32, #tpu.memory_space<vmem>>, vector<32x128xf32>
      %c0_12 = arith.constant 0 : index
      %c0_13 = arith.constant 0 : index
      %13 = vector.load %arg5[%c0_12, %c0_13] : memref<1x128xf32, #tpu.memory_space<vmem>>, vector<1x128xf32>
      %14 = vector.broadcast %13 : vector<1x128xf32> to vector<32x128xf32>
      %15 = arith.addf %12, %14 : vector<32x128xf32>
      %c0_14 = arith.constant 0 : index
      %c0_15 = arith.constant 0 : index
      %16 = vector.load %arg6[%c0_14, %c0_15] : memref<32x128xf32, #tpu.memory_space<vmem>>, vector<32x128xf32>
      %17 = arith.addf %15, %16 : vector<32x128xf32>
      %c0_16 = arith.constant 0 : index
      %c0_17 = arith.constant 0 : index
      %18 = vector.load %arg7[%c0_16, %c0_17] : memref<32x128xf32, #tpu.memory_space<vmem>>, vector<32x128xf32>
      tpu.vector_store %arg7[%c0_16, %c0_17], %17 {strides = array<i32>} : memref<32x128xf32, #tpu.memory_space<vmem>>, vector<32x128xf32>,
    } else {
    }
    return
  }
  func.func @transform_0(%arg0: i32, %arg1: i32, %arg2: i32) -> (i32, i32) {
    %c0_i32 = arith.constant 0 : i32
    return %arg0, %arg2 : i32, i32
  }
  func.func @transform_1(%arg0: i32, %arg1: i32, %arg2: i32) -> (i32, i32) {
    %c0_i32 = arith.constant 0 : i32
    return %arg2, %arg1 : i32, i32
  }
  func.func @transform_2(%arg0: i32, %arg1: i32, %arg2: i32) -> (i32, i32) {
    %c0_i32 = arith.constant 0 : i32
    %c0_i32_0 = arith.constant 0 : i32
    return %c0_i32, %arg1 : i32, i32
  }
  func.func @transform_3(%arg0: i32, %arg1: i32, %arg2: i32) -> (i32, i32) {
    %c0_i32 = arith.constant 0 : i32
    return %arg0, %arg1 : i32, i32
  }
  func.func @transform_4(%arg0: i32, %arg1: i32, %arg2: i32) -> (i32, i32) {
    %c0_i32 = arith.constant 0 : i32
    return %arg0, %arg1 : i32, i32
  }
}

module attributes {stable_mosaic.version = 11 : i64} {
  func.func @_ln_linear_kernel(%arg0: i32, %arg1: i32, %arg2: memref<64x128xf32, #tpu.memory_space<vmem>>, %arg3: memref<1x128xf32, #tpu.memory_space<vmem>>, %arg4: memref<1x128xf32, #tpu.memory_space<vmem>>, %arg5: memref<128x256xbf16, #tpu.memory_space<vmem>>, %arg6: memref<1x256xf32, #tpu.memory_space<vmem>>, %arg7: memref<64x256xbf16, #tpu.memory_space<vmem>>) attributes {dimension_semantics = [#tpu.dimension_semantics<parallel>, #tpu.dimension_semantics<parallel>], iteration_bounds = array<i64: 1, 2>, scalar_prefetch = 0 : i64, scratch_operands = 0 : i64, tpu.core_type = #tpu.core_type<tc>, window_params = [{transform_indices = @transform_0, window_bounds = array<i64: 64, 128>}, {pipeline_mode = #tpu.pipeline_mode<synchronous>, transform_indices = @transform_1, window_bounds = array<i64: 1, 128>}, {pipeline_mode = #tpu.pipeline_mode<synchronous>, transform_indices = @transform_2, window_bounds = array<i64: 1, 128>}, {transform_indices = @transform_3, window_bounds = array<i64: 128, 256>}, {transform_indices = @transform_4, window_bounds = array<i64: 1, 256>}, {transform_indices = @transform_5, window_bounds = array<i64: 64, 256>}]} {
    %c0 = arith.constant 0 : index
    %c0_0 = arith.constant 0 : index
    %0 = vector.load %arg2[%c0, %c0_0] : memref<64x128xf32, #tpu.memory_space<vmem>>, vector<64x128xf32>
    %cst = arith.constant dense<0.000000e+00> : vector<64xf32>
    %1 = vector.multi_reduction <add>, %0, %cst [1] : vector<64x128xf32> to vector<64xf32>
    %2 = vector.shape_cast %1 : vector<64xf32> to vector<64x1xf32>
    %cst_1 = arith.constant 1.280000e+02 : f32
    %3 = vector.broadcast %cst_1 : f32 to vector<64x1xf32>
    %4 = arith.divf %2, %3 : vector<64x1xf32>
    %5 = vector.broadcast %4 : vector<64x1xf32> to vector<64x128xf32>
    %6 = arith.subf %0, %5 : vector<64x128xf32>
    %7 = arith.mulf %6, %6 : vector<64x128xf32>
    %cst_2 = arith.constant dense<0.000000e+00> : vector<64xf32>
    %8 = vector.multi_reduction <add>, %7, %cst_2 [1] : vector<64x128xf32> to vector<64xf32>
    %9 = vector.shape_cast %8 : vector<64xf32> to vector<64x1xf32>
    %cst_3 = arith.constant 1.280000e+02 : f32
    %10 = vector.broadcast %cst_3 : f32 to vector<64x1xf32>
    %11 = arith.divf %9, %10 : vector<64x1xf32>
    %cst_4 = arith.constant 9.99999974E-6 : f32
    %12 = vector.broadcast %cst_4 : f32 to vector<64x1xf32>
    %13 = arith.addf %11, %12 : vector<64x1xf32>
    %14 = math.rsqrt %13 : vector<64x1xf32>
    %15 = vector.broadcast %14 : vector<64x1xf32> to vector<64x128xf32>
    %16 = arith.mulf %6, %15 : vector<64x128xf32>
    %c0_5 = arith.constant 0 : index
    %c0_6 = arith.constant 0 : index
    %17 = vector.load %arg3[%c0_5, %c0_6] : memref<1x128xf32, #tpu.memory_space<vmem>>, vector<1x128xf32>
    %18 = vector.broadcast %17 : vector<1x128xf32> to vector<64x128xf32>
    %19 = arith.mulf %16, %18 : vector<64x128xf32>
    %c0_7 = arith.constant 0 : index
    %c0_8 = arith.constant 0 : index
    %20 = vector.load %arg4[%c0_7, %c0_8] : memref<1x128xf32, #tpu.memory_space<vmem>>, vector<1x128xf32>
    %21 = vector.broadcast %20 : vector<1x128xf32> to vector<64x128xf32>
    %22 = arith.addf %19, %21 : vector<64x128xf32>
    %23 = arith.truncf %22 : vector<64x128xf32> to vector<64x128xbf16>
    %c0_9 = arith.constant 0 : index
    %c0_10 = arith.constant 0 : index
    %24 = vector.load %arg5[%c0_9, %c0_10] : memref<128x256xbf16, #tpu.memory_space<vmem>>, vector<128x256xbf16>
    %cst_11 = arith.constant dense<0.000000e+00> : vector<64x256xf32>
    %25 = tpu.matmul %23, %24, %cst_11 {dimension_numbers = #tpu.dot_dimension_numbers<[1], [0], [0], [1], [0, 0, 1, 1], [], []>} : vector<64x128xbf16>, vector<128x256xbf16>, vector<64x256xf32> -> vector<64x256xf32>
    %c0_12 = arith.constant 0 : index
    %c0_13 = arith.constant 0 : index
    %26 = vector.load %arg6[%c0_12, %c0_13] : memref<1x256xf32, #tpu.memory_space<vmem>>, vector<1x256xf32>
    %27 = vector.broadcast %26 : vector<1x256xf32> to vector<64x256xf32>
    %28 = arith.addf %25, %27 : vector<64x256xf32>
    %cst_14 = arith.constant 5.000000e-01 : f32
    %29 = vector.broadcast %cst_14 : f32 to vector<64x256xf32>
    %30 = arith.mulf %29, %28 : vector<64x256xf32>
    %cst_15 = arith.constant 4.471500e-02 : f32
    %31 = vector.broadcast %cst_15 : f32 to vector<64x256xf32>
    %32 = arith.mulf %31, %28 : vector<64x256xf32>
    %33 = arith.mulf %32, %28 : vector<64x256xf32>
    %34 = arith.mulf %33, %28 : vector<64x256xf32>
    %35 = arith.addf %28, %34 : vector<64x256xf32>
    %cst_16 = arith.constant 0.797884583 : f32
    %36 = vector.broadcast %cst_16 : f32 to vector<64x256xf32>
    %37 = arith.mulf %36, %35 : vector<64x256xf32>
    %38 = math.tanh %37 : vector<64x256xf32>
    %cst_17 = arith.constant 1.000000e+00 : f32
    %39 = vector.broadcast %cst_17 : f32 to vector<64x256xf32>
    %40 = arith.addf %39, %38 : vector<64x256xf32>
    %41 = arith.mulf %30, %40 : vector<64x256xf32>
    %42 = arith.truncf %41 : vector<64x256xf32> to vector<64x256xbf16>
    %c0_18 = arith.constant 0 : index
    %c0_19 = arith.constant 0 : index
    %43 = vector.load %arg7[%c0_18, %c0_19] : memref<64x256xbf16, #tpu.memory_space<vmem>>, vector<64x256xbf16>
    tpu.vector_store %arg7[%c0_18, %c0_19], %42 {strides = array<i32>} : memref<64x256xbf16, #tpu.memory_space<vmem>>, vector<64x256xbf16>,
    return
  }
  func.func @transform_0(%arg0: i32, %arg1: i32) -> (i32, i32) {
    %c0_i32 = arith.constant 0 : i32
    %c0_i32_0 = arith.constant 0 : i32
    return %arg0, %c0_i32 : i32, i32
  }
  func.func @transform_1(%arg0: i32, %arg1: i32) -> (i32, i32) {
    %c0_i32 = arith.constant 0 : i32
    %c0_i32_0 = arith.constant 0 : i32
    %c0_i32_1 = arith.constant 0 : i32
    return %c0_i32, %c0_i32_0 : i32, i32
  }
  func.func @transform_2(%arg0: i32, %arg1: i32) -> (i32, i32) {
    %c0_i32 = arith.constant 0 : i32
    %c0_i32_0 = arith.constant 0 : i32
    %c0_i32_1 = arith.constant 0 : i32
    return %c0_i32, %c0_i32_0 : i32, i32
  }
  func.func @transform_3(%arg0: i32, %arg1: i32) -> (i32, i32) {
    %c0_i32 = arith.constant 0 : i32
    %c0_i32_0 = arith.constant 0 : i32
    return %c0_i32, %arg1 : i32, i32
  }
  func.func @transform_4(%arg0: i32, %arg1: i32) -> (i32, i32) {
    %c0_i32 = arith.constant 0 : i32
    %c0_i32_0 = arith.constant 0 : i32
    return %c0_i32, %arg1 : i32, i32
  }
  func.func @transform_5(%arg0: i32, %arg1: i32) -> (i32, i32) {
    %c0_i32 = arith.constant 0 : i32
    return %arg0, %arg1 : i32, i32
  }
}

module attributes {stable_mosaic.version = 11 : i64} {
  func.func @_linear_kernel(%arg0: i32, %arg1: i32, %arg2: i32, %arg3: memref<32x512xbf16, #tpu.memory_space<vmem>>, %arg4: memref<512x128xbf16, #tpu.memory_space<vmem>>, %arg5: memref<1x128xf32, #tpu.memory_space<vmem>>, %arg6: memref<32x128xf32, #tpu.memory_space<vmem>>, %arg7: memref<32x128xf32, #tpu.memory_space<vmem>>, %arg8: memref<32x128xf32, #tpu.memory_space<vmem>>) attributes {dimension_semantics = [#tpu.dimension_semantics<parallel>, #tpu.dimension_semantics<parallel>, #tpu.dimension_semantics<arbitrary>], iteration_bounds = array<i64: 2, 1, 1>, scalar_prefetch = 0 : i64, scratch_operands = 1 : i64, tpu.core_type = #tpu.core_type<tc>, window_params = [{transform_indices = @transform_0, window_bounds = array<i64: 32, 512>}, {transform_indices = @transform_1, window_bounds = array<i64: 512, 128>}, {transform_indices = @transform_2, window_bounds = array<i64: 1, 128>}, {transform_indices = @transform_3, window_bounds = array<i64: 32, 128>}, {transform_indices = @transform_4, window_bounds = array<i64: 32, 128>}]} {
    %c0_i32 = arith.constant 0 : i32
    %0 = arith.cmpi eq, %arg2, %c0_i32 : i32
    %1 = arith.extui %0 : i1 to i32
    %c0_i32_0 = arith.constant 0 : i32
    %2 = arith.cmpi ne, %1, %c0_i32_0 : i32
    scf.if %2 {
      %cst_10 = arith.constant 0.000000e+00 : f32
      %12 = vector.broadcast %cst_10 : f32 to vector<32x128xf32>
      %c0_11 = arith.constant 0 : index
      %c0_12 = arith.constant 0 : index
      %13 = vector.load %arg8[%c0_11, %c0_12] : memref<32x128xf32, #tpu.memory_space<vmem>>, vector<32x128xf32>
      tpu.vector_store %arg8[%c0_11, %c0_12], %12 {strides = array<i32>} : memref<32x128xf32, #tpu.memory_space<vmem>>, vector<32x128xf32>,
    } else {
    }
    %c0 = arith.constant 0 : index
    %c0_1 = arith.constant 0 : index
    %3 = vector.load %arg8[%c0, %c0_1] : memref<32x128xf32, #tpu.memory_space<vmem>>, vector<32x128xf32>
    %c0_2 = arith.constant 0 : index
    %c0_3 = arith.constant 0 : index
    %4 = vector.load %arg3[%c0_2, %c0_3] : memref<32x512xbf16, #tpu.memory_space<vmem>>, vector<32x512xbf16>
    %c0_4 = arith.constant 0 : index
    %c0_5 = arith.constant 0 : index
    %5 = vector.load %arg4[%c0_4, %c0_5] : memref<512x128xbf16, #tpu.memory_space<vmem>>, vector<512x128xbf16>
    %cst = arith.constant dense<0.000000e+00> : vector<32x128xf32>
    %6 = tpu.matmul %4, %5, %cst {dimension_numbers = #tpu.dot_dimension_numbers<[1], [0], [0], [1], [0, 0, 1, 1], [], []>} : vector<32x512xbf16>, vector<512x128xbf16>, vector<32x128xf32> -> vector<32x128xf32>
    %7 = arith.addf %3, %6 : vector<32x128xf32>
    %c0_6 = arith.constant 0 : index
    %c0_7 = arith.constant 0 : index
    %8 = vector.load %arg8[%c0_6, %c0_7] : memref<32x128xf32, #tpu.memory_space<vmem>>, vector<32x128xf32>
    tpu.vector_store %arg8[%c0_6, %c0_7], %7 {strides = array<i32>} : memref<32x128xf32, #tpu.memory_space<vmem>>, vector<32x128xf32>,
    %c0_i32_8 = arith.constant 0 : i32
    %9 = arith.cmpi eq, %arg2, %c0_i32_8 : i32
    %10 = arith.extui %9 : i1 to i32
    %c0_i32_9 = arith.constant 0 : i32
    %11 = arith.cmpi ne, %10, %c0_i32_9 : i32
    scf.if %11 {
      %c0_10 = arith.constant 0 : index
      %c0_11 = arith.constant 0 : index
      %12 = vector.load %arg8[%c0_10, %c0_11] : memref<32x128xf32, #tpu.memory_space<vmem>>, vector<32x128xf32>
      %c0_12 = arith.constant 0 : index
      %c0_13 = arith.constant 0 : index
      %13 = vector.load %arg5[%c0_12, %c0_13] : memref<1x128xf32, #tpu.memory_space<vmem>>, vector<1x128xf32>
      %14 = vector.broadcast %13 : vector<1x128xf32> to vector<32x128xf32>
      %15 = arith.addf %12, %14 : vector<32x128xf32>
      %c0_14 = arith.constant 0 : index
      %c0_15 = arith.constant 0 : index
      %16 = vector.load %arg6[%c0_14, %c0_15] : memref<32x128xf32, #tpu.memory_space<vmem>>, vector<32x128xf32>
      %17 = arith.addf %15, %16 : vector<32x128xf32>
      %c0_16 = arith.constant 0 : index
      %c0_17 = arith.constant 0 : index
      %18 = vector.load %arg7[%c0_16, %c0_17] : memref<32x128xf32, #tpu.memory_space<vmem>>, vector<32x128xf32>
      tpu.vector_store %arg7[%c0_16, %c0_17], %17 {strides = array<i32>} : memref<32x128xf32, #tpu.memory_space<vmem>>, vector<32x128xf32>,
    } else {
    }
    return
  }
  func.func @transform_0(%arg0: i32, %arg1: i32, %arg2: i32) -> (i32, i32) {
    %c0_i32 = arith.constant 0 : i32
    return %arg0, %arg2 : i32, i32
  }
  func.func @transform_1(%arg0: i32, %arg1: i32, %arg2: i32) -> (i32, i32) {
    %c0_i32 = arith.constant 0 : i32
    return %arg2, %arg1 : i32, i32
  }
  func.func @transform_2(%arg0: i32, %arg1: i32, %arg2: i32) -> (i32, i32) {
    %c0_i32 = arith.constant 0 : i32
    %c0_i32_0 = arith.constant 0 : i32
    return %c0_i32, %arg1 : i32, i32
  }
  func.func @transform_3(%arg0: i32, %arg1: i32, %arg2: i32) -> (i32, i32) {
    %c0_i32 = arith.constant 0 : i32
    return %arg0, %arg1 : i32, i32
  }
  func.func @transform_4(%arg0: i32, %arg1: i32, %arg2: i32) -> (i32, i32) {
    %c0_i32 = arith.constant 0 : i32
    return %arg0, %arg1 : i32, i32
  }
}

module attributes {stable_mosaic.version = 11 : i64} {
  func.func @_linear_kernel(%arg0: i32, %arg1: i32, %arg2: i32, %arg3: memref<32x512xbf16, #tpu.memory_space<vmem>>, %arg4: memref<512x128xbf16, #tpu.memory_space<vmem>>, %arg5: memref<1x128xf32, #tpu.memory_space<vmem>>, %arg6: memref<32x128xf32, #tpu.memory_space<vmem>>, %arg7: memref<32x128xf32, #tpu.memory_space<vmem>>, %arg8: memref<32x128xf32, #tpu.memory_space<vmem>>) attributes {dimension_semantics = [#tpu.dimension_semantics<parallel>, #tpu.dimension_semantics<parallel>, #tpu.dimension_semantics<arbitrary>], iteration_bounds = array<i64: 2, 1, 1>, scalar_prefetch = 0 : i64, scratch_operands = 1 : i64, tpu.core_type = #tpu.core_type<tc>, window_params = [{transform_indices = @transform_0, window_bounds = array<i64: 32, 512>}, {transform_indices = @transform_1, window_bounds = array<i64: 512, 128>}, {transform_indices = @transform_2, window_bounds = array<i64: 1, 128>}, {transform_indices = @transform_3, window_bounds = array<i64: 32, 128>}, {transform_indices = @transform_4, window_bounds = array<i64: 32, 128>}]} {
    %c0_i32 = arith.constant 0 : i32
    %0 = arith.cmpi eq, %arg2, %c0_i32 : i32
    %1 = arith.extui %0 : i1 to i32
    %c0_i32_0 = arith.constant 0 : i32
    %2 = arith.cmpi ne, %1, %c0_i32_0 : i32
    scf.if %2 {
      %cst_10 = arith.constant 0.000000e+00 : f32
      %12 = vector.broadcast %cst_10 : f32 to vector<32x128xf32>
      %c0_11 = arith.constant 0 : index
      %c0_12 = arith.constant 0 : index
      %13 = vector.load %arg8[%c0_11, %c0_12] : memref<32x128xf32, #tpu.memory_space<vmem>>, vector<32x128xf32>
      tpu.vector_store %arg8[%c0_11, %c0_12], %12 {strides = array<i32>} : memref<32x128xf32, #tpu.memory_space<vmem>>, vector<32x128xf32>,
    } else {
    }
    %c0 = arith.constant 0 : index
    %c0_1 = arith.constant 0 : index
    %3 = vector.load %arg8[%c0, %c0_1] : memref<32x128xf32, #tpu.memory_space<vmem>>, vector<32x128xf32>
    %c0_2 = arith.constant 0 : index
    %c0_3 = arith.constant 0 : index
    %4 = vector.load %arg3[%c0_2, %c0_3] : memref<32x512xbf16, #tpu.memory_space<vmem>>, vector<32x512xbf16>
    %c0_4 = arith.constant 0 : index
    %c0_5 = arith.constant 0 : index
    %5 = vector.load %arg4[%c0_4, %c0_5] : memref<512x128xbf16, #tpu.memory_space<vmem>>, vector<512x128xbf16>
    %cst = arith.constant dense<0.000000e+00> : vector<32x128xf32>
    %6 = tpu.matmul %4, %5, %cst {dimension_numbers = #tpu.dot_dimension_numbers<[1], [0], [0], [1], [0, 0, 1, 1], [], []>} : vector<32x512xbf16>, vector<512x128xbf16>, vector<32x128xf32> -> vector<32x128xf32>
    %7 = arith.addf %3, %6 : vector<32x128xf32>
    %c0_6 = arith.constant 0 : index
    %c0_7 = arith.constant 0 : index
    %8 = vector.load %arg8[%c0_6, %c0_7] : memref<32x128xf32, #tpu.memory_space<vmem>>, vector<32x128xf32>
    tpu.vector_store %arg8[%c0_6, %c0_7], %7 {strides = array<i32>} : memref<32x128xf32, #tpu.memory_space<vmem>>, vector<32x128xf32>,
    %c0_i32_8 = arith.constant 0 : i32
    %9 = arith.cmpi eq, %arg2, %c0_i32_8 : i32
    %10 = arith.extui %9 : i1 to i32
    %c0_i32_9 = arith.constant 0 : i32
    %11 = arith.cmpi ne, %10, %c0_i32_9 : i32
    scf.if %11 {
      %c0_10 = arith.constant 0 : index
      %c0_11 = arith.constant 0 : index
      %12 = vector.load %arg8[%c0_10, %c0_11] : memref<32x128xf32, #tpu.memory_space<vmem>>, vector<32x128xf32>
      %c0_12 = arith.constant 0 : index
      %c0_13 = arith.constant 0 : index
      %13 = vector.load %arg5[%c0_12, %c0_13] : memref<1x128xf32, #tpu.memory_space<vmem>>, vector<1x128xf32>
      %14 = vector.broadcast %13 : vector<1x128xf32> to vector<32x128xf32>
      %15 = arith.addf %12, %14 : vector<32x128xf32>
      %c0_14 = arith.constant 0 : index
      %c0_15 = arith.constant 0 : index
      %16 = vector.load %arg6[%c0_14, %c0_15] : memref<32x128xf32, #tpu.memory_space<vmem>>, vector<32x128xf32>
      %17 = arith.addf %15, %16 : vector<32x128xf32>
      %c0_16 = arith.constant 0 : index
      %c0_17 = arith.constant 0 : index
      %18 = vector.load %arg7[%c0_16, %c0_17] : memref<32x128xf32, #tpu.memory_space<vmem>>, vector<32x128xf32>
      tpu.vector_store %arg7[%c0_16, %c0_17], %17 {strides = array<i32>} : memref<32x128xf32, #tpu.memory_space<vmem>>, vector<32x128xf32>,
    } else {
    }
    return
  }
  func.func @transform_0(%arg0: i32, %arg1: i32, %arg2: i32) -> (i32, i32) {
    %c0_i32 = arith.constant 0 : i32
    return %arg0, %arg2 : i32, i32
  }
  func.func @transform_1(%arg0: i32, %arg1: i32, %arg2: i32) -> (i32, i32) {
    %c0_i32 = arith.constant 0 : i32
    return %arg2, %arg1 : i32, i32
  }
  func.func @transform_2(%arg0: i32, %arg1: i32, %arg2: i32) -> (i32, i32) {
    %c0_i32 = arith.constant 0 : i32
    %c0_i32_0 = arith.constant 0 : i32
    return %c0_i32, %arg1 : i32, i32
  }
  func.func @transform_3(%arg0: i32, %arg1: i32, %arg2: i32) -> (i32, i32) {
    %c0_i32 = arith.constant 0 : i32
    return %arg0, %arg1 : i32, i32
  }
  func.func @transform_4(%arg0: i32, %arg1: i32, %arg2: i32) -> (i32, i32) {
    %c0_i32 = arith.constant 0 : i32
    return %arg0, %arg1 : i32, i32
  }
}

module attributes {stable_mosaic.version = 11 : i64} {
  func.func @_ln_linear_kernel(%arg0: i32, %arg1: i32, %arg2: memref<64x128xf32, #tpu.memory_space<vmem>>, %arg3: memref<1x128xf32, #tpu.memory_space<vmem>>, %arg4: memref<1x128xf32, #tpu.memory_space<vmem>>, %arg5: memref<128x128xbf16, #tpu.memory_space<vmem>>, %arg6: memref<64x128xf32, #tpu.memory_space<vmem>>) attributes {dimension_semantics = [#tpu.dimension_semantics<parallel>, #tpu.dimension_semantics<parallel>], iteration_bounds = array<i64: 1, 2>, scalar_prefetch = 0 : i64, scratch_operands = 0 : i64, tpu.core_type = #tpu.core_type<tc>, window_params = [{transform_indices = @transform_0, window_bounds = array<i64: 64, 128>}, {pipeline_mode = #tpu.pipeline_mode<synchronous>, transform_indices = @transform_1, window_bounds = array<i64: 1, 128>}, {pipeline_mode = #tpu.pipeline_mode<synchronous>, transform_indices = @transform_2, window_bounds = array<i64: 1, 128>}, {transform_indices = @transform_3, window_bounds = array<i64: 128, 128>}, {transform_indices = @transform_4, window_bounds = array<i64: 64, 128>}]} {
    %c0 = arith.constant 0 : index
    %c0_0 = arith.constant 0 : index
    %0 = vector.load %arg2[%c0, %c0_0] : memref<64x128xf32, #tpu.memory_space<vmem>>, vector<64x128xf32>
    %cst = arith.constant dense<0.000000e+00> : vector<64xf32>
    %1 = vector.multi_reduction <add>, %0, %cst [1] : vector<64x128xf32> to vector<64xf32>
    %2 = vector.shape_cast %1 : vector<64xf32> to vector<64x1xf32>
    %cst_1 = arith.constant 1.280000e+02 : f32
    %3 = vector.broadcast %cst_1 : f32 to vector<64x1xf32>
    %4 = arith.divf %2, %3 : vector<64x1xf32>
    %5 = vector.broadcast %4 : vector<64x1xf32> to vector<64x128xf32>
    %6 = arith.subf %0, %5 : vector<64x128xf32>
    %7 = arith.mulf %6, %6 : vector<64x128xf32>
    %cst_2 = arith.constant dense<0.000000e+00> : vector<64xf32>
    %8 = vector.multi_reduction <add>, %7, %cst_2 [1] : vector<64x128xf32> to vector<64xf32>
    %9 = vector.shape_cast %8 : vector<64xf32> to vector<64x1xf32>
    %cst_3 = arith.constant 1.280000e+02 : f32
    %10 = vector.broadcast %cst_3 : f32 to vector<64x1xf32>
    %11 = arith.divf %9, %10 : vector<64x1xf32>
    %cst_4 = arith.constant 9.99999974E-6 : f32
    %12 = vector.broadcast %cst_4 : f32 to vector<64x1xf32>
    %13 = arith.addf %11, %12 : vector<64x1xf32>
    %14 = math.rsqrt %13 : vector<64x1xf32>
    %15 = vector.broadcast %14 : vector<64x1xf32> to vector<64x128xf32>
    %16 = arith.mulf %6, %15 : vector<64x128xf32>
    %c0_5 = arith.constant 0 : index
    %c0_6 = arith.constant 0 : index
    %17 = vector.load %arg3[%c0_5, %c0_6] : memref<1x128xf32, #tpu.memory_space<vmem>>, vector<1x128xf32>
    %18 = vector.broadcast %17 : vector<1x128xf32> to vector<64x128xf32>
    %19 = arith.mulf %16, %18 : vector<64x128xf32>
    %c0_7 = arith.constant 0 : index
    %c0_8 = arith.constant 0 : index
    %20 = vector.load %arg4[%c0_7, %c0_8] : memref<1x128xf32, #tpu.memory_space<vmem>>, vector<1x128xf32>
    %21 = vector.broadcast %20 : vector<1x128xf32> to vector<64x128xf32>
    %22 = arith.addf %19, %21 : vector<64x128xf32>
    %23 = arith.truncf %22 : vector<64x128xf32> to vector<64x128xbf16>
    %c0_9 = arith.constant 0 : index
    %c0_10 = arith.constant 0 : index
    %24 = vector.load %arg5[%c0_9, %c0_10] : memref<128x128xbf16, #tpu.memory_space<vmem>>, vector<128x128xbf16>
    %cst_11 = arith.constant dense<0.000000e+00> : vector<64x128xf32>
    %25 = tpu.matmul %23, %24, %cst_11 {dimension_numbers = #tpu.dot_dimension_numbers<[1], [0], [0], [1], [0, 0, 1, 1], [], []>} : vector<64x128xbf16>, vector<128x128xbf16>, vector<64x128xf32> -> vector<64x128xf32>
    %c0_12 = arith.constant 0 : index
    %c0_13 = arith.constant 0 : index
    %26 = vector.load %arg6[%c0_12, %c0_13] : memref<64x128xf32, #tpu.memory_space<vmem>>, vector<64x128xf32>
    tpu.vector_store %arg6[%c0_12, %c0_13], %25 {strides = array<i32>} : memref<64x128xf32, #tpu.memory_space<vmem>>, vector<64x128xf32>,
    return
  }
  func.func @transform_0(%arg0: i32, %arg1: i32) -> (i32, i32) {
    %c0_i32 = arith.constant 0 : i32
    %c0_i32_0 = arith.constant 0 : i32
    return %arg0, %c0_i32 : i32, i32
  }
  func.func @transform_1(%arg0: i32, %arg1: i32) -> (i32, i32) {
    %c0_i32 = arith.constant 0 : i32
    %c0_i32_0 = arith.constant 0 : i32
    %c0_i32_1 = arith.constant 0 : i32
    return %c0_i32, %c0_i32_0 : i32, i32
  }
  func.func @transform_2(%arg0: i32, %arg1: i32) -> (i32, i32) {
    %c0_i32 = arith.constant 0 : i32
    %c0_i32_0 = arith.constant 0 : i32
    %c0_i32_1 = arith.constant 0 : i32
    return %c0_i32, %c0_i32_0 : i32, i32
  }
  func.func @transform_3(%arg0: i32, %arg1: i32) -> (i32, i32) {
    %c0_i32 = arith.constant 0 : i32
    %c0_i32_0 = arith.constant 0 : i32
    return %c0_i32, %arg1 : i32, i32
  }
  func.func @transform_4(%arg0: i32, %arg1: i32) -> (i32, i32) {
    %c0_i32 = arith.constant 0 : i32
    return %arg0, %arg1 : i32, i32
  }
}

</mosaic_0001>

<bundles_post_ra>
// kernel: gpt_forward.13
= control target key start
LH: loop header
LB: loop body
LE: loop exit
PB: predicated region body
PF: predicated region fallthrough
CT: control target
= control target key end

     0   :  { %9 = vsyncpa [#allocation4], 0  ;;  %s783_s15 = smov 0   ;;  %s785_s16 = smov 0   ;;  %s829_s0 = inlined_call_operand.vmem [shape: bf16[64,128], index: 0, kind: input, shape index: {}]   ;;  %s830_s1 = inlined_call_operand.hbm [shape: bf16[128,128], index: 1, kind: input, shape index: {}]   ;;  %s831_s2 = inlined_call_operand.vmem [shape: f32[1,128], index: 2, kind: input, shape index: {}]   ;;  %s832_s3 = inlined_call_operand.vmem [shape: f32[64,128], index: 3, kind: input, shape index: {}]   ;;  %s833_s4 = inlined_call_operand.vmem [shape: f32[64,128], index: 4, kind: output, shape index: {}]  }
   0x1   :  { %s787_s17 = smov 0  }
   0x2 LB: > { %s585_s18 = sadd.s32 4294967295, %s753_s17   ;;  %s34_s19 = sadd.s32 1, %s749_s16  ;;  %s753_s17 = sphi %s787_s17, %s15_s17   ;;  %s749_s16 = sphi %s785_s16, %s835_s16   ;;  %s745_s15 = sphi %s783_s15, %s834_s15  }
   0x3   : > { %p36_p0 = scmp.ge.s32.totalorder %s34_s19, 2  ;;  %p587_p1 = scmp.ge.s32.totalorder %s753_s17, 1 }
   0x4   : > { %p177_p2 = scmp.lt.s32.totalorder %s753_s17, 3  ;;  %p667_p4 = scmp.eq.s32.totalorder %s585_s18, 0 }
   0x5   : > { %s837_s19 = smov (%p36_p0, %s34_s19), 0  ;;  %s192_s22 = sshll.u32 %s830_s1, 4  ;;  %s193_s22 = int_to_ptr.hbm [resolvable:$true] %s192_s22 }
   0x6   : > { %p178_p3 = pnand %p587_p1, %p177_p2  ;;  %s755_s23 = smov [#allocation3]  }
   0x7   : > { %s194_s24 = sshll.u32 %s755_s23, 4  ;;  %s756_s25 = smov 64   ;;  %s195_s24 = int_to_ptr.vmem [resolvable:$true] %s194_s24 }
   0x8   : > { %p663_p5 = pneg %p178_p3  ;;  %s757_s26 = smov 4  }
   0x9   : > { %240 = sbr.rel (%p178_p3) target bundleno = 187 (0xbb), region = 36 }
   0xa   : > { %p664_p6 = pnand %p667_p4, %p663_p5 }
   0xc   : > { %666 = dma.hbm_to_vmem [thread:$0]  (!%p664_p6), %s193_s22, 1024, %s195_s24, [#allocation4], %s756_s25, %s756_s25, %s757_s26  }
   0xe   : > { %740 = dma.done.wait (%p667_p4), [#allocation4], 1024  }
   0xf   : > { %742 = vsyncadd (%p667_p4), [#allocation4], 4294966272  ;;  %v650_v0 = vld [vmem:[#allocation3 + $0x38] sm:$0xff]  ;;  %v649_v1 = vld [vmem:[#allocation3 + $0x30] sm:$0xff]  ;;  %s593_s27 = sshll.u32 %s745_s15, 2 }
  0x10   : > { %407 = vmatpush.bf16.msra.mxu0 %v650_v0  ;;  %651 = vmatpush.bf16.msra.mxu1 %v650_v0  ;;  %v648_v2 = vld [vmem:[#allocation3 + $0x28] sm:$0xff]  ;;  %v647_v3 = vld [vmem:[#allocation3 + $0x20] sm:$0xff]  ;;  %v646_v4 = vld [vmem:[#allocation3 + $0x18] sm:$0xff]  ;;  %p285_p7 = scmp.lt.s32.totalorder %s593_s27, 7 }
  0x11   : > { %v645_v5 = vld [vmem:[#allocation3 + $0x10] sm:$0xff]  ;;  %v644_v6 = vld [vmem:[#allocation3 + $0x8] sm:$0xff]  ;;  %v643_v7 = vld [vmem:[#allocation3] sm:$0xff] }
  0x12   : > { %s839_s27 = smov (!%p285_p7, %s593_s27), 7  ;;  %v696_v10 = vld [vmem:[%s831_s2] ss:$0 sm:$0xff] }
  0x13   : > { %s594_s28 = sshll.u32 %s839_s27, 2  ;;  %s596_s6 = sshll.u32 %s839_s27, 3 }
  0x14   : > { %408 = vmatpush.bf16.msra.mxu0 %v649_v1  ;;  %652 = vmatpush.bf16.msra.mxu1 %v649_v1  ;;  %s291_s5 = scalar_lea.vmem %s829_s0, %s594_s28  ;;  %s304_s9 = scalar_lea.vmem %s832_s3, %s596_s6 }
  0x15   : > { %v641_v8 = vld [vmem:[%s291_s5] sm:$0xff]  ;;  %v642_v9 = vld [vmem:[%s291_s5 + $0x8] sm:$0xff]  ;;  %s313_s14 = scalar_lea.vmem %s833_s4, %s596_s6  ;;  %v451_v20 = vld [vmem:[%s304_s9 + $0x10] sm:$0xff] }
  0x16   : > { %v449_v12 = vld [vmem:[%s304_s9] sm:$0xff]  ;;  %v450_v18 = vld [vmem:[%s304_s9 + $0x8] sm:$0xff]  ;;  %v452_v23 = vld [vmem:[%s304_s9 + $0x18] sm:$0xff] }
  0x18   : > { %409 = vmatpush.bf16.msra.mxu0 %v648_v2  ;;  %653 = vmatpush.bf16.msra.mxu1 %v648_v2 }
  0x1c   : > { %410 = vmatpush.bf16.msra.mxu0 %v647_v3  ;;  %654 = vmatpush.bf16.msra.mxu1 %v647_v3 }
  0x20   : > { %411 = vmatpush.bf16.msra.mxu0 %v646_v4  ;;  %655 = vmatpush.bf16.msra.mxu1 %v646_v4 }
  0x24   : > { %412 = vmatpush.bf16.msra.mxu0 %v645_v5  ;;  %656 = vmatpush.bf16.msra.mxu1 %v645_v5 }
  0x28   : > { %413 = vmatpush.bf16.msra.mxu0 %v644_v6  ;;  %657 = vmatpush.bf16.msra.mxu1 %v644_v6 }
  0x2c   : > { %414 = vmatpush.bf16.msra.mxu0 %v643_v7  ;;  %658 = vmatpush.bf16.msra.mxu1 %v643_v7 }
  0x2f   : > { %415 = vmatmul.bf16.vlgmr.msra.gmra.mxu0 %v641_v8  ;;  %420 = vmatmul.bf16.vlgmr.msra.gmra.mxu1 %v642_v9 }
  0xac   : > { %v416_v11 = vpop.f32.mrf.mxu0  ;;  %v421_v13 = vpop.f32.mrf.mxu1 }
  0xad   : > { %v445_v14 = vadd.f32 %v696_v10, %v416_v11  ;;  %v447_v16 = vadd.f32 %v696_v10, %v421_v13 }
  0xaf   : > { %v453_v15 = vadd.f32 %v449_v12, %v445_v14  ;;  %v455_v25 = vadd.f32 %v451_v20, %v447_v16 }
  0xb1   : > { %457 = vst [vmem:[%s313_s14] sm:$0xff] %v453_v15 }
  0xb2   : > { %459 = vst [vmem:[%s313_s14 + $0x10] sm:$0xff] %v455_v25 }
  0xb4   : > { %v418_v17 = vpop.f32.mrf.mxu0  ;;  %v423_v19 = vpop.f32.mrf.mxu1 }
  0xb5   : > { %v446_v21 = vadd.f32 %v696_v10, %v418_v17  ;;  %v448_v22 = vadd.f32 %v696_v10, %v423_v19 }
  0xb7   : > { %v454_v24 = vadd.f32 %v450_v18, %v446_v21  ;;  %v456_v26 = vadd.f32 %v452_v23, %v448_v22 }
  0xb9   : > { %458 = vst [vmem:[%s313_s14 + $0x8] sm:$0xff] %v454_v24 }
  0xba   : > { %460 = vst [vmem:[%s313_s14 + $0x18] sm:$0xff] %v456_v26 }
  0xbb PF: > { %s15_s17 = sadd.s32 1, %s753_s17   ;;  %s834_s15 = smov %s749_s16 }
  0xbc   : > { %p12_p8 = scmp.ge.s32.totalorder %s15_s17, 4   ;;  %s835_s16 = smov %s837_s19 }
  0xbe   :  { %14 = sbr.rel (!%p12_p8) target bundleno = 2 (0x2), region = 86 }
  0xc3   :  { %489 = vsyncpa [#allocation4], 1 }
  0xc4   :  { %491 = vsyncpa [#allocation4 + $0x1], 1 }

// kernel: gpt_forward.11
= control target key start
LH: loop header
LB: loop body
LE: loop exit
PB: predicated region body
PF: predicated region fallthrough
CT: control target
= control target key end

     0   :  { %10 = vsyncpa [#allocation3], 0  ;;  %s1363_s0 = inlined_call_operand.vmem [shape: f32[64,128], index: 0, kind: input, shape index: {}]   ;;  %s1364_s1 = inlined_call_operand.vmem [shape: f32[1,128], index: 1, kind: input, shape index: {}]   ;;  %s1365_s2 = inlined_call_operand.vmem [shape: f32[1,128], index: 2, kind: input, shape index: {}]   ;;  %s1366_s3 = inlined_call_operand.hbm [shape: bf16[128,384], index: 3, kind: input, shape index: {}]   ;;  %s1367_s4 = inlined_call_operand.vmem [shape: f32[1,384], index: 4, kind: input, shape index: {}]   ;;  %s1368_s5 = inlined_call_operand.vmem [shape: bf16[64,384], index: 5, kind: output, shape index: {}]  }
   0x1   :  { %12 = vsyncpa [#allocation3 + $0x1], 0  ;;  %s1081_s18 = smov 0   ;;  %s1083_s19 = smov 0  }
   0x2   :  { %s1085_s20 = smov 0   ;;  %s1087_s21 = smov 0  }
   0x3   :  { %s1089_s22 = smov 0   ;;  %s1091_s23 = smov 0  }
   0x4 LB: > { %s784_s24 = sadd.s32 4294967295, %s1045_s23   ;;  %s27_s25 = sadd.s32 1, %s1041_s22  ;;  %s1045_s23 = sphi %s1091_s23, %s18_s23   ;;  %s1041_s22 = sphi %s1089_s22, %s1382_s22   ;;  %s1037_s21 = sphi %s1087_s21, %s1381_s21   ;;  %s1033_s20 = sphi %s1085_s20, %s1380_s20   ;;  %s1029_s19 = sphi %s1083_s19, %s1379_s19   ;;  %s1025_s18 = sphi %s1081_s18, %s1378_s18  }
   0x5   : > { %p28_p0 = scmp.ge.s32.totalorder %s27_s25, 3  ;;  %s105_s26 = sadd.s32 1, %s1033_s20 }
   0x6   : > { %p112_p1 = scmp.ne.s32.totalorder %s1033_s20, %s1029_s19  ;;  %p113_p2 = scmp.eq.s32.totalorder %s1045_s23, 0 }
   0x7   : > { %s1384_s25 = smov (%p28_p0, %s27_s25), 0  ;;  %p118_p4 = scmp.ne.s32.totalorder %s1029_s19, %s1025_s18 }
   0x8   : > { %p1117_p3 = por %p113_p2, %p112_p1  ;;  %s102_s28 = ssub.s32 %s1041_s22, %s1384_s25 }
   0x9   : > { %p119_p5 = scmp.eq.s32.totalorder %s784_s24, 0  ;;  %p103_p6 = scmp.eq.s32.totalorder %s102_s28, 0 }
   0xa   : > { %p170_p7 = scmp.eq.s32.totalorder %s784_s24, 2  ;;  %p891_p10 = scmp.lt.s32.totalorder %s1045_s23, 3 }
   0xb   : > { %p1124_p8 = por %p119_p5, %p118_p4  ;;  %s211_s7 = sand.u32 1, %s1033_s20  }
   0xc   : > { %s1129_s30 = scalar_select %p103_p6, %s1033_s20, %s105_s26  }
   0xd   : > { %p1131_p9 = por %p170_p7, %p112_p1  ;;  %s790_s8 = sshll.u32 %s1041_s22, 2 }
   0xe   : > { %s789_s9 = sshll.u32 %s211_s7, 6  ;;  %s219_s12 = scalar_lea.hbm %s1366_s3, %s790_s8 }
   0xf   : > { %s220_s13 = sshll.u32 %s219_s12, 4  ;;  %s215_s14 = scalar_lea.vmem [#allocation2], %s789_s9  ;;  %s221_s13 = int_to_ptr.hbm [resolvable:$true] %s220_s13 }
  0x10   : > { %s222_s15 = sshll.u32 %s215_s14, 4  ;;  %p888_p11 = pnand %p891_p10, %p1117_p3  ;;  %s223_s15 = int_to_ptr.vmem [resolvable:$true] %s222_s15 }
  0x11   : > { %p791_p12 = scmp.ge.s32.totalorder %s1045_s23, 1  ;;  %s212_s16 = scalar_lea.sflag [#allocation3], %s211_s7 }
  0x12   : > { %s1047_s17 = smov 192   ;;  %s1048_s18 = smov 64  }
  0x13   : > { %s1049_s24 = smov 4   ;;  %p236_p13 = scmp.lt.s32.totalorder %s1045_s23, 4 }
  0x14   : > { %890 = dma.hbm_to_vmem [thread:$0]  (!%p888_p11), %s221_s13, 1024, %s223_s15, %s212_s16, %s1047_s17, %s1048_s18, %s1049_s24  }
  0x15   : > { %p237_p0 = pnand %p791_p12, %p236_p13 }
  0x16   : > { %s1146_s26 = sand.u32 (!%p237_p0), 1, %s1029_s19  }
  0x17   : > { %240 = sbr.rel (%p237_p0) target bundleno = 471 (0x1d7), region = 40  ;;  %s792_s28 = sshll.u32 (!%p237_p0), %s1146_s26, 6 }
  0x18   : > { %s243_s8 = scalar_lea.sflag (!%p237_p0), [#allocation3], %s1146_s26  ;;  %s1150_s9 = scalar_lea.vmem (!%p237_p0), [#allocation2], %s792_s28 }
  0x1c   : > { %1020 = dma.done.wait (%p1124_p8), %s243_s8, 1024  }
  0x1d   : > { %1022 = vsyncadd (%p1124_p8), %s243_s8, 4294966272  ;;  %v297_v0 = vld [vmem:[%s1363_s0 + $0x30] sm:$0xff]  ;;  %v295_v1 = vld [vmem:[%s1363_s0 + $0x20] sm:$0xff]  ;;  %v1050_v8 = vmov 128.0   ;;  %p287_p1 = scmp.lt.s32.totalorder %s1037_s21, 2  ;;  %s793_s17 = sshll.u32 %s1146_s26, 5 }
  0x1e   : > { %v291_v2 = vld [vmem:[%s1363_s0] sm:$0xff]  ;;  %311 = vadd.xlane.f32.xlu1 %v297_v0  ;;  %307 = vadd.xlane.f32.xlu0 %v295_v1  ;;  %v298_v3 = vld [vmem:[%s1363_s0 + $0x38] sm:$0xff]  ;;  %v296_v4 = vld [vmem:[%s1363_s0 + $0x28] sm:$0xff]  ;;  %947 = vrcp.f32 %v1050_v8  ;;  %s280_s18 = scalar_lea.vmem [#allocation4], %s793_s17  ;;  %s827_s26 = sshll.u32 (%p1131_p9), %s1037_s21, 2 }
  0x1f   : > { %299 = vadd.xlane.f32.xlu2 %v291_v2  ;;  %v292_v5 = vld [vmem:[%s1363_s0 + $0x8] sm:$0xff]  ;;  %v293_v6 = vld [vmem:[%s1363_s0 + $0x10] sm:$0xff]  ;;  %v294_v7 = vld [vmem:[%s1363_s0 + $0x18] sm:$0xff]  ;;  %s1224_s7 = scalar_select %p287_p1, %s1037_s21, 2 }
  0x20   : > { %v837_v47 = vld [vmem:[%s1150_s9 + $0x38] sm:$0xff]  ;;  %v836_v48 = vld [vmem:[%s1150_s9 + $0x30] sm:$0xff]  ;;  %v835_v49 = vld [vmem:[%s1150_s9 + $0x28] sm:$0xff]  ;;  %s618_s8 = scalar_lea.vmem (%p1131_p9), %s1368_s5, %s827_s26 }
  0x21   : > { %s289_s12 = scalar_lea.vmem %s1367_s4, %s1224_s7  ;;  %862 = vmatpush.bf16.msra.mxu2 %v837_v47  ;;  %863 = vmatpush.bf16.msra.mxu3 %v837_v47  ;;  %v834_v50 = vld [vmem:[%s1150_s9 + $0x20] sm:$0xff]  ;;  %v833_v51 = vld [vmem:[%s1150_s9 + $0x18] sm:$0xff]  ;;  %v832_v52 = vld [vmem:[%s1150_s9 + $0x10] sm:$0xff] }
  0x22   : > { %562 = vmatpush.bf16.msra.mxu0 %v837_v47  ;;  %861 = vmatpush.bf16.msra.mxu1 %v837_v47  ;;  %v831_v55 = vld [vmem:[%s1150_s9 + $0x8] sm:$0xff]  ;;  %v830_v60 = vld [vmem:[%s1150_s9] sm:$0xff] }
  0x24   : > { %v948_v9 = vpop.eup %947 }
  0x25   : > { %v316_v10 = vmul.f32 128.0, %v948_v9  ;;  %vm320_vm0 = vweird.f32 %v948_v9  ;;  %865 = vmatpush.bf16.msra.mxu2 %v836_v48  ;;  %866 = vmatpush.bf16.msra.mxu3 %v836_v48 }
  0x26   : > { %313 = vadd.xlane.f32.xlu1 %v298_v3  ;;  %309 = vadd.xlane.f32.xlu0 %v296_v4 }
  0x27   : > { %301 = vadd.xlane.f32.xlu2 %v292_v5  ;;  %v317_v11 = vsub.f32 1.0, %v316_v10  ;;  %563 = vmatpush.bf16.msra.mxu0 %v836_v48 }
  0x28   : > { %864 = vmatpush.bf16.msra.mxu1 %v836_v48 }
  0x29   : > { %v318_v12 = vmul.f32 %v948_v9, %v317_v11  ;;  %868 = vmatpush.bf16.msra.mxu2 %v835_v49  ;;  %869 = vmatpush.bf16.msra.mxu3 %v835_v49 }
  0x2b   : > { %v319_v13 = vadd.f32 %v948_v9, %v318_v12  ;;  %564 = vmatpush.bf16.msra.mxu0 %v835_v49 }
  0x2c   : > { %867 = vmatpush.bf16.msra.mxu1 %v835_v49 }
  0x2d   : > { %v1180_v14 = vsel %vm320_vm0, %v948_v9, %v319_v13  ;;  %871 = vmatpush.bf16.msra.mxu2 %v834_v50  ;;  %872 = vmatpush.bf16.msra.mxu3 %v834_v50 }
  0x2e   : > { %303 = vadd.xlane.f32.xlu0 %v293_v6  ;;  %305 = vadd.xlane.f32.xlu1 %v294_v7 }
  0x2f   : > { %565 = vmatpush.bf16.msra.mxu0 %v834_v50 }
  0x30   : > { %870 = vmatpush.bf16.msra.mxu1 %v834_v50 }
  0x31   : > { %874 = vmatpush.bf16.msra.mxu2 %v833_v51  ;;  %875 = vmatpush.bf16.msra.mxu3 %v833_v51 }
  0x33   : > { %566 = vmatpush.bf16.msra.mxu0 %v833_v51 }
  0x34   : > { %873 = vmatpush.bf16.msra.mxu1 %v833_v51 }
  0x35   : > { %877 = vmatpush.bf16.msra.mxu2 %v832_v52  ;;  %878 = vmatpush.bf16.msra.mxu3 %v832_v52 }
  0x37   : > { %567 = vmatpush.bf16.msra.mxu0 %v832_v52 }
  0x38   : > { %876 = vmatpush.bf16.msra.mxu1 %v832_v52 }
  0x39   : > { %880 = vmatpush.bf16.msra.mxu2 %v831_v55  ;;  %881 = vmatpush.bf16.msra.mxu3 %v831_v55 }
  0x3b   : > { %568 = vmatpush.bf16.msra.mxu0 %v831_v55 }
  0x3c   : > { %879 = vmatpush.bf16.msra.mxu1 %v831_v55 }
  0x3d   : > { %883 = vmatpush.bf16.msra.mxu2 %v830_v60  ;;  %884 = vmatpush.bf16.msra.mxu3 %v830_v60 }
  0x3f   : > { %569 = vmatpush.bf16.msra.mxu0 %v830_v60 }
  0x40   : > { %882 = vmatpush.bf16.msra.mxu1 %v830_v60 }
  0x91   : > { %v312_v15 = vpop.xlane.xlu1 %311  ;;  %v308_v16 = vpop.xlane.xlu0 %307 }
  0x92   : > { %v328_v17 = vmul.f32 %v1180_v14, %v312_v15  ;;  %v326_v18 = vmul.f32 %v1180_v14, %v308_v16  ;;  %v300_v19 = vpop.xlane.xlu2 %299 }
  0x93   : > { %v322_v30 = vmul.f32 %v1180_v14, %v300_v19 }
  0x94   : > { %v1184_v20 = vsub.f32 %v297_v0, %v328_v17  ;;  %v1186_v21 = vsub.f32 %v295_v1, %v326_v18 }
  0x95   : > { %v1208_v37 = vsub.f32 %v291_v2, %v322_v30 }
  0x96   : > { %v344_v22 = vmul.f32 %v1184_v20, %v1184_v20  ;;  %v342_v23 = vmul.f32 %v1186_v21, %v1186_v21 }
  0x97   : > { %v338_v42 = vmul.f32 %v1208_v37, %v1208_v37 }
  0x98   : > { %358 = vadd.xlane.f32.xlu1 %v344_v22  ;;  %354 = vadd.xlane.f32.xlu2 %v342_v23 }
  0x99   : > { %v314_v24 = vpop.xlane.xlu1 %313  ;;  %v310_v25 = vpop.xlane.xlu0 %309 }
  0x9a   : > { %v329_v26 = vmul.f32 %v1180_v14, %v314_v24  ;;  %v327_v27 = vmul.f32 %v1180_v14, %v310_v25  ;;  %v302_v28 = vpop.xlane.xlu2 %301 }
  0x9b   : > { %v323_v29 = vmul.f32 %v1180_v14, %v302_v28 }
  0x9c   : > { %v1196_v31 = vsub.f32 %v298_v3, %v329_v26  ;;  %v1198_v32 = vsub.f32 %v296_v4, %v327_v27 }
  0x9d   : > { %v1200_v33 = vsub.f32 %v292_v5, %v323_v29 }
  0x9e   : > { %v343_v34 = vmul.f32 %v1198_v32, %v1198_v32  ;;  %v345_v35 = vmul.f32 %v1196_v31, %v1196_v31 }
  0x9f   : > { %v339_v36 = vmul.f32 %v1200_v33, %v1200_v33 }
  0xa0   : > { %356 = vadd.xlane.f32.xlu0 %v343_v34  ;;  %360 = vadd.xlane.f32.xlu2 %v345_v35 }
  0xa1   : > { %348 = vadd.xlane.f32.xlu1 %v339_v36  ;;  %v304_v38 = vpop.xlane.xlu0 %303  ;;  %v306_v39 = vpop.xlane.xlu1 %305 }
  0xa2   : > { %v324_v40 = vmul.f32 %v1180_v14, %v304_v38  ;;  %v325_v43 = vmul.f32 %v1180_v14, %v306_v39 }
  0xa4   : > { %v1211_v41 = vsub.f32 %v293_v6, %v324_v40  ;;  %v1218_v45 = vsub.f32 %v294_v7, %v325_v43 }
  0xa6   : > { %v340_v44 = vmul.f32 %v1211_v41, %v1211_v41  ;;  %v341_v46 = vmul.f32 %v1218_v45, %v1218_v45 }
  0xa8   : > { %350 = vadd.xlane.f32.xlu2 %v340_v44  ;;  %346 = vadd.xlane.f32.xlu0 %v338_v42 }
  0xb0   : > { %352 = vadd.xlane.f32.xlu0 %v341_v46 }
 0x10b   : > { %v359_v53 = vpop.xlane.xlu1 %358  ;;  %v355_v54 = vpop.xlane.xlu2 %354 }
 0x10c   : > { %v368_v56 = vmul.f32 %v359_v53, %v1180_v14  ;;  %v366_v57 = vmul.f32 %v355_v54, %v1180_v14 }
 0x10e   : > { %v376_v58 = vadd.f32 1e-05, %v368_v56  ;;  %v374_v59 = vadd.f32 1e-05, %v366_v57 }
 0x110   : > { %949 = vrsqrt.f32 %v376_v58  ;;  %vm444_vm1 = vweird.f32 %v376_v58  ;;  %vm424_vm5 = vweird.f32 %v374_v59 }
 0x111   : > { %951 = vrsqrt.f32 %v374_v59 }
 0x113   : > { %v357_v61 = vpop.xlane.xlu0 %356  ;;  %v361_v62 = vpop.xlane.xlu2 %360 }
 0x114   : > { %v367_v63 = vmul.f32 %v357_v61, %v1180_v14  ;;  %v349_v0 = vpop.xlane.xlu1 %348  ;;  %v369_v1 = vmul.f32 %v361_v62, %v1180_v14  ;;  %v944_v61 = vld [vmem:[%s1364_s1] ss:$0 sm:$0xff] }
 0x115   : > { %v363_v2 = vmul.f32 %v349_v0, %v1180_v14 }
 0x116   : > { %v1243_v3 = vpop.eup %949  ;;  %v1245_v4 = vadd.f32 1e-05, %v367_v63  ;;  %v1247_v5 = vadd.f32 1e-05, %v369_v1 }
 0x117   : > { %v1249_v6 = vpop.eup %951  ;;  %v439_v7 = vmul.f32 %v1243_v3, %v376_v58  ;;  %v371_v8 = vadd.f32 1e-05, %v363_v2  ;;  %vm445_vm2 = vweird.f32 %v1243_v3 }
 0x118   : > { %v419_v9 = vmul.f32 %v1249_v6, %v374_v59  ;;  %953 = vrsqrt.f32 %v1245_v4  ;;  %vm425_vm3 = vweird.f32 %v1249_v6  ;;  %vm1275_vm4 = vmor %vm444_vm1, %vm445_vm2  ;;  %vm434_vm6 = vweird.f32 %v1245_v4 }
 0x119   : > { %v440_v10 = vmul.f32 %v1243_v3, %v439_v7  ;;  %955 = vrsqrt.f32 %v371_v8  ;;  %vm1282_vm7 = vmor %vm424_vm5, %vm425_vm3  ;;  %vm394_vm8 = vweird.f32 %v371_v8  ;;  %vm454_vm11 = vweird.f32 %v1247_v5 }
 0x11a   : > { %v420_v11 = vmul.f32 %v1249_v6, %v419_v9  ;;  %957 = vrsqrt.f32 %v1247_v5 }
 0x11b   : > { %v441_v12 = vmul.f32 0.5, %v440_v10  ;;  %v347_v13 = vpop.xlane.xlu0 %346  ;;  %v351_v15 = vpop.xlane.xlu2 %350 }
 0x11c   : > { %v421_v16 = vmul.f32 0.5, %v420_v11  ;;  %v362_v17 = vmul.f32 %v347_v13, %v1180_v14  ;;  %v364_v18 = vmul.f32 %v351_v15, %v1180_v14 }
 0x11d   : > { %v442_v19 = vsub.f32 1.5, %v441_v12 }
 0x11e   : > { %v954_v22 = vpop.eup %953  ;;  %v422_v23 = vsub.f32 1.5, %v421_v16  ;;  %v1259_v24 = vadd.f32 1e-05, %v362_v17  ;;  %v1261_v25 = vadd.f32 1e-05, %v364_v18 }
 0x11f   : > { %v1263_v26 = vpop.eup %955  ;;  %v429_v27 = vmul.f32 %v954_v22, %v1245_v4  ;;  %v443_v30 = vmul.f32 %v1243_v3, %v442_v19  ;;  %vm435_vm10 = vweird.f32 %v954_v22  ;;  %v945_v4 = vld [vmem:[%s1365_s2] ss:$0 sm:$0xff] }
 0x120   : > { %v958_v28 = vpop.eup %957  ;;  %v389_v29 = vmul.f32 %v1263_v26, %v371_v8  ;;  %959 = vrsqrt.f32 %v1259_v24  ;;  %v423_v34 = vmul.f32 %v1249_v6, %v422_v23  ;;  %vm395_vm9 = vweird.f32 %v1263_v26  ;;  %vm436_vm14 = vmor %vm434_vm6, %vm435_vm10 }
 0x121   : > { %v430_v35 = vmul.f32 %v954_v22, %v429_v27  ;;  %v449_v36 = vmul.f32 %v958_v28, %v1247_v5  ;;  %961 = vrsqrt.f32 %v1261_v25  ;;  %v447_v51 = vsel %vm1275_vm4, %v1243_v3, %v443_v30  ;;  %vm1297_vm12 = vmor %vm394_vm8, %vm395_vm9 }
 0x122   : > { %v390_v38 = vmul.f32 %v1263_v26, %v389_v29  ;;  %v427_v50 = vsel %vm1282_vm7, %v1249_v6, %v423_v34  ;;  %vm455_vm13 = vweird.f32 %v958_v28  ;;  %v464_v62 = vmul.f32 %v447_v51, %v1184_v20 }
 0x123   : > { %v431_v40 = vmul.f32 0.5, %v430_v35  ;;  %v450_v42 = vmul.f32 %v958_v28, %v449_v36  ;;  %v353_v43 = vpop.xlane.xlu0 %352  ;;  %v462_v60 = vmul.f32 %v427_v50, %v1186_v21  ;;  %vm456_vm15 = vmor %vm454_vm11, %vm455_vm13  ;;  %vm384_vm1 = vweird.f32 %v1259_v24 }
 0x124   : > { %v391_v46 = vmul.f32 0.5, %v390_v38  ;;  %v365_v47 = vmul.f32 %v353_v43, %v1180_v14  ;;  %v476_v10 = vmul.f32 %v944_v61, %v464_v62  ;;  %vm404_vm2 = vweird.f32 %v1261_v25 }
 0x125   : > { %v432_v48 = vsub.f32 1.5, %v431_v40  ;;  %v451_v49 = vmul.f32 0.5, %v450_v42  ;;  %v474_v8 = vmul.f32 %v944_v61, %v462_v60 }
 0x126   : > { %v960_v52 = vpop.eup %959  ;;  %v392_v53 = vsub.f32 1.5, %v391_v46  ;;  %v1295_v54 = vadd.f32 1e-05, %v365_v47 }
 0x127   : > { %v433_v55 = vmul.f32 %v954_v22, %v432_v48  ;;  %v452_v56 = vsub.f32 1.5, %v451_v49  ;;  %v379_v57 = vmul.f32 %v960_v52, %v1259_v24  ;;  %v962_v58 = vpop.eup %961  ;;  %vm385_vm0 = vweird.f32 %v960_v52 }
 0x128   : > { %v393_v59 = vmul.f32 %v1263_v26, %v392_v53  ;;  %963 = vrsqrt.f32 %v1295_v54  ;;  %v399_v1 = vmul.f32 %v962_v58, %v1261_v25  ;;  %vm405_vm3 = vweird.f32 %v962_v58  ;;  %vm386_vm4 = vmor %vm384_vm1, %vm385_vm0  ;;  %v946_v53 = vld [vmem:[%s289_s12] ss:$0 sm:$0xff] }
 0x129   : > { %v453_v63 = vmul.f32 %v958_v28, %v452_v56  ;;  %v380_v0 = vmul.f32 %v960_v52, %v379_v57  ;;  %v437_v2 = vsel %vm436_vm14, %v954_v22, %v433_v55  ;;  %v488_v22 = vadd.f32 %v945_v4, %v476_v10  ;;  %vm406_vm5 = vmor %vm404_vm2, %vm405_vm3 }
 0x12a   : > { %v397_v21 = vsel %vm1297_vm12, %v1263_v26, %v393_v59  ;;  %v400_v6 = vmul.f32 %v962_v58, %v399_v1  ;;  %v463_v20 = vmul.f32 %v437_v2, %v1198_v32  ;;  %vm414_vm7 = vweird.f32 %v1295_v54 }
 0x12b   : > { %v381_v3 = vmul.f32 0.5, %v380_v0  ;;  %v457_v7 = vsel %vm456_vm15, %v958_v28, %v453_v63  ;;  %v459_v32 = vmul.f32 %v397_v21, %v1200_v33 }
 0x12c   : > { %v465_v9 = vmul.f32 %v457_v7, %v1196_v31  ;;  %v401_v11 = vmul.f32 0.5, %v400_v6  ;;  %v475_v12 = vmul.f32 %v944_v61, %v463_v20  ;;  %v486_v31 = vadd.f32 %v945_v4, %v474_v8 }
 0x12d   : > { %v382_v5 = vsub.f32 1.5, %v381_v3  ;;  %v471_v30 = vmul.f32 %v944_v61, %v459_v32 }
 0x12e   : > { %v964_v13 = vpop.eup %963  ;;  %v477_v15 = vmul.f32 %v944_v61, %v465_v9  ;;  %v402_v17 = vsub.f32 1.5, %v401_v11  ;;  %v487_v19 = vadd.f32 %v945_v4, %v475_v12 }
 0x12f   : > { %v383_v16 = vmul.f32 %v960_v52, %v382_v5  ;;  %v409_v18 = vmul.f32 %v964_v13, %v1295_v54  ;;  %vm415_vm6 = vweird.f32 %v964_v13  ;;  %v483_v40 = vadd.f32 %v945_v4, %v471_v30 }
 0x130   : > { %v489_v23 = vadd.f32 %v945_v4, %v477_v15  ;;  %v403_v26 = vmul.f32 %v962_v58, %v402_v17  ;;  %v492_v24 = vpack.c.bf16 %v487_v19, %v486_v31  ;;  %vm416_vm8 = vmor %vm414_vm7, %vm415_vm6 }
 0x131   : > { %v410_v27 = vmul.f32 %v964_v13, %v409_v18  ;;  %v387_v28 = vsel %vm386_vm4, %v960_v52, %v383_v16 }
 0x132   : > { %v493_v29 = vpack.c.bf16 %v489_v23, %v488_v22  ;;  %v458_v33 = vmul.f32 %v387_v28, %v1208_v37  ;;  %v407_v35 = vsel %vm406_vm5, %v962_v58, %v403_v26  ;;  %580 = vmatmul.bf16.vlgmr.msra.gmra.mxu2 %v492_v24 }
 0x133   : > { %v411_v34 = vmul.f32 0.5, %v410_v27  ;;  %v460_v42 = vmul.f32 %v407_v35, %v1211_v41 }
 0x134   : > { %585 = vmatmul.bf16.vlgmr.msra.gmra.mxu3 %v493_v29  ;;  %v470_v36 = vmul.f32 %v944_v61, %v458_v33 }
 0x135   : > { %v412_v38 = vsub.f32 1.5, %v411_v34  ;;  %v472_v46 = vmul.f32 %v944_v61, %v460_v42 }
 0x136   : > { %v482_v39 = vadd.f32 %v945_v4, %v470_v36 }
 0x137   : > { %v413_v43 = vmul.f32 %v964_v13, %v412_v38  ;;  %v484_v48 = vadd.f32 %v945_v4, %v472_v46 }
 0x138   : > { %v490_v25 = vpack.c.bf16 %v483_v40, %v482_v39 }
 0x139   : > { %v417_v37 = vsel %vm416_vm8, %v964_v13, %v413_v43 }
 0x13a   : > { %570 = vmatmul.bf16.vlgmr.msra.gmra.mxu0 %v490_v25  ;;  %v461_v44 = vmul.f32 %v417_v37, %v1218_v45 }
 0x13c   : > { %v473_v47 = vmul.f32 %v944_v61, %v461_v44 }
 0x13e   : > { %v485_v49 = vadd.f32 %v945_v4, %v473_v47 }
 0x140   : > { %v491_v50 = vpack.c.bf16 %v485_v49, %v484_v48 }
 0x142   : > { %575 = vmatmul.bf16.vlgmr.msra.gmra.mxu1 %v491_v50 }
 0x1b5   : > { %v581_v51 = vpop.f32.mrf.mxu2 }
 0x1b6   : > { %v582_v14 = vadd.f32 %v946_v53, %v581_v51 }
 0x1b7   : > { %v586_v52 = vpop.f32.mrf.mxu3  ;;  %v571_v41 = vpop.f32.mrf.mxu0 }
 0x1b8   : > { %v587_v56 = vadd.f32 %v946_v53, %v586_v52  ;;  %v572_v60 = vadd.f32 %v946_v53, %v571_v41 }
 0x1bd   : > { %v583_v54 = vpop.f32.mrf.mxu2 }
 0x1be   : > { %v584_v45 = vadd.f32 %v946_v53, %v583_v54 }
 0x1bf   : > { %v588_v55 = vpop.f32.mrf.mxu3  ;;  %v573_v58 = vpop.f32.mrf.mxu0 }
 0x1c0   : > { %v589_v57 = vadd.f32 %v946_v53, %v588_v55  ;;  %v576_v59 = vpop.f32.mrf.mxu1  ;;  %v574_v61 = vadd.f32 %v946_v53, %v573_v58  ;;  %v851_v62 = vpack.c.bf16 %v584_v45, %v582_v14 }
 0x1c1   : > { %v577_v2 = vadd.f32 %v946_v53, %v576_v59 }
 0x1c2   : > { %v856_v63 = vpack.c.bf16 %v589_v57, %v587_v56  ;;  %v841_v0 = vpack.c.bf16 %v574_v61, %v572_v60  ;;  %859 = vst [vmem:[%s280_s18 + $0x10] sm:$0xff] %v851_v62  }
 0x1c4   : > { %860 = vst [vmem:[%s280_s18 + $0x18] sm:$0xff] %v856_v63  }
 0x1c5   : > { %842 = vst [vmem:[%s280_s18] sm:$0xff] %v841_v0  }
 0x1c8   : > { %v578_v1 = vpop.f32.mrf.mxu1 }
 0x1c9   : > { %v579_v21 = vadd.f32 %v946_v53, %v578_v1  ;;  %613 = sbr.rel (!%p1131_p9) target bundleno = 471 (0x1d7), region = 48  ;;  %v643_v4 = vld [vmem:[%s280_s18 + $0x10] sm:$0xf] (%p1131_p9)  ;;  %v645_v9 = vld [vmem:[%s280_s18 + $0x14] sm:$0xf] (%p1131_p9) }
 0x1ca   : > { %644 = vst [vmem:[%s618_s8 + $0x30] sm:$0xf] (%p1131_p9), %v643_v4 }
 0x1cb   : > { %v846_v3 = vpack.c.bf16 %v579_v21, %v577_v2  ;;  %v647_v10 = vld [vmem:[%s280_s18 + $0x18] sm:$0xf] (%p1131_p9)  ;;  %v649_v5 = vld [vmem:[%s280_s18 + $0x1c] sm:$0xf] (%p1131_p9)  ;;  %646 = vst [vmem:[%s618_s8 + $0x3c] sm:$0xf] (%p1131_p9), %v645_v9 }
 0x1cc   : > { %v635_v6 = vld [vmem:[%s280_s18] sm:$0xf] (%p1131_p9)  ;;  %v637_v20 = vld [vmem:[%s280_s18 + $0x4] sm:$0xf] (%p1131_p9)  ;;  %648 = vst [vmem:[%s618_s8 + $0x48] sm:$0xf] (%p1131_p9), %v647_v10 }
 0x1cd   : > { %858 = vst [vmem:[%s280_s18 + $0x8] sm:$0xff] %v846_v3  }
 0x1ce   : > { %636 = vst [vmem:[%s618_s8] sm:$0xf] %v635_v6 }
 0x1cf   : > { %638 = vst [vmem:[%s618_s8 + $0xc] sm:$0xf] %v637_v20 }
 0x1d0   : > { %650 = vst [vmem:[%s618_s8 + $0x54] sm:$0xf] %v649_v5 }
 0x1d4   : > { %v639_v7 = vld [vmem:[%s280_s18 + $0x8] sm:$0xf]  ;;  %v641_v8 = vld [vmem:[%s280_s18 + $0xc] sm:$0xf] }
 0x1d5   : > { %640 = vst [vmem:[%s618_s8 + $0x18] sm:$0xf] %v639_v7 }
 0x1d6   : > { %642 = vst [vmem:[%s618_s8 + $0x24] sm:$0xf] %v641_v8 }
 0x1d7 PF: > { %s18_s23 = sadd.s32 1, %s1045_s23   ;;  %s1378_s18 = smov %s1029_s19 }
 0x1d8   : > { %p15_p2 = scmp.ge.s32.totalorder %s18_s23, 5   ;;  %s1379_s19 = smov %s1033_s20 }
 0x1d9   : > { %s1380_s20 = smov %s1129_s30  ;;  %s1381_s21 = smov %s1041_s22 }
 0x1da   : > { %s1382_s22 = smov %s1384_s25  ;;  %17 = sbr.rel (!%p15_p2) target bundleno = 4 (0x4), region = 127 }
 0x1df   :  { %700 = vsyncpa [#allocation3], 1 }
 0x1e0   :  { %702 = vsyncpa [#allocation3 + $0x1], 1 }

// kernel: gpt_forward.14
= control target key start
LH: loop header
LB: loop body
LE: loop exit
PB: predicated region body
PF: predicated region fallthrough
CT: control target
= control target key end

     0   :  { %s1341_s18 = smov 0   ;;  %s1343_s19 = smov 0   ;;  %s1743_s0 = inlined_call_operand.vmem [shape: f32[64,128], index: 0, kind: input, shape index: {}]   ;;  %s1744_s1 = inlined_call_operand.vmem [shape: f32[1,128], index: 1, kind: input, shape index: {}]   ;;  %s1745_s2 = inlined_call_operand.vmem [shape: f32[1,128], index: 2, kind: input, shape index: {}]   ;;  %s1746_s3 = inlined_call_operand.vmem [shape: bf16[128,512], index: 3, kind: input, shape index: {}]   ;;  %s1747_s4 = inlined_call_operand.vmem [shape: f32[1,512], index: 4, kind: input, shape index: {}]   ;;  %s1748_s5 = inlined_call_operand.vmem [shape: bf16[64,512], index: 5, kind: output, shape index: {}]  }
   0x1   :  { %s1345_s20 = smov 0   ;;  %s1347_s21 = smov 0  }
   0x2   :  { %s1349_s22 = smov 0  }
   0x3 LB: > { %s24_s23 = sadd.s32 1, %s1304_s21  ;;  %s1062_s24 = sadd.s32 4294967295, %s1308_s22   ;;  %s1308_s22 = sphi %s1349_s22, %s15_s22   ;;  %s1304_s21 = sphi %s1347_s21, %s1761_s21   ;;  %s1300_s20 = sphi %s1345_s20, %s1760_s20   ;;  %s1296_s19 = sphi %s1343_s19, %s1759_s19   ;;  %s1292_s18 = sphi %s1341_s18, %s1758_s18  }
   0x4   : > { %p25_p0 = scmp.ge.s32.totalorder %s24_s23, 2  ;;  %p109_p1 = scmp.ne.s32.totalorder %s1296_s19, %s1292_s18 }
   0x5   : > { %p110_p2 = scmp.eq.s32.totalorder %s1308_s22, 0  ;;  %p167_p4 = scmp.eq.s32.totalorder %s1062_s24, 1 }
   0x6   : > { %s1763_s23 = smov (%p25_p0, %s24_s23), 0  ;;  %s102_s26 = sadd.s32 1, %s1296_s19 }
   0x7   : > { %p111_p3 = por %p110_p2, %p109_p1  ;;  %s99_s25 = ssub.s32 %s1304_s21, %s1763_s23 }
   0x8   : > { %p100_p5 = scmp.eq.s32.totalorder %s99_s25, 0  ;;  %p1376_p6 = por %p167_p4, %p109_p1 }
   0x9   : > { %p1066_p7 = scmp.ge.s32.totalorder %s1308_s22, 2 }
   0xa   : > { %s1381_s28 = scalar_select %p100_p5, %s1296_s19, %s102_s26  }
   0xb   : > { %204 = sbr.rel (%p1066_p7) target bundleno = 36 (0x24), region = 28 }
  0x10   : > { %207 = sbr.rel (!%p111_p3) target bundleno = 36 (0x24), region = 32  ;;  %s209_s29 = sand.u32 (%p111_p3), 1, %s1296_s19  }
  0x11   : > { %s1143_s30 = sshll.u32 (%p111_p3), %s1304_s21, 3  ;;  %s1067_s6 = sshll.u32 (%p111_p3), %s209_s29, 7 }
  0x12   : > { %s1389_s9 = scalar_lea.vmem (%p111_p3), %s1746_s3, %s1143_s30  ;;  %s211_s10 = scalar_lea.vmem (%p111_p3), [#allocation2], %s1067_s6 }
  0x13   : > { %v273_v0 = vld [vmem:[%s1389_s9] sm:$0xff] (%p111_p3)  ;;  %v275_v1 = vld [vmem:[%s1389_s9 + $0x10] sm:$0xff] (%p111_p3) }
  0x14   : > { %v277_v2 = vld [vmem:[%s1389_s9 + $0x20] sm:$0xff] (%p111_p3)  ;;  %274 = vst [vmem:[%s211_s10] sm:$0xff] (%p111_p3), %v273_v0  ;;  %v279_v3 = vld [vmem:[%s1389_s9 + $0x30] sm:$0xff] (%p111_p3) }
  0x15   : > { %276 = vst [vmem:[%s211_s10 + $0x8] sm:$0xff] %v275_v1  ;;  %v281_v4 = vld [vmem:[%s1389_s9 + $0x40] sm:$0xff]  ;;  %v283_v5 = vld [vmem:[%s1389_s9 + $0x50] sm:$0xff] }
  0x16   : > { %278 = vst [vmem:[%s211_s10 + $0x10] sm:$0xff] %v277_v2  ;;  %v285_v6 = vld [vmem:[%s1389_s9 + $0x60] sm:$0xff]  ;;  %v287_v7 = vld [vmem:[%s1389_s9 + $0x70] sm:$0xff] }
  0x17   : > { %280 = vst [vmem:[%s211_s10 + $0x18] sm:$0xff] %v279_v3  ;;  %v289_v8 = vld [vmem:[%s1389_s9 + $0x80] sm:$0xff]  ;;  %v291_v9 = vld [vmem:[%s1389_s9 + $0x90] sm:$0xff] }
  0x18   : > { %282 = vst [vmem:[%s211_s10 + $0x20] sm:$0xff] %v281_v4  ;;  %v293_v10 = vld [vmem:[%s1389_s9 + $0xa0] sm:$0xff]  ;;  %v295_v11 = vld [vmem:[%s1389_s9 + $0xb0] sm:$0xff] }
  0x19   : > { %284 = vst [vmem:[%s211_s10 + $0x28] sm:$0xff] %v283_v5  ;;  %v297_v12 = vld [vmem:[%s1389_s9 + $0xc0] sm:$0xff]  ;;  %v299_v13 = vld [vmem:[%s1389_s9 + $0xd0] sm:$0xff] }
  0x1a   : > { %286 = vst [vmem:[%s211_s10 + $0x30] sm:$0xff] %v285_v6  ;;  %v301_v14 = vld [vmem:[%s1389_s9 + $0xe0] sm:$0xff]  ;;  %v303_v15 = vld [vmem:[%s1389_s9 + $0xf0] sm:$0xff] }
  0x1b   : > { %288 = vst [vmem:[%s211_s10 + $0x38] sm:$0xff] %v287_v7 }
  0x1c   : > { %290 = vst [vmem:[%s211_s10 + $0x40] sm:$0xff] %v289_v8 }
  0x1d   : > { %292 = vst [vmem:[%s211_s10 + $0x48] sm:$0xff] %v291_v9 }
  0x1e   : > { %294 = vst [vmem:[%s211_s10 + $0x50] sm:$0xff] %v293_v10 }
  0x1f   : > { %296 = vst [vmem:[%s211_s10 + $0x58] sm:$0xff] %v295_v11 }
  0x20   : > { %298 = vst [vmem:[%s211_s10 + $0x60] sm:$0xff] %v297_v12 }
  0x21   : > { %300 = vst [vmem:[%s211_s10 + $0x68] sm:$0xff] %v299_v13 }
  0x22   : > { %302 = vst [vmem:[%s211_s10 + $0x70] sm:$0xff] %v301_v14 }
  0x23   : > { %304 = vst [vmem:[%s211_s10 + $0x78] sm:$0xff] %v303_v15 }
  0x24 PF: > { %p1070_p8 = scmp.ge.s32.totalorder %s1308_s22, 1  ;;  %p317_p9 = scmp.lt.s32.totalorder %s1308_s22, 3 }
  0x26   : > { %p318_p10 = pnand %p1070_p8, %p317_p9 }
  0x27   : > { %s324_s10 = sand.u32 (!%p318_p10), 1, %s1292_s18   ;;  %s1073_s17 = sshll.u32 (!%p318_p10), %s1300_s20, 1 }
  0x28   : > { %321 = sbr.rel (%p318_p10) target bundleno = 518 (0x206), region = 74  ;;  %s1071_s11 = sshll.u32 (!%p318_p10), %s324_s10, 7 }
  0x29   : > { %s1478_s12 = scalar_lea.vmem (!%p318_p10), [#allocation2], %s1071_s11  ;;  %p367_p11 = scmp.lt.s32.totalorder (!%p318_p10), %s1073_s17, 3 }
  0x2a   : > { %s1072_s29 = sshll.u32 (!%p318_p10), %s324_s10, 6 }
  0x2b   : > { %s1661_s18 = scalar_lea.vmem (!%p318_p10), [#allocation3], %s1072_s29 }
  0x2d   : > { %v379_v16 = vld [vmem:[%s1743_s0 + $0x30] sm:$0xff]  ;;  %v377_v17 = vld [vmem:[%s1743_s0 + $0x20] sm:$0xff]  ;;  %v380_v19 = vld [vmem:[%s1743_s0 + $0x38] sm:$0xff]  ;;  %v1310_v24 = vmov 128.0   ;;  %s1765_s17 = smov (!%p367_p11, %s1073_s17), 3  ;;  %s1160_s30 = sshll.u32 (%p1376_p6), %s1300_s20, 3 }
  0x2e   : > { %v373_v18 = vld [vmem:[%s1743_s0] sm:$0xff]  ;;  %393 = vadd.xlane.f32.xlu2 %v379_v16  ;;  %389 = vadd.xlane.f32.xlu0 %v377_v17  ;;  %v378_v20 = vld [vmem:[%s1743_s0 + $0x28] sm:$0xff]  ;;  %v375_v22 = vld [vmem:[%s1743_s0 + $0x10] sm:$0xff]  ;;  %1220 = vrcp.f32 %v1310_v24  ;;  %s369_s26 = scalar_lea.vmem %s1747_s4, %s1765_s17  ;;  %s908_s8 = scalar_lea.vmem (%p1376_p6), %s1748_s5, %s1160_s30 }
  0x2f   : > { %381 = vadd.xlane.f32.xlu1 %v373_v18  ;;  %v374_v21 = vld [vmem:[%s1743_s0 + $0x8] sm:$0xff]  ;;  %v376_v23 = vld [vmem:[%s1743_s0 + $0x18] sm:$0xff]  ;;  %v1132_v63 = vld [vmem:[%s1478_s12 + $0x70] sm:$0xf] }
  0x30   : > { %v1159_v0 = vld [vmem:[%s1478_s12 + $0x74] sm:$0xf0]  ;;  %v1158_v1 = vld [vmem:[%s1478_s12 + $0x74] sm:$0xf]  ;;  %v1134_v3 = vld [vmem:[%s1478_s12 + $0x78] sm:$0xf0] }
  0x31   : > { %v1133_v2 = vor.u32 %v1159_v0, %v1132_v63  ;;  %v1137_v4 = vor.u32 %v1158_v1, %v1134_v3  ;;  %v1124_v5 = vld [vmem:[%s1478_s12 + $0x60] sm:$0xf]  ;;  %v1157_v6 = vld [vmem:[%s1478_s12 + $0x64] sm:$0xf0]  ;;  %v1156_v7 = vld [vmem:[%s1478_s12 + $0x64] sm:$0xf] }
  0x32   : > { %v1125_v8 = vor.u32 %v1157_v6, %v1124_v5  ;;  %v1126_v9 = vld [vmem:[%s1478_s12 + $0x68] sm:$0xf0]  ;;  %v1116_v11 = vld [vmem:[%s1478_s12 + $0x50] sm:$0xf]  ;;  %v1155_v12 = vld [vmem:[%s1478_s12 + $0x54] sm:$0xf0] }
  0x33   : > { %678 = vmatpush.bf16.msra.mxu0 %v1133_v2  ;;  %1161 = vmatpush.bf16.msra.mxu2 %v1133_v2  ;;  %v1129_v10 = vor.u32 %v1156_v7, %v1126_v9  ;;  %v1154_v13 = vld [vmem:[%s1478_s12 + $0x54] sm:$0xf]  ;;  %v1117_v14 = vor.u32 %v1155_v12, %v1116_v11  ;;  %v1118_v15 = vld [vmem:[%s1478_s12 + $0x58] sm:$0xf0]  ;;  %v1151_v24 = vld [vmem:[%s1478_s12 + $0x34] sm:$0xf0] }
  0x34   : > { %v1221_v25 = vpop.eup %1220  ;;  %707 = vmatpush.bf16.msra.mxu1 %v1137_v4  ;;  %1169 = vmatpush.bf16.msra.mxu3 %v1137_v4 }
  0x35   : > { %v398_v26 = vmul.f32 128.0, %v1221_v25  ;;  %vm402_vm0 = vweird.f32 %v1221_v25 }
  0x36   : > { %395 = vadd.xlane.f32.xlu2 %v380_v19  ;;  %391 = vadd.xlane.f32.xlu0 %v378_v20 }
  0x37   : > { %383 = vadd.xlane.f32.xlu1 %v374_v21  ;;  %v399_v27 = vsub.f32 1.0, %v398_v26  ;;  %679 = vmatpush.bf16.msra.mxu0 %v1125_v8 }
  0x38   : > { %1162 = vmatpush.bf16.msra.mxu2 %v1125_v8  ;;  %708 = vmatpush.bf16.msra.mxu1 %v1129_v10 }
  0x39   : > { %v400_v28 = vmul.f32 %v1221_v25, %v399_v27  ;;  %1170 = vmatpush.bf16.msra.mxu3 %v1129_v10  ;;  %v1102_v27 = vld [vmem:[%s1478_s12 + $0x38] sm:$0xf0] }
  0x3b   : > { %v401_v29 = vadd.f32 %v1221_v25, %v400_v28  ;;  %680 = vmatpush.bf16.msra.mxu0 %v1117_v14 }
  0x3c   : > { %1163 = vmatpush.bf16.msra.mxu2 %v1117_v14 }
  0x3d   : > { %v1433_v30 = vsel %vm402_vm0, %v1221_v25, %v401_v29  ;;  %v1150_v25 = vld [vmem:[%s1478_s12 + $0x34] sm:$0xf]  ;;  %v1092_v29 = vld [vmem:[%s1478_s12 + $0x20] sm:$0xf] }
  0x3e   : > { %385 = vadd.xlane.f32.xlu0 %v375_v22  ;;  %v1105_v28 = vor.u32 %v1150_v25, %v1102_v27 }
  0x3f   : > { %387 = vadd.xlane.f32.xlu1 %v376_v23 }
  0xa1   : > { %v394_v31 = vpop.xlane.xlu2 %393  ;;  %v390_v32 = vpop.xlane.xlu0 %389 }
  0xa2   : > { %v408_v33 = vmul.f32 %v1433_v30, %v390_v32  ;;  %v382_v34 = vpop.xlane.xlu1 %381  ;;  %v410_v46 = vmul.f32 %v1433_v30, %v394_v31  ;;  %v1149_v31 = vld [vmem:[%s1478_s12 + $0x24] sm:$0xf0]  ;;  %v1148_v32 = vld [vmem:[%s1478_s12 + $0x24] sm:$0xf] }
  0xa3   : > { %v404_v35 = vmul.f32 %v1433_v30, %v382_v34  ;;  %v1094_v34 = vld [vmem:[%s1478_s12 + $0x28] sm:$0xf0] }
  0xa4   : > { %v1437_v36 = vsub.f32 %v377_v17, %v408_v33  ;;  %v1461_v53 = vsub.f32 %v379_v16, %v410_v46  ;;  %v1121_v16 = vor.u32 %v1154_v13, %v1118_v15  ;;  %v1108_v17 = vld [vmem:[%s1478_s12 + $0x40] sm:$0xf]  ;;  %v1093_v33 = vor.u32 %v1149_v31, %v1092_v29 }
  0xa5   : > { %v1439_v37 = vsub.f32 %v373_v18, %v404_v35  ;;  %v1153_v18 = vld [vmem:[%s1478_s12 + $0x44] sm:$0xf0]  ;;  %v1097_v35 = vor.u32 %v1148_v32, %v1094_v34 }
  0xa6   : > { %v424_v38 = vmul.f32 %v1437_v36, %v1437_v36  ;;  %v426_v58 = vmul.f32 %v1461_v53, %v1461_v53  ;;  %709 = vmatpush.bf16.msra.mxu1 %v1121_v16  ;;  %1171 = vmatpush.bf16.msra.mxu3 %v1121_v16 }
  0xa7   : > { %v420_v39 = vmul.f32 %v1439_v37, %v1439_v37 }
  0xa8   : > { %436 = vadd.xlane.f32.xlu2 %v424_v38  ;;  %v1084_v38 = vld [vmem:[%s1478_s12 + $0x10] sm:$0xf] }
  0xa9   : > { %428 = vadd.xlane.f32.xlu1 %v420_v39  ;;  %v396_v40 = vpop.xlane.xlu2 %395  ;;  %v392_v41 = vpop.xlane.xlu0 %391  ;;  %v1147_v39 = vld [vmem:[%s1478_s12 + $0x14] sm:$0xf0] }
  0xaa   : > { %v411_v42 = vmul.f32 %v1433_v30, %v396_v40  ;;  %v409_v43 = vmul.f32 %v1433_v30, %v392_v41  ;;  %v384_v44 = vpop.xlane.xlu1 %383  ;;  %v1146_v40 = vld [vmem:[%s1478_s12 + $0x14] sm:$0xf] }
  0xab   : > { %v405_v45 = vmul.f32 %v1433_v30, %v384_v44 }
  0xac   : > { %v1449_v47 = vsub.f32 %v380_v19, %v411_v42  ;;  %v1451_v48 = vsub.f32 %v378_v20, %v409_v43  ;;  %v1152_v19 = vld [vmem:[%s1478_s12 + $0x44] sm:$0xf]  ;;  %v1109_v20 = vor.u32 %v1153_v18, %v1108_v17  ;;  %v1085_v42 = vor.u32 %v1147_v39, %v1084_v38  ;;  %v1086_v43 = vld [vmem:[%s1478_s12 + $0x18] sm:$0xf0] }
  0xad   : > { %v1453_v49 = vsub.f32 %v374_v21, %v405_v45  ;;  %v1110_v21 = vld [vmem:[%s1478_s12 + $0x48] sm:$0xf0]  ;;  %v1089_v46 = vor.u32 %v1146_v40, %v1086_v43 }
  0xae   : > { %v425_v50 = vmul.f32 %v1451_v48, %v1451_v48  ;;  %v427_v51 = vmul.f32 %v1449_v47, %v1449_v47  ;;  %681 = vmatpush.bf16.msra.mxu0 %v1109_v20  ;;  %1164 = vmatpush.bf16.msra.mxu2 %v1109_v20 }
  0xaf   : > { %v421_v52 = vmul.f32 %v1453_v49, %v1453_v49 }
  0xb0   : > { %438 = vadd.xlane.f32.xlu0 %v425_v50 }
  0xb1   : > { %442 = vadd.xlane.f32.xlu1 %v427_v51  ;;  %430 = vadd.xlane.f32.xlu2 %v421_v52  ;;  %v386_v54 = vpop.xlane.xlu0 %385  ;;  %v1076_v52 = vld [vmem:[%s1478_s12] sm:$0xf] }
  0xb2   : > { %v406_v55 = vmul.f32 %v1433_v30, %v386_v54  ;;  %v388_v56 = vpop.xlane.xlu1 %387  ;;  %v1145_v54 = vld [vmem:[%s1478_s12 + $0x4] sm:$0xf0] }
  0xb3   : > { %v407_v59 = vmul.f32 %v1433_v30, %v388_v56  ;;  %v1077_v56 = vor.u32 %v1145_v54, %v1076_v52 }
  0xb4   : > { %v1464_v57 = vsub.f32 %v375_v22, %v406_v55  ;;  %v1113_v22 = vor.u32 %v1152_v19, %v1110_v21 }
  0xb5   : > { %v1471_v61 = vsub.f32 %v376_v23, %v407_v59  ;;  %v1100_v23 = vld [vmem:[%s1478_s12 + $0x30] sm:$0xf]  ;;  %v1078_v59 = vld [vmem:[%s1478_s12 + $0x8] sm:$0xf0] }
  0xb6   : > { %v422_v60 = vmul.f32 %v1464_v57, %v1464_v57  ;;  %710 = vmatpush.bf16.msra.mxu1 %v1113_v22  ;;  %1172 = vmatpush.bf16.msra.mxu3 %v1113_v22  ;;  %v1101_v26 = vor.u32 %v1151_v24, %v1100_v23 }
  0xb7   : > { %v423_v62 = vmul.f32 %v1471_v61, %v1471_v61 }
  0xb8   : > { %440 = vadd.xlane.f32.xlu0 %v426_v58  ;;  %682 = vmatpush.bf16.msra.mxu0 %v1101_v26  ;;  %v1144_v58 = vld [vmem:[%s1478_s12 + $0x4] sm:$0xf] }
  0xb9   : > { %432 = vadd.xlane.f32.xlu2 %v422_v60  ;;  %1165 = vmatpush.bf16.msra.mxu2 %v1101_v26  ;;  %v1081_v60 = vor.u32 %v1144_v58, %v1078_v59  ;;  %v1218_v59 = vld [vmem:[%s1744_s1] ss:$0 sm:$0xff] }
  0xba   : > { %711 = vmatpush.bf16.msra.mxu1 %v1105_v28  ;;  %1173 = vmatpush.bf16.msra.mxu3 %v1105_v28 }
  0xbc   : > { %683 = vmatpush.bf16.msra.mxu0 %v1093_v33 }
  0xbd   : > { %1166 = vmatpush.bf16.msra.mxu2 %v1093_v33 }
  0xbe   : > { %712 = vmatpush.bf16.msra.mxu1 %v1097_v35  ;;  %1174 = vmatpush.bf16.msra.mxu3 %v1097_v35 }
  0xc0   : > { %434 = vadd.xlane.f32.xlu0 %v423_v62  ;;  %684 = vmatpush.bf16.msra.mxu0 %v1085_v42 }
  0xc1   : > { %1167 = vmatpush.bf16.msra.mxu2 %v1085_v42 }
  0xc2   : > { %713 = vmatpush.bf16.msra.mxu1 %v1089_v46  ;;  %1175 = vmatpush.bf16.msra.mxu3 %v1089_v46 }
  0xc4   : > { %685 = vmatpush.bf16.msra.mxu0 %v1077_v56 }
  0xc5   : > { %1168 = vmatpush.bf16.msra.mxu2 %v1077_v56 }
  0xc6   : > { %714 = vmatpush.bf16.msra.mxu1 %v1081_v60  ;;  %1176 = vmatpush.bf16.msra.mxu3 %v1081_v60 }
 0x11b   : > { %v437_v41 = vpop.xlane.xlu2 %436 }
 0x11c   : > { %v448_v44 = vmul.f32 %v437_v41, %v1433_v30  ;;  %v429_v45 = vpop.xlane.xlu1 %428 }
 0x11d   : > { %v444_v50 = vmul.f32 %v429_v45, %v1433_v30 }
 0x11e   : > { %v1510_v51 = vadd.f32 1e-05, %v448_v44 }
 0x11f   : > { %v452_v55 = vadd.f32 1e-05, %v444_v50 }
 0x120   : > { %1222 = vrsqrt.f32 %v1510_v51  ;;  %vm506_vm4 = vweird.f32 %v1510_v51 }
 0x121   : > { %1224 = vrsqrt.f32 %v452_v55  ;;  %vm466_vm1 = vweird.f32 %v452_v55 }
 0x123   : > { %v439_v62 = vpop.xlane.xlu0 %438 }
 0x124   : > { %v449_v63 = vmul.f32 %v439_v62, %v1433_v30  ;;  %v431_v0 = vpop.xlane.xlu2 %430  ;;  %v443_v1 = vpop.xlane.xlu1 %442 }
 0x125   : > { %v445_v2 = vmul.f32 %v431_v0, %v1433_v30  ;;  %v451_v3 = vmul.f32 %v443_v1, %v1433_v30 }
 0x126   : > { %v1520_v4 = vpop.eup %1222  ;;  %v457_v5 = vadd.f32 1e-05, %v449_v63 }
 0x127   : > { %v1225_v6 = vpop.eup %1224  ;;  %v501_v7 = vmul.f32 %v1520_v4, %v1510_v51  ;;  %v453_v8 = vadd.f32 1e-05, %v445_v2  ;;  %v1524_v9 = vadd.f32 1e-05, %v451_v3  ;;  %vm507_vm3 = vweird.f32 %v1520_v4 }
 0x128   : > { %v461_v10 = vmul.f32 %v1225_v6, %v452_v55  ;;  %1226 = vrsqrt.f32 %v457_v5  ;;  %vm467_vm2 = vweird.f32 %v1225_v6  ;;  %vm1548_vm6 = vmor %vm506_vm4, %vm507_vm3  ;;  %vm516_vm10 = vweird.f32 %v457_v5 }
 0x129   : > { %v502_v11 = vmul.f32 %v1520_v4, %v501_v7  ;;  %1228 = vrsqrt.f32 %v453_v8  ;;  %vm1544_vm5 = vmor %vm466_vm1, %vm467_vm2  ;;  %vm476_vm8 = vweird.f32 %v453_v8  ;;  %vm536_vm15 = vweird.f32 %v1524_v9 }
 0x12a   : > { %v462_v12 = vmul.f32 %v1225_v6, %v461_v10  ;;  %1230 = vrsqrt.f32 %v1524_v9 }
 0x12b   : > { %v503_v13 = vmul.f32 0.5, %v502_v11  ;;  %v441_v14 = vpop.xlane.xlu0 %440 }
 0x12c   : > { %v463_v15 = vmul.f32 0.5, %v462_v12  ;;  %v450_v16 = vmul.f32 %v441_v14, %v1433_v30  ;;  %v433_v17 = vpop.xlane.xlu2 %432 }
 0x12d   : > { %v504_v18 = vsub.f32 1.5, %v503_v13  ;;  %v446_v19 = vmul.f32 %v433_v17, %v1433_v30 }
 0x12e   : > { %v1227_v20 = vpop.eup %1226  ;;  %v464_v21 = vsub.f32 1.5, %v463_v15  ;;  %v1530_v22 = vadd.f32 1e-05, %v450_v16 }
 0x12f   : > { %v1229_v23 = vpop.eup %1228  ;;  %v511_v24 = vmul.f32 %v1227_v20, %v457_v5  ;;  %v1532_v25 = vadd.f32 1e-05, %v446_v19  ;;  %v505_v29 = vmul.f32 %v1520_v4, %v504_v18  ;;  %vm517_vm7 = vweird.f32 %v1227_v20 }
 0x130   : > { %v1534_v26 = vpop.eup %1230  ;;  %v465_v27 = vmul.f32 %v1225_v6, %v464_v21  ;;  %v471_v28 = vmul.f32 %v1229_v23, %v453_v8  ;;  %1232 = vrsqrt.f32 %v1530_v22  ;;  %vm477_vm9 = vweird.f32 %v1229_v23  ;;  %vm518_vm11 = vmor %vm516_vm10, %vm517_vm7 }
 0x131   : > { %v512_v31 = vmul.f32 %v1227_v20, %v511_v24  ;;  %v531_v32 = vmul.f32 %v1534_v26, %v1524_v9  ;;  %1234 = vrsqrt.f32 %v1532_v25  ;;  %v509_v45 = vsel %vm1548_vm6, %v1520_v4, %v505_v29  ;;  %vm478_vm12 = vmor %vm476_vm8, %vm477_vm9 }
 0x132   : > { %v472_v33 = vmul.f32 %v1229_v23, %v471_v28  ;;  %v469_v43 = vsel %vm1544_vm5, %v1225_v6, %v465_v27  ;;  %v544_v60 = vmul.f32 %v509_v45, %v1437_v36  ;;  %vm486_vm13 = vweird.f32 %v1532_v25  ;;  %v1219_v36 = vld [vmem:[%s1745_s2] ss:$0 sm:$0xff] }
 0x133   : > { %v513_v35 = vmul.f32 0.5, %v512_v31  ;;  %v435_v38 = vpop.xlane.xlu0 %434  ;;  %v532_v41 = vmul.f32 %v1534_v26, %v531_v32  ;;  %v540_v54 = vmul.f32 %v469_v43, %v1439_v37  ;;  %vm537_vm0 = vweird.f32 %v1534_v26 }
 0x134   : > { %v473_v40 = vmul.f32 0.5, %v472_v33  ;;  %v447_v42 = vmul.f32 %v435_v38, %v1433_v30  ;;  %v556_v7 = vmul.f32 %v1218_v59, %v544_v60  ;;  %vm1592_vm3 = vmor %vm536_vm15, %vm537_vm0  ;;  %vm526_vm4 = vweird.f32 %v1530_v22 }
 0x135   : > { %v514_v44 = vsub.f32 1.5, %v513_v35  ;;  %v533_v58 = vmul.f32 0.5, %v532_v41  ;;  %v552_v6 = vmul.f32 %v1218_v59, %v540_v54 }
 0x136   : > { %v1559_v46 = vpop.eup %1232  ;;  %v474_v50 = vsub.f32 1.5, %v473_v40  ;;  %v1561_v51 = vadd.f32 1e-05, %v447_v42  ;;  %v568_v18 = vadd.f32 %v1219_v36, %v556_v7 }
 0x137   : > { %v515_v52 = vmul.f32 %v1227_v20, %v514_v44  ;;  %v521_v30 = vmul.f32 %v1559_v46, %v1530_v22  ;;  %v1235_v55 = vpop.eup %1234  ;;  %v534_v5 = vsub.f32 1.5, %v533_v58  ;;  %vm527_vm1 = vweird.f32 %v1559_v46 }
 0x138   : > { %v475_v56 = vmul.f32 %v1229_v23, %v474_v50  ;;  %1236 = vrsqrt.f32 %v1561_v51  ;;  %v481_v63 = vmul.f32 %v1235_v55, %v1532_v25  ;;  %vm487_vm14 = vweird.f32 %v1235_v55  ;;  %vm528_vm5 = vmor %vm526_vm4, %vm527_vm1 }
 0x139   : > { %v522_v62 = vmul.f32 %v1559_v46, %v521_v30  ;;  %v519_v0 = vsel %vm518_vm11, %v1227_v20, %v515_v52  ;;  %vm1587_vm2 = vmor %vm486_vm13, %vm487_vm14  ;;  %v564_v16 = vadd.f32 %v1219_v36, %v552_v6  ;;  %v535_v19 = vmul.f32 %v1534_v26, %v534_v5 }
 0x13a   : > { %v479_v37 = vsel %vm478_vm12, %v1229_v23, %v475_v56  ;;  %v482_v2 = vmul.f32 %v1235_v55, %v481_v63  ;;  %v545_v4 = vmul.f32 %v519_v0, %v1451_v48  ;;  %vm496_vm6 = vweird.f32 %v1561_v51 }
 0x13b   : > { %v523_v1 = vmul.f32 0.5, %v522_v62  ;;  %v541_v3 = vmul.f32 %v479_v37, %v1453_v49  ;;  %v539_v22 = vsel %vm1592_vm3, %v1534_v26, %v535_v19 }
 0x13c   : > { %v483_v10 = vmul.f32 0.5, %v482_v2  ;;  %v557_v12 = vmul.f32 %v1218_v59, %v545_v4  ;;  %v547_v35 = vmul.f32 %v539_v22, %v1449_v47  ;;  %v592_v47 = vld [vmem:[%s369_s26] sm:$0x3] }
 0x13d   : > { %v524_v8 = vsub.f32 1.5, %v523_v1  ;;  %v553_v11 = vmul.f32 %v1218_v59, %v541_v3 }
 0x13e   : > { %v1237_v13 = vpop.eup %1236  ;;  %v484_v48 = vsub.f32 1.5, %v483_v10  ;;  %v569_v9 = vadd.f32 %v1219_v36, %v557_v12  ;;  %v559_v43 = vmul.f32 %v1218_v59, %v547_v35 }
 0x13f   : > { %v525_v49 = vmul.f32 %v1559_v46, %v524_v8  ;;  %v491_v14 = vmul.f32 %v1237_v13, %v1561_v51  ;;  %v565_v17 = vadd.f32 %v1219_v36, %v553_v11  ;;  %vm497_vm7 = vweird.f32 %v1237_v13 }
 0x140   : > { %v485_v21 = vmul.f32 %v1235_v55, %v484_v48  ;;  %v574_v25 = vpack.c.bf16 %v569_v9, %v568_v18  ;;  %vm498_vm8 = vmor %vm496_vm6, %vm497_vm7  ;;  %v571_v50 = vadd.f32 %v1219_v36, %v559_v43 }
 0x141   : > { %v492_v23 = vmul.f32 %v1237_v13, %v491_v14  ;;  %v572_v24 = vpack.c.bf16 %v565_v17, %v564_v16  ;;  %v529_v29 = vsel %vm528_vm5, %v1559_v46, %v525_v49 }
 0x142   : > { %v489_v28 = vsel %vm1587_vm2, %v1235_v55, %v485_v21  ;;  %696 = vmatmul.bf16.vlgmr.msra.gmra.mxu2 %v574_v25  ;;  %725 = vmatmul.bf16.vlgmr.msra.gmra.mxu3 %v574_v25  ;;  %v546_v33 = vmul.f32 %v529_v29, %v1461_v53  ;;  %v1612_v53 = vperm.slane %v592_v47, 0 }
 0x143   : > { %v493_v27 = vmul.f32 0.5, %v492_v23  ;;  %686 = vmatmul.bf16.vlgmr.msra.gmra.mxu0 %v572_v24  ;;  %715 = vmatmul.bf16.vlgmr.msra.gmra.mxu1 %v572_v24  ;;  %v542_v32 = vmul.f32 %v489_v28, %v1464_v57 }
 0x144   : > { %v558_v41 = vmul.f32 %v1218_v59, %v546_v33 }
 0x145   : > { %v494_v31 = vsub.f32 1.5, %v493_v27  ;;  %v554_v40 = vmul.f32 %v1218_v59, %v542_v32 }
 0x146   : > { %v570_v46 = vadd.f32 %v1219_v36, %v558_v41 }
 0x147   : > { %v495_v34 = vmul.f32 %v1237_v13, %v494_v31  ;;  %v566_v44 = vadd.f32 %v1219_v36, %v554_v40 }
 0x148   : > { %v575_v57 = vpack.c.bf16 %v571_v50, %v570_v46 }
 0x149   : > { %v499_v38 = vsel %vm498_vm8, %v1237_v13, %v495_v34 }
 0x14a   : > { %v543_v39 = vmul.f32 %v499_v38, %v1471_v61  ;;  %v1614_v61 = vperm.slane %v592_v47, 1 }
 0x14c   : > { %v555_v42 = vmul.f32 %v1218_v59, %v543_v39 }
 0x14e   : > { %v567_v45 = vadd.f32 %v1219_v36, %v555_v42 }
 0x150   : > { %v573_v26 = vpack.c.bf16 %v567_v45, %v566_v44 }
 0x152   : > { %701 = vmatmul.bf16.gmra.mxu2 %v575_v57  ;;  %730 = vmatmul.bf16.gmra.mxu3 %v575_v57 }
 0x153   : > { %691 = vmatmul.bf16.gmra.mxu0 %v573_v26  ;;  %720 = vmatmul.bf16.gmra.mxu1 %v573_v26 }
 0x1c0   : > { %v687_v51 = vpop.f32.mrf.mxu0  ;;  %v716_v30 = vpop.f32.mrf.mxu1 }
 0x1c1   : > { %v688_v52 = vadd.f32 %v687_v51, %v1612_v53  ;;  %v717_v54 = vadd.f32 %v716_v30, %v1614_v61 }
 0x1c3   : > { %v752_v55 = vmul.f32 0.044715, %v688_v52  ;;  %v753_v56 = vmul.f32 0.044715, %v717_v54  ;;  %v736_v28 = vmul.f32 0.5, %v688_v52  ;;  %v737_v32 = vmul.f32 0.5, %v717_v54 }
 0x1c5   : > { %v768_v58 = vmul.f32 %v752_v55, %v688_v52  ;;  %v769_v59 = vmul.f32 %v753_v56, %v717_v54  ;;  %v697_v60 = vpop.f32.mrf.mxu2  ;;  %v726_v37 = vpop.f32.mrf.mxu3 }
 0x1c6   : > { %v698_v63 = vadd.f32 %v697_v60, %v1612_v53  ;;  %v1620_v1 = vadd.f32 %v726_v37, %v1614_v61 }
 0x1c7   : > { %v784_v62 = vmul.f32 %v768_v58, %v688_v52  ;;  %v785_v0 = vmul.f32 %v769_v59, %v717_v54 }
 0x1c8   : > { %v689_v2 = vpop.f32.mrf.mxu0  ;;  %v760_v4 = vmul.f32 0.044715, %v698_v63  ;;  %v718_v6 = vpop.f32.mrf.mxu1  ;;  %v761_v7 = vmul.f32 0.044715, %v1620_v1  ;;  %v744_v50 = vmul.f32 0.5, %v698_v63  ;;  %v745_v60 = vmul.f32 0.5, %v1620_v1 }
 0x1c9   : > { %v800_v3 = vadd.f32 %v784_v62, %v688_v52  ;;  %v690_v5 = vadd.f32 %v689_v2, %v1612_v53  ;;  %v801_v36 = vadd.f32 %v785_v0, %v717_v54  ;;  %v719_v8 = vadd.f32 %v718_v6, %v1614_v61 }
 0x1ca   : > { %v776_v11 = vmul.f32 %v760_v4, %v698_v63  ;;  %v777_v49 = vmul.f32 %v761_v7, %v1620_v1 }
 0x1cb   : > { %v816_v10 = vmul.f32 0.7978846, %v800_v3  ;;  %v754_v12 = vmul.f32 0.044715, %v690_v5  ;;  %v817_v13 = vmul.f32 0.7978846, %v801_v36 }
 0x1cc   : > { %v755_v48 = vmul.f32 0.044715, %v719_v8  ;;  %v792_v14 = vmul.f32 %v776_v11, %v698_v63  ;;  %v793_v16 = vmul.f32 %v777_v49, %v1620_v1  ;;  %v738_v62 = vmul.f32 0.5, %v690_v5 }
 0x1cd   : > { %1238 = vtanh.f32 %v816_v10  ;;  %v770_v15 = vmul.f32 %v754_v12, %v690_v5  ;;  %v699_v18 = vpop.f32.mrf.mxu2  ;;  %v728_v21 = vpop.f32.mrf.mxu3  ;;  %v739_v3 = vmul.f32 0.5, %v719_v8 }
 0x1ce   : > { %1240 = vtanh.f32 %v817_v13  ;;  %v771_v17 = vmul.f32 %v755_v48, %v719_v8  ;;  %v808_v9 = vadd.f32 %v792_v14, %v698_v63  ;;  %v1628_v20 = vadd.f32 %v699_v18, %v1612_v53 }
 0x1cf   : > { %v786_v19 = vmul.f32 %v770_v15, %v690_v5  ;;  %v809_v23 = vadd.f32 %v793_v16, %v1620_v1  ;;  %v1632_v25 = vadd.f32 %v728_v21, %v1614_v61 }
 0x1d0   : > { %v787_v24 = vmul.f32 %v771_v17, %v719_v8  ;;  %v692_v27 = vpop.f32.mrf.mxu0  ;;  %v824_v29 = vmul.f32 0.7978846, %v808_v9  ;;  %v762_v22 = vmul.f32 0.044715, %v1628_v20  ;;  %v721_v42 = vpop.f32.mrf.mxu1 }
 0x1d1   : > { %v802_v31 = vadd.f32 %v786_v19, %v690_v5  ;;  %v825_v33 = vmul.f32 0.7978846, %v809_v23  ;;  %v763_v35 = vmul.f32 0.044715, %v1632_v25  ;;  %v1638_v41 = vadd.f32 %v692_v27, %v1612_v53 }
 0x1d2   : > { %v803_v34 = vadd.f32 %v787_v24, %v719_v8  ;;  %1242 = vtanh.f32 %v824_v29  ;;  %v778_v40 = vmul.f32 %v762_v22, %v1628_v20  ;;  %v1648_v56 = vadd.f32 %v721_v42, %v1614_v61 }
 0x1d3   : > { %v1239_v38 = vpop.eup %1238  ;;  %v818_v39 = vmul.f32 0.7978846, %v802_v31  ;;  %1244 = vtanh.f32 %v825_v33  ;;  %v779_v46 = vmul.f32 %v763_v35, %v1632_v25  ;;  %v756_v52 = vmul.f32 0.044715, %v1638_v41 }
 0x1d4   : > { %v1241_v43 = vpop.eup %1240  ;;  %v848_v44 = vadd.f32 1.0, %v1239_v38  ;;  %v819_v45 = vmul.f32 0.7978846, %v803_v34  ;;  %v794_v57 = vmul.f32 %v778_v40, %v1628_v20  ;;  %v757_v6 = vmul.f32 0.044715, %v1648_v56 }
 0x1d5   : > { %v849_v26 = vadd.f32 1.0, %v1241_v43  ;;  %1246 = vtanh.f32 %v818_v39  ;;  %v795_v51 = vmul.f32 %v779_v46, %v1632_v25  ;;  %v702_v30 = vpop.f32.mrf.mxu2  ;;  %v731_v59 = vpop.f32.mrf.mxu3  ;;  %v772_v37 = vmul.f32 %v756_v52, %v1638_v41 }
 0x1d6   : > { %v864_v47 = vmul.f32 %v848_v44, %v736_v28  ;;  %1248 = vtanh.f32 %v819_v45  ;;  %v810_v55 = vadd.f32 %v794_v57, %v1628_v20  ;;  %v1651_v58 = vadd.f32 %v702_v30, %v1612_v53 }
 0x1d7   : > { %v865_v54 = vmul.f32 %v849_v26, %v737_v32  ;;  %v811_v63 = vadd.f32 %v795_v51, %v1632_v25  ;;  %v788_v11 = vmul.f32 %v772_v37, %v1638_v41  ;;  %v1659_v12 = vadd.f32 %v731_v59, %v1614_v61 }
 0x1d8   : > { %v1243_v0 = vpop.eup %1242  ;;  %v826_v4 = vmul.f32 0.7978846, %v810_v55  ;;  %v773_v8 = vmul.f32 %v757_v6, %v1648_v56  ;;  %v764_v13 = vmul.f32 0.044715, %v1651_v58  ;;  %v694_v19 = vpop.f32.mrf.mxu0  ;;  %v746_v45 = vmul.f32 0.5, %v1628_v20 }
 0x1d9   : > { %v880_v2 = vpack.c.bf16 %v865_v54, %v864_v47  ;;  %v1245_v36 = vpop.eup %1244  ;;  %v856_v7 = vadd.f32 1.0, %v1243_v0  ;;  %v827_v10 = vmul.f32 0.7978846, %v811_v63  ;;  %v804_v15 = vadd.f32 %v788_v11, %v1638_v41  ;;  %v723_v21 = vpop.f32.mrf.mxu1 }
 0x1da   : > { %v857_v5 = vadd.f32 1.0, %v1245_v36  ;;  %1250 = vtanh.f32 %v826_v4  ;;  %v789_v18 = vmul.f32 %v773_v8, %v1648_v56  ;;  %v780_v9 = vmul.f32 %v764_v13, %v1651_v58 }
 0x1db   : > { %v1247_v1 = vpop.eup %1246  ;;  %888 = vst [vmem:[%s1661_s18] sm:$0xff] %v880_v2  ;;  %v872_v48 = vmul.f32 %v856_v7, %v744_v50  ;;  %1252 = vtanh.f32 %v827_v10  ;;  %v820_v24 = vmul.f32 0.7978846, %v804_v15  ;;  %v765_v27 = vmul.f32 0.044715, %v1659_v12 }
 0x1dc   : > { %v1249_v49 = vpop.eup %1248  ;;  %v850_v14 = vadd.f32 1.0, %v1247_v1  ;;  %v873_v16 = vmul.f32 %v857_v5, %v745_v60  ;;  %v805_v22 = vadd.f32 %v789_v18, %v1648_v56  ;;  %v796_v32 = vmul.f32 %v780_v9, %v1651_v58 }
 0x1dd   : > { %v851_v17 = vadd.f32 1.0, %v1249_v49  ;;  %v704_v28 = vpop.f32.mrf.mxu2  ;;  %1254 = vtanh.f32 %v820_v24  ;;  %v781_v33 = vmul.f32 %v765_v27, %v1659_v12  ;;  %v1674_v34 = vadd.f32 %v694_v19, %v1612_v53  ;;  %v733_v52 = vpop.f32.mrf.mxu3 }
 0x1de   : > { %v866_v23 = vmul.f32 %v850_v14, %v738_v62  ;;  %v884_v29 = vpack.c.bf16 %v873_v16, %v872_v48  ;;  %v1677_v35 = vadd.f32 %v723_v21, %v1614_v61  ;;  %v821_v40 = vmul.f32 0.7978846, %v805_v22 }
 0x1df   : > { %v867_v31 = vmul.f32 %v851_v17, %v739_v3  ;;  %v812_v42 = vadd.f32 %v796_v32, %v1651_v58  ;;  %v1682_v43 = vadd.f32 %v704_v28, %v1612_v53  ;;  %v797_v26 = vmul.f32 %v781_v33, %v1659_v12 }
 0x1e0   : > { %v1251_v38 = vpop.eup %1250  ;;  %892 = vst [vmem:[%s1661_s18 + $0x20] sm:$0xff] %v884_v29  ;;  %v758_v50 = vmul.f32 0.044715, %v1674_v34  ;;  %v747_v57 = vmul.f32 0.5, %v1632_v25  ;;  %1256 = vtanh.f32 %v821_v40  ;;  %v759_v55 = vmul.f32 0.044715, %v1677_v35 }
 0x1e1   : > { %v881_v39 = vpack.c.bf16 %v867_v31, %v866_v23  ;;  %v1253_v44 = vpop.eup %1252  ;;  %v858_v46 = vadd.f32 1.0, %v1251_v38  ;;  %v828_v51 = vmul.f32 0.7978846, %v812_v42  ;;  %v813_v54 = vadd.f32 %v797_v26, %v1659_v12 }
 0x1e2   : > { %v859_v47 = vadd.f32 1.0, %v1253_v44  ;;  %v774_v53 = vmul.f32 %v758_v50, %v1674_v34  ;;  %v766_v59 = vmul.f32 0.044715, %v1682_v43  ;;  %v775_v63 = vmul.f32 %v759_v55, %v1677_v35 }
 0x1e3   : > { %889 = vst [vmem:[%s1661_s18 + $0x8] sm:$0xff] %v881_v39  ;;  %v874_v30 = vmul.f32 %v858_v46, %v746_v45  ;;  %1258 = vtanh.f32 %v828_v51  ;;  %v1255_v60 = vpop.eup %1254  ;;  %v829_v62 = vmul.f32 0.7978846, %v813_v54  ;;  %v734_v37 = vadd.f32 %v733_v52, %v1614_v61 }
 0x1e4   : > { %v875_v20 = vmul.f32 %v859_v47, %v747_v57  ;;  %v790_v25 = vmul.f32 %v774_v53, %v1674_v34  ;;  %v852_v2 = vadd.f32 1.0, %v1255_v60  ;;  %v782_v3 = vmul.f32 %v766_v59, %v1682_v43 }
 0x1e5   : > { %v740_v4 = vmul.f32 0.5, %v1638_v41  ;;  %1260 = vtanh.f32 %v829_v62  ;;  %v791_v36 = vmul.f32 %v775_v63, %v1677_v35  ;;  %v741_v10 = vmul.f32 0.5, %v1648_v56 }
 0x1e6   : > { %v885_v0 = vpack.c.bf16 %v875_v20, %v874_v30  ;;  %v806_v6 = vadd.f32 %v790_v25, %v1674_v34  ;;  %v1257_v7 = vpop.eup %1256  ;;  %v798_v11 = vmul.f32 %v782_v3, %v1682_v43  ;;  %v767_v1 = vmul.f32 0.044715, %v734_v37 }
 0x1e7   : > { %v868_v5 = vmul.f32 %v852_v2, %v740_v4  ;;  %v853_v61 = vadd.f32 1.0, %v1257_v7  ;;  %v807_v13 = vadd.f32 %v791_v36, %v1677_v35  ;;  %v748_v17 = vmul.f32 0.5, %v1651_v58  ;;  %v959_v54 = vld [vmem:[%s1661_s18 + $0x20] sm:$0xff] (%p1376_p6) }
 0x1e8   : > { %893 = vst [vmem:[%s1661_s18 + $0x28] sm:$0xff] %v885_v0  ;;  %v822_v8 = vmul.f32 0.7978846, %v806_v6  ;;  %v814_v41 = vadd.f32 %v798_v11, %v1682_v43  ;;  %v783_v48 = vmul.f32 %v767_v1, %v734_v37  ;;  %v749_v21 = vmul.f32 0.5, %v1659_v12 }
 0x1e9   : > { %v1259_v49 = vpop.eup %1258  ;;  %v869_v14 = vmul.f32 %v853_v61, %v741_v10  ;;  %v823_v16 = vmul.f32 0.7978846, %v807_v13  ;;  %v742_v32 = vmul.f32 0.5, %v1674_v34  ;;  %v743_v39 = vmul.f32 0.5, %v1677_v35  ;;  %v951_v35 = vld [vmem:[%s1661_s18] sm:$0xff] (%p1376_p6)  ;;  %960 = vst [vmem:[%s908_s8 + $0x40] sm:$0xff] (%p1376_p6), %v959_v54 }
 0x1ea   : > { %v860_v15 = vadd.f32 1.0, %v1259_v49  ;;  %1262 = vtanh.f32 %v822_v8  ;;  %v830_v56 = vmul.f32 0.7978846, %v814_v41  ;;  %v799_v18 = vmul.f32 %v783_v48, %v734_v37  ;;  %952 = vst [vmem:[%s908_s8] sm:$0xff] (%p1376_p6), %v951_v35 }
 0x1eb   : > { %v1261_v9 = vpop.eup %1260  ;;  %v882_v19 = vpack.c.bf16 %v869_v14, %v868_v5  ;;  %1264 = vtanh.f32 %v823_v16  ;;  %v750_v45 = vmul.f32 0.5, %v1682_v43  ;;  %v751_v57 = vmul.f32 0.5, %v734_v37  ;;  %v953_v43 = vld [vmem:[%s1661_s18 + $0x8] sm:$0xff] (%p1376_p6) }
 0x1ec   : > { %v876_v23 = vmul.f32 %v860_v15, %v748_v17  ;;  %v861_v24 = vadd.f32 1.0, %v1261_v9  ;;  %1266 = vtanh.f32 %v830_v56  ;;  %v815_v27 = vadd.f32 %v799_v18, %v734_v37  ;;  %954 = vst [vmem:[%s908_s8 + $0x10] sm:$0xff] (%p1376_p6), %v953_v43 }
 0x1ed   : > { %890 = vst [vmem:[%s1661_s18 + $0x10] sm:$0xff] %v882_v19 }
 0x1ee   : > { %v877_v28 = vmul.f32 %v861_v24, %v749_v21  ;;  %v831_v29 = vmul.f32 0.7978846, %v815_v27 }
 0x1ef   : > { %v961_v53 = vld [vmem:[%s1661_s18 + $0x28] sm:$0xff] (%p1376_p6) }
 0x1f0   : > { %v1263_v31 = vpop.eup %1262  ;;  %v886_v22 = vpack.c.bf16 %v877_v28, %v876_v23  ;;  %1268 = vtanh.f32 %v831_v29  ;;  %962 = vst [vmem:[%s908_s8 + $0x50] sm:$0xff] (%p1376_p6), %v961_v53 }
 0x1f1   : > { %v854_v58 = vadd.f32 1.0, %v1263_v31  ;;  %v1265_v33 = vpop.eup %1264 }
 0x1f2   : > { %v1267_v38 = vpop.eup %1266  ;;  %894 = vst [vmem:[%s1661_s18 + $0x30] sm:$0xff] %v886_v22  ;;  %v855_v40 = vadd.f32 1.0, %v1265_v33 }
 0x1f3   : > { %v870_v12 = vmul.f32 %v854_v58, %v742_v32  ;;  %v862_v42 = vadd.f32 1.0, %v1267_v38 }
 0x1f4   : > { %v871_v44 = vmul.f32 %v855_v40, %v743_v39  ;;  %v955_v52 = vld [vmem:[%s1661_s18 + $0x10] sm:$0xff] (%p1376_p6) }
 0x1f5   : > { %v878_v50 = vmul.f32 %v862_v42, %v750_v45  ;;  %956 = vst [vmem:[%s908_s8 + $0x20] sm:$0xff] (%p1376_p6), %v955_v52 }
 0x1f6   : > { %v1269_v46 = vpop.eup %1268  ;;  %v883_v26 = vpack.c.bf16 %v871_v44, %v870_v12 }
 0x1f7   : > { %v863_v34 = vadd.f32 1.0, %v1269_v46 }
 0x1f8   : > { %891 = vst [vmem:[%s1661_s18 + $0x18] sm:$0xff] %v883_v26 }
 0x1f9   : > { %v879_v47 = vmul.f32 %v863_v34, %v751_v57  ;;  %902 = sbr.rel (!%p1376_p6) target bundleno = 518 (0x206), region = 82  ;;  %v963_v55 = vld [vmem:[%s1661_s18 + $0x30] sm:$0xff] (%p1376_p6) }
 0x1fa   : > { %964 = vst [vmem:[%s908_s8 + $0x60] sm:$0xff] (%p1376_p6), %v963_v55 }
 0x1fb   : > { %v887_v51 = vpack.c.bf16 %v879_v47, %v878_v50 }
 0x1fd   : > { %895 = vst [vmem:[%s1661_s18 + $0x38] sm:$0xff] %v887_v51 }
 0x1ff   : > { %v957_v30 = vld [vmem:[%s1661_s18 + $0x18] sm:$0xff] }
 0x200   : > { %958 = vst [vmem:[%s908_s8 + $0x30] sm:$0xff] %v957_v30 }
 0x204   : > { %v965_v20 = vld [vmem:[%s1661_s18 + $0x38] sm:$0xff] }
 0x205   : > { %966 = vst [vmem:[%s908_s8 + $0x70] sm:$0xff] %v965_v20 }
 0x206 PF: > { %s15_s22 = sadd.s32 1, %s1308_s22   ;;  %s1758_s18 = smov %s1296_s19 }
 0x207   : > { %p12_p12 = scmp.ge.s32.totalorder %s15_s22, 4   ;;  %s1759_s19 = smov %s1381_s28 }
 0x208   : > { %s1760_s20 = smov %s1304_s21  ;;  %s1761_s21 = smov %s1763_s23 }
 0x209   :  { %14 = sbr.rel (!%p12_p12) target bundleno = 3 (0x3), region = 157 }

// kernel: gpt_forward.12
= control target key start
LH: loop header
LB: loop body
LE: loop exit
PB: predicated region body
PF: predicated region fallthrough
CT: control target
= control target key end

     0   :  { %s1421_s12 = smov 0   ;;  %s1423_s13 = smov 0   ;;  %s1771_s0 = inlined_call_operand.vmem [shape: bf16[2,32,384], index: 0, kind: input, shape index: {}, may-alias: {0,1,2}]   ;;  %s1772_s1 = inlined_call_operand.vmem [shape: bf16[2,32,384], index: 1, kind: input, shape index: {}, may-alias: {0,1,2}]   ;;  %s1773_s2 = inlined_call_operand.vmem [shape: bf16[2,32,384], index: 2, kind: input, shape index: {}, may-alias: {0,1,2}]   ;;  %s1774_s3 = inlined_call_operand.vmem [shape: bf16[2,32,128], index: 3, kind: output, shape index: {}]  }
   0x1   :  { %s1425_s14 = smov 0   ;;  %s1427_s15 = smov 0  }
   0x2   :  { %s1429_s16 = smov 0  }
   0x3 LB: > { %s25_s17 = sadd.s32 1, %s1392_s15  ;;  %p41_p1 = scmp.ne.s32.totalorder %s1384_s13, %s1380_s12  ;;  %s1396_s16 = sphi %s1429_s16, %s13_s16   ;;  %s1392_s15 = sphi %s1427_s15, %s1779_s15   ;;  %s1388_s14 = sphi %s1425_s14, %s1778_s14   ;;  %s1384_s13 = sphi %s1423_s13, %s1777_s13   ;;  %s1380_s12 = sphi %s1421_s12, %s1776_s12  }
   0x4   : > { %p27_p0 = scmp.ge.s32.totalorder %s25_s17, 2  ;;  %p42_p2 = scmp.eq.s32.totalorder %s1396_s16, 0 }
   0x5   : > { %s34_s20 = sadd.s32 1, %s1384_s13  ;;  %p1139_p5 = scmp.ge.s32.totalorder %s1396_s16, 2 }
   0x6   : > { %s1781_s17 = smov (%p27_p0, %s25_s17), 0  ;;  %p1452_p3 = por %p42_p2, %p41_p1 }
   0x7   : > { %s29_s19 = ssub.s32 %s1392_s15, %s1781_s17  ;;  %155 = sbr.rel (%p1139_p5) target bundleno = 39 (0x27), region = 16 }
   0x8   : > { %p32_p4 = scmp.eq.s32.totalorder %s29_s19, 0 }
   0xa   : > { %s1460_s21 = scalar_select %p32_p4, %s1384_s13, %s34_s20  }
   0xc   : > { %158 = sbr.rel (!%p1452_p3) target bundleno = 21 (0x15), region = 20  ;;  %s160_s22 = sand.u32 (%p1452_p3), 1, %s1384_s13  }
   0xd   : > { %s1220_s23 = smul.u32 (%p1452_p3), 48, %s1392_s15  ;;  %s1140_s24 = sshll.u32 (%p1452_p3), %s160_s22, 4 }
   0xe   : > { %s162_s28 = scalar_lea.vmem (%p1452_p3), [#allocation2], %s1140_s24 }
   0xf   : > { %s166_s27 = scalar_lea.vmem (%p1452_p3), %s1771_s0, %s1220_s23 }
  0x10   : > { %v183_v0 = vld [vmem:[%s166_s27] sm:$0xf] (%p1452_p3)  ;;  %v185_v1 = vld [vmem:[%s166_s27 + $0xc] sm:$0xf] (%p1452_p3)  ;;  %v187_v2 = vld [vmem:[%s166_s27 + $0x18] sm:$0xf] (%p1452_p3) }
  0x11   : > { %184 = vst [vmem:[%s162_s28] sm:$0xf] %v183_v0  ;;  %v189_v3 = vld [vmem:[%s166_s27 + $0x24] sm:$0xf] }
  0x12   : > { %186 = vst [vmem:[%s162_s28 + $0x4] sm:$0xf] %v185_v1 }
  0x13   : > { %188 = vst [vmem:[%s162_s28 + $0x8] sm:$0xf] %v187_v2 }
  0x14   : > { %190 = vst [vmem:[%s162_s28 + $0xc] sm:$0xf] %v189_v3 }
  0x15 PF: > { %222 = sbr.rel (!%p1452_p3) target bundleno = 30 (0x1e), region = 61  ;;  %s224_s29 = sand.u32 (%p1452_p3), 1, %s1384_s13  }
  0x16   : > { %s1143_s30 = smul.u32 (%p1452_p3), 48, %s1392_s15  ;;  %s1142_s4 = sshll.u32 (%p1452_p3), %s224_s29, 4 }
  0x17   : > { %s226_s8 = scalar_lea.vmem (%p1452_p3), [#allocation3], %s1142_s4 }
  0x18   : > { %s1047_s7 = scalar_lea.vmem (%p1452_p3), %s1772_s1, %s1143_s30 }
  0x19   : > { %v1144_v4 = vld [vmem:[%s1047_s7 + $0x4] sm:$0xf] (%p1452_p3)  ;;  %v1145_v5 = vld [vmem:[%s1047_s7 + $0x10] sm:$0xf] (%p1452_p3)  ;;  %v1146_v6 = vld [vmem:[%s1047_s7 + $0x1c] sm:$0xf] (%p1452_p3) }
  0x1a   : > { %249 = vst [vmem:[%s226_s8] sm:$0xf] %v1144_v4  ;;  %v1147_v7 = vld [vmem:[%s1047_s7 + $0x28] sm:$0xf] }
  0x1b   : > { %251 = vst [vmem:[%s226_s8 + $0x4] sm:$0xf] %v1145_v5 }
  0x1c   : > { %253 = vst [vmem:[%s226_s8 + $0x8] sm:$0xf] %v1146_v6 }
  0x1d   : > { %255 = vst [vmem:[%s226_s8 + $0xc] sm:$0xf] %v1147_v7 }
  0x1e PF: > { %287 = sbr.rel (!%p1452_p3) target bundleno = 39 (0x27), region = 102  ;;  %s289_s9 = sand.u32 (%p1452_p3), 1, %s1384_s13  }
  0x1f   : > { %s1149_s10 = smul.u32 (%p1452_p3), 48, %s1392_s15  ;;  %s1148_s11 = sshll.u32 (%p1452_p3), %s289_s9, 4 }
  0x20   : > { %s291_s23 = scalar_lea.vmem (%p1452_p3), [#allocation4], %s1148_s11 }
  0x21   : > { %s1054_s22 = scalar_lea.vmem (%p1452_p3), %s1773_s2, %s1149_s10 }
  0x22   : > { %v1150_v8 = vld [vmem:[%s1054_s22 + $0x8] sm:$0xf] (%p1452_p3)  ;;  %v1151_v9 = vld [vmem:[%s1054_s22 + $0x14] sm:$0xf] (%p1452_p3)  ;;  %v1152_v10 = vld [vmem:[%s1054_s22 + $0x20] sm:$0xf] (%p1452_p3) }
  0x23   : > { %314 = vst [vmem:[%s291_s23] sm:$0xf] %v1150_v8  ;;  %v1153_v11 = vld [vmem:[%s1054_s22 + $0x2c] sm:$0xf] }
  0x24   : > { %316 = vst [vmem:[%s291_s23 + $0x4] sm:$0xf] %v1151_v9 }
  0x25   : > { %318 = vst [vmem:[%s291_s23 + $0x8] sm:$0xf] %v1152_v10 }
  0x26   : > { %320 = vst [vmem:[%s291_s23 + $0xc] sm:$0xf] %v1153_v11 }
  0x27 PF: > { %p1154_p6 = scmp.ge.s32.totalorder %s1396_s16, 1  ;;  %p351_p7 = scmp.lt.s32.totalorder %s1396_s16, 3 }
  0x29   : > { %p352_p8 = pnand %p1154_p6, %p351_p7 }
  0x2a   : > { %s358_s18 = sand.u32 (!%p352_p8), 1, %s1380_s12   ;;  %s1398_s12 = smov (!%p352_p8), 96  }
  0x2b   : > { %355 = sbr.rel (%p352_p8) target bundleno = 1364 (0x554), region = 143  ;;  %s1487_s24 = sshll.u32 (!%p352_p8), %s358_s18, 4 }
  0x2c   : > { %s367_s25 = scalar_lea.vmem (!%p352_p8), [#allocation3], %s1487_s24  ;;  %s360_s26 = scalar_lea.vmem (!%p352_p8), [#allocation2], %s1487_s24 }
  0x2d   : > { %s1399_s27 = smov (!%p352_p8), 64   ;;  %s1400_s28 = smov (!%p352_p8), 32  }
  0x2e   : > { %s374_s29 = scalar_lea.vmem (!%p352_p8), [#allocation4], %s1487_s24  ;;  %p408_p9 = scmp.lt.s32.totalorder (!%p352_p8), %s1388_s14, 1 }
  0x30   : > { %vm460_vm0 = vcmask 261120   ;;  %v1490_v12 = vld [vmem:[%s367_s25 + $0x8] sm:$0xff]  ;;  %v1205_v14 = vld [vmem:[%s367_s25] sm:$0xff]  ;;  %v417_v18 = vlaneseq  ;;  %s1783_s14 = smov (!%p408_p9, %s1388_s14), 1  ;;  %vm991_vm5 = vcmask 523264   ;;  %vm996_vm6 = vcmask 785408  }
  0x31   : > { %v471_v13 = vsel %vm460_vm0, %v1490_v12, 0  ;;  %v468_v15 = vsel %vm460_vm0, %v1205_v14, 0  ;;  %v1496_v16 = vld [vmem:[%s360_s26] sm:$0xff]  ;;  %v1500_v17 = vld [vmem:[%s360_s26 + $0x8] sm:$0xff]  ;;  %585 = vrot.lane.b32.xlu2 %v1490_v12, %s1398_s12  ;;  %s1202_s30 = sshll.u32 %s1783_s14, 4 }
  0x32   : > { %479 = vmatpush.bf16.xpose.msra.mxu0 %v471_v13  ;;  %v1512_v19 = vshrl.u32 %v417_v18, 7  ;;  %v1514_v20 = vand.u32 127, %v417_v18  ;;  %v1571_v62 = vld [vmem:[%s374_s29 + $0x8] sm:$0xff]  ;;  %v1574_v63 = vld [vmem:[%s374_s29] sm:$0xff]  ;;  %s415_s6 = scalar_lea.vmem %s1774_s3, %s1202_s30 }
  0x33   : > { %566 = vmatpush.bf16.msra.mxu1 %v1571_v62 }
  0x34   : > { %vm424_vm1 = vcmp.le.s32.totalorder %v1514_v20, %v1512_v19  ;;  %v1523_v24 = vadd.s32 8, %v1512_v19  ;;  %v1532_v28 = vadd.s32 16, %v1512_v19  ;;  %v1541_v32 = vadd.s32 24, %v1512_v19 }
  0x36   : > { %vm425_vm2 = vcmp.le.s32.totalorder %v1514_v20, %v1523_v24  ;;  %vm426_vm3 = vcmp.le.s32.totalorder %v1514_v20, %v1532_v28  ;;  %vm427_vm4 = vcmp.le.s32.totalorder %v1514_v20, %v1541_v32 }
  0x37   : > { %567 = vmatpush.bf16.msra.mxu1 %v1574_v63 }
  0x39   : > { %583 = vrot.lane.b32.xlu2 %v1205_v14, %s1398_s12 }
  0x3a   : > { %480 = vmatpush.bf16.xpose.msra.mxu0 %v468_v15 }
  0x41   : > { %1176 = vmatmul.msk.bf16.vlgmr.msra.gmra.mxu0 %vm460_vm0, %v1496_v16  ;;  %579 = vrot.lane.b32.xlu2 %v1496_v16, %s1398_s12 }
  0x49   : > { %581 = vrot.lane.b32.xlu2 %v1500_v17, %s1398_s12 }
  0x51   : > { %1177 = vmatmul.msk.bf16.gmra.mxu0 %vm460_vm0, %v1500_v17  ;;  %703 = vrot.lane.b32.xlu2 %v1205_v14, %s1399_s27 }
  0x59   : > { %823 = vrot.lane.b32.xlu2 %v1205_v14, %s1400_s28 }
  0x61   : > { %699 = vrot.lane.b32.xlu2 %v1496_v16, %s1399_s27 }
  0x69   : > { %701 = vrot.lane.b32.xlu2 %v1500_v17, %s1399_s27 }
  0x8b   : > { %v586_v36 = vpop.permute.xlu2 %585 }
  0x8c   : > { %v597_v37 = vsel %vm460_vm0, %v586_v36, 0 }
  0x8d   : > { %605 = vmatpush.bf16.xpose.msra.mxu2 %v597_v37 }
  0x93   : > { %v584_v38 = vpop.permute.xlu2 %583 }
  0x94   : > { %v594_v39 = vsel %vm460_vm0, %v584_v38, 0 }
  0x95   : > { %606 = vmatpush.bf16.xpose.msra.mxu2 %v594_v39 }
  0x9b   : > { %v580_v40 = vpop.permute.xlu2 %579 }
  0x9c   : > { %1188 = vmatmul.msk.bf16.vlgmr.msra.gmra.mxu2 %vm460_vm0, %v580_v40 }
  0xa3   : > { %v582_v46 = vpop.permute.xlu2 %581 }
  0xab   : > { %v704_v9 = vpop.permute.xlu2 %703 }
  0xac   : > { %1189 = vmatmul.msk.bf16.gmra.mxu2 %vm460_vm0, %v582_v46  ;;  %v714_v15 = vsel %vm460_vm0, %v704_v9, 0 }
  0xbe   : > { %v482_v21 = vpop.f32.mrf.mxu0 }
  0xbf   : > { %v492_v22 = vsel %vm424_vm1, %v482_v21, -1e+30 }
  0xc0   : > { %v496_v23 = vsel %vm460_vm0, %v492_v22, -inf }
  0xc1   : > { %497 = vmax.xlane.f32.xlu0 %v496_v23 }
  0xc6   : > { %v484_v25 = vpop.f32.mrf.mxu0 }
  0xc7   : > { %v493_v26 = vsel %vm425_vm2, %v484_v25, -1e+30 }
  0xc8   : > { %v499_v27 = vsel %vm460_vm0, %v493_v26, -inf }
  0xc9   : > { %500 = vmax.xlane.f32.xlu0 %v499_v27 }
  0xce   : > { %v487_v29 = vpop.f32.mrf.mxu0 }
  0xcf   : > { %v494_v30 = vsel %vm426_vm3, %v487_v29, -1e+30 }
  0xd0   : > { %v502_v31 = vsel %vm460_vm0, %v494_v30, -inf }
  0xd1   : > { %503 = vmax.xlane.f32.xlu1 %v502_v31 }
  0xd6   : > { %v489_v33 = vpop.f32.mrf.mxu0 }
  0xd7   : > { %v495_v34 = vsel %vm427_vm4, %v489_v33, -1e+30 }
  0xd8   : > { %v505_v35 = vsel %vm460_vm0, %v495_v34, -inf }
  0xd9   : > { %506 = vmax.xlane.f32.xlu1 %v505_v35  ;;  %v824_v35 = vpop.permute.xlu2 %823 }
  0xda   : > { %v834_v39 = vsel %vm460_vm0, %v824_v35, 0 }
  0xdd   : > { %705 = vrot.lane.b32.xlu0 %v1490_v12, %s1399_s27 }
  0xe1   : > { %v700_v38 = vpop.permute.xlu2 %699 }
 0x11f   : > { %v608_v2 = vpop.f32.mrf.mxu2 }
 0x120   : > { %v1581_v7 = vsel %vm424_vm1, %v608_v2, -1e+30 }
 0x127   : > { %v610_v4 = vpop.f32.mrf.mxu2 }
 0x128   : > { %v1586_v8 = vsel %vm425_vm2, %v610_v4, -1e+30 }
 0x129   : > { %v625_v14 = vsel %vm460_vm0, %v1586_v8, -inf }
 0x12a   : > { %626 = vmax.xlane.f32.xlu2 %v625_v14 }
 0x12f   : > { %v613_v11 = vpop.f32.mrf.mxu2 }
 0x130   : > { %v1597_v21 = vsel %vm426_vm3, %v613_v11, -1e+30 }
 0x131   : > { %v628_v27 = vsel %vm460_vm0, %v1597_v21, -inf }
 0x134   : > { %v498_v41 = vpop.xlane.xlu0 %497 }
 0x135   : > { %v508_v42 = vsub.f32 %v492_v22, %v498_v41  ;;  %v702_v41 = vpop.permute.xlu2 %701 }
 0x137   : > { %v512_v43 = vmul.f32 1.442695, %v508_v42  ;;  %v615_v22 = vpop.f32.mrf.mxu2 }
 0x138   : > { %v1602_v25 = vsel %vm427_vm4, %v615_v22, -1e+30 }
 0x139   : > { %1294 = vpow2.f32 %v512_v43 }
 0x13c   : > { %v501_v44 = vpop.xlane.xlu0 %500 }
 0x13d   : > { %v509_v45 = vsub.f32 %v493_v26, %v501_v44  ;;  %v631_v26 = vsel %vm460_vm0, %v1602_v25, -inf }
 0x13f   : > { %v1295_v47 = vpop.eup %1294  ;;  %v514_v48 = vmul.f32 1.442695, %v509_v45 }
 0x140   : > { %v520_v49 = vsel %vm460_vm0, %v1295_v47, 0.0 }
 0x141   : > { %1296 = vpow2.f32 %v514_v48  ;;  %521 = vadd.xlane.f32.xlu0 %v520_v49 }
 0x144   : > { %v504_v50 = vpop.xlane.xlu1 %503 }
 0x145   : > { %v510_v51 = vsub.f32 %v494_v30, %v504_v50 }
 0x147   : > { %v1297_v52 = vpop.eup %1296  ;;  %v516_v53 = vmul.f32 1.442695, %v510_v51 }
 0x148   : > { %v523_v54 = vsel %vm460_vm0, %v1297_v52, 0.0 }
 0x149   : > { %1298 = vpow2.f32 %v516_v53  ;;  %524 = vadd.xlane.f32.xlu1 %v523_v54 }
 0x14c   : > { %v507_v55 = vpop.xlane.xlu1 %506 }
 0x14d   : > { %v511_v56 = vsub.f32 %v495_v34, %v507_v55 }
 0x14f   : > { %v1299_v57 = vpop.eup %1298  ;;  %v518_v58 = vmul.f32 1.442695, %v511_v56  ;;  %v706_v0 = vpop.permute.xlu0 %705 }
 0x150   : > { %v526_v59 = vsel %vm460_vm0, %v1299_v57, 0.0  ;;  %v717_v1 = vsel %vm460_vm0, %v706_v0, 0 }
 0x151   : > { %1300 = vpow2.f32 %v518_v58  ;;  %527 = vadd.xlane.f32.xlu0 %v526_v59  ;;  %725 = vmatpush.bf16.xpose.msrb.mxu1 %v717_v1 }
 0x157   : > { %v1301_v60 = vpop.eup %1300 }
 0x158   : > { %v529_v61 = vsel %vm460_vm0, %v1301_v60, 0.0 }
 0x159   : > { %530 = vadd.xlane.f32.xlu1 %v529_v61  ;;  %726 = vmatpush.bf16.xpose.msrb.mxu1 %v714_v15 }
 0x165   : > { %819 = vrot.lane.b32.xlu0 %v1496_v16, %s1400_s28  ;;  %v622_v16 = vsel %vm460_vm0, %v1581_v7, -inf }
 0x172   : > { %825 = vrot.lane.b32.xlu1 %v1490_v12, %s1400_s28 }
 0x17a   : > { %821 = vrot.lane.b32.xlu1 %v1500_v17, %s1400_s28 }
 0x18f   : > { %623 = vmax.xlane.f32.xlu0 %v622_v16 }
 0x197   : > { %632 = vmax.xlane.f32.xlu0 %v631_v26 }
 0x1a4   : > { %629 = vmax.xlane.f32.xlu1 %v628_v27 }
 0x1b4   : > { %v522_v3 = vpop.xlane.xlu0 %521 }
 0x1b5   : > { %1302 = vrcp.f32 %v522_v3 }
 0x1bb   : > { %v1303_v6 = vpop.eup %1302 }
 0x1bc   : > { %v525_v5 = vpop.xlane.xlu1 %524  ;;  %v536_v12 = vmul.f32 %v1303_v6, %v1295_v47 }
 0x1bd   : > { %1304 = vrcp.f32 %v525_v5 }
 0x1c3   : > { %v1305_v10 = vpop.eup %1304 }
 0x1c4   : > { %v537_v13 = vmul.f32 %v1305_v10, %v1297_v52  ;;  %v528_v18 = vpop.xlane.xlu0 %527  ;;  %v627_v10 = vpop.xlane.xlu2 %626 }
 0x1c5   : > { %1306 = vrcp.f32 %v528_v18 }
 0x1c6   : > { %v540_v17 = vpack.c.bf16 %v537_v13, %v536_v12 }
 0x1c8   : > { %1186 = vmatmul.msk.bf16.vlgmr.msra.gmra.mxu1 %vm460_vm0, %v540_v17  ;;  %v635_v17 = vsub.f32 %v1586_v8, %v627_v10 }
 0x1ca   : > { %v640_v22 = vmul.f32 1.442695, %v635_v17 }
 0x1cb   : > { %v1307_v29 = vpop.eup %1306 }
 0x1cc   : > { %v531_v23 = vpop.xlane.xlu1 %530  ;;  %v538_v31 = vmul.f32 %v1307_v29, %v1299_v57 }
 0x1cd   : > { %1308 = vrcp.f32 %v531_v23 }
 0x1d3   : > { %v1309_v30 = vpop.eup %1308 }
 0x1d4   : > { %v539_v33 = vmul.f32 %v1309_v30, %v1301_v60 }
 0x1d6   : > { %v541_v34 = vpack.c.bf16 %v539_v33, %v538_v31 }
 0x1d7   : > { %v820_v40 = vpop.permute.xlu0 %819 }
 0x1d8   : > { %1187 = vmatmul.msk.bf16.gmra.mxu1 %vm460_vm0, %v541_v34 }
 0x1e4   : > { %v826_v36 = vpop.permute.xlu1 %825 }
 0x1e5   : > { %v837_v37 = vsel %vm460_vm0, %v826_v36, 0 }
 0x1e6   : > { %845 = vmatpush.bf16.xpose.msrb.mxu0 %v837_v37 }
 0x1e8   : > { %1192 = vmatmul.msk.bf16.vlgmr.msrb.gmra.mxu1 %vm460_vm0, %v700_v38 }
 0x1ec   : > { %v822_v42 = vpop.permute.xlu1 %821 }
 0x1ee   : > { %846 = vmatpush.bf16.xpose.msrb.mxu0 %v834_v39 }
 0x1f5   : > { %1196 = vmatmul.msk.bf16.vlgmr.msrb.gmra.mxu0 %vm460_vm0, %v820_v40 }
 0x1f8   : > { %1193 = vmatmul.msk.bf16.gmra.mxu1 %vm460_vm0, %v702_v41 }
 0x202   : > { %v624_v60 = vpop.xlane.xlu0 %623 }
 0x203   : > { %v634_v0 = vsub.f32 %v1581_v7, %v624_v60 }
 0x205   : > { %1197 = vmatmul.msk.bf16.gmra.mxu0 %vm460_vm0, %v822_v42  ;;  %v638_v1 = vmul.f32 1.442695, %v634_v0 }
 0x207   : > { %1310 = vpow2.f32 %v638_v1 }
 0x20a   : > { %v633_v9 = vpop.xlane.xlu0 %632 }
 0x20b   : > { %v637_v35 = vsub.f32 %v1602_v25, %v633_v9 }
 0x20d   : > { %v1652_v3 = vpop.eup %1310 }
 0x20e   : > { %v646_v4 = vsel %vm460_vm0, %v1652_v3, 0.0 }
 0x217   : > { %v630_v26 = vpop.xlane.xlu1 %629 }
 0x218   : > { %v636_v30 = vsub.f32 %v1597_v21, %v630_v26  ;;  %v644_v21 = vmul.f32 1.442695, %v637_v35 }
 0x21a   : > { %v642_v31 = vmul.f32 1.442695, %v636_v30 }
 0x245   : > { %v1615_v43 = vpop.f32.mrf.mxu1 }
 0x24d   : > { %v1621_v47 = vpop.f32.mrf.mxu1 }
 0x255   : > { %v1627_v51 = vpop.f32.mrf.mxu1 }
 0x25d   : > { %v1643_v57 = vpop.f32.mrf.mxu1 }
 0x265   : > { %v728_v59 = vpop.f32.mrf.mxu1 }
 0x266   : > { %v738_v25 = vsel %vm424_vm1, %v728_v59, -1e+30 }
 0x26d   : > { %v730_v61 = vpop.f32.mrf.mxu1 }
 0x26e   : > { %v739_v23 = vsel %vm425_vm2, %v730_v61, -1e+30 }
 0x26f   : > { %v745_v27 = vsel %vm460_vm0, %v739_v23, -inf }
 0x272   : > { %v848_v44 = vpop.f32.mrf.mxu0 }
 0x273   : > { %v858_v45 = vsel %vm424_vm1, %v848_v44, -1e+30 }
 0x274   : > { %v862_v46 = vsel %vm460_vm0, %v858_v45, -inf }
 0x275   : > { %863 = vmax.xlane.f32.xlu0 %v862_v46  ;;  %v733_v2 = vpop.f32.mrf.mxu1 }
 0x276   : > { %v1677_v33 = vsel %vm426_vm3, %v733_v2, -1e+30 }
 0x277   : > { %v748_v24 = vsel %vm460_vm0, %v1677_v33, -inf }
 0x27a   : > { %v850_v48 = vpop.f32.mrf.mxu0 }
 0x27b   : > { %v859_v49 = vsel %vm425_vm2, %v850_v48, -1e+30 }
 0x27c   : > { %v865_v50 = vsel %vm460_vm0, %v859_v49, -inf }
 0x27d   : > { %866 = vmax.xlane.f32.xlu2 %v865_v50  ;;  %v735_v5 = vpop.f32.mrf.mxu1 }
 0x27e   : > { %v1659_v6 = vsel %vm427_vm4, %v735_v5, -1e+30 }
 0x27f   : > { %v751_v7 = vsel %vm460_vm0, %v1659_v6, -inf }
 0x282   : > { %v853_v52 = vpop.f32.mrf.mxu0 }
 0x283   : > { %v1632_v53 = vsel %vm426_vm3, %v853_v52, -1e+30 }
 0x284   : > { %v868_v54 = vsel %vm460_vm0, %v1632_v53, -inf }
 0x285   : > { %869 = vmax.xlane.f32.xlu2 %v868_v54 }
 0x289   : > { %668 = vrot.lane.b32.xlu0 %v1574_v63, %s1398_s12 }
 0x28a   : > { %v855_v55 = vpop.f32.mrf.mxu0 }
 0x28b   : > { %v1641_v56 = vsel %vm427_vm4, %v855_v55, -1e+30 }
 0x28c   : > { %v871_v58 = vsel %vm460_vm0, %v1641_v56, -inf }
 0x28d   : > { %872 = vmax.xlane.f32.xlu1 %v871_v58 }
 0x29d   : > { %790 = vrot.lane.b32.xlu2 %v1571_v62, %s1399_s27 }
 0x2a6   : > { %670 = vrot.lane.b32.xlu1 %v1571_v62, %s1398_s12 }
 0x2b3   : > { %647 = vadd.xlane.f32.xlu0 %v646_v4 }
 0x2bb   : > { %752 = vmax.xlane.f32.xlu0 %v751_v7 }
 0x2e8   : > { %v864_v11 = vpop.xlane.xlu0 %863 }
 0x2e9   : > { %v874_v12 = vsub.f32 %v858_v45, %v864_v11  ;;  %v742_v45 = vsel %vm460_vm0, %v738_v25, -inf }
 0x2eb   : > { %v878_v13 = vmul.f32 1.442695, %v874_v12 }
 0x2ed   : > { %1312 = vpow2.f32 %v878_v13 }
 0x2f0   : > { %v867_v14 = vpop.xlane.xlu2 %866 }
 0x2f1   : > { %v875_v15 = vsub.f32 %v859_v49, %v867_v14 }
 0x2f3   : > { %v1663_v16 = vpop.eup %1312  ;;  %v880_v18 = vmul.f32 1.442695, %v875_v15 }
 0x2f4   : > { %v886_v32 = vsel %vm460_vm0, %v1663_v16, 0.0 }
 0x2f5   : > { %1314 = vpow2.f32 %v880_v18  ;;  %887 = vadd.xlane.f32.xlu1 %v886_v32 }
 0x2f6   : > { %1316 = vpow2.f32 %v640_v22 }
 0x2f7   : > { %1318 = vpow2.f32 %v642_v31 }
 0x2f8   : > { %1320 = vpow2.f32 %v644_v21  ;;  %v870_v40 = vpop.xlane.xlu2 %869 }
 0x2f9   : > { %v876_v48 = vsub.f32 %v1632_v53, %v870_v40 }
 0x2fb   : > { %v1315_v29 = vpop.eup %1314  ;;  %v669_v46 = vpop.permute.xlu0 %668  ;;  %v882_v49 = vmul.f32 1.442695, %v876_v48 }
 0x2fc   : > { %v889_v8 = vsel %vm460_vm0, %v1315_v29, 0.0  ;;  %v1317_v34 = vpop.eup %1316 }
 0x2fd   : > { %890 = vadd.xlane.f32.xlu2 %v889_v8  ;;  %746 = vmax.xlane.f32.xlu1 %v745_v27  ;;  %v649_v36 = vsel %vm460_vm0, %v1317_v34, 0.0  ;;  %v1319_v37 = vpop.eup %1318  ;;  %1322 = vpow2.f32 %v882_v49 }
 0x2fe   : > { %v652_v38 = vsel %vm460_vm0, %v1319_v37, 0.0  ;;  %v1321_v39 = vpop.eup %1320 }
 0x2ff   : > { %v655_v41 = vsel %vm460_vm0, %v1321_v39, 0.0 }
 0x300   : > { %v1684_v28 = vpop.xlane.xlu1 %872  ;;  %v791_v44 = vpop.permute.xlu2 %790 }
 0x303   : > { %v1694_v50 = vpop.eup %1322 }
 0x304   : > { %v892_v19 = vsel %vm460_vm0, %v1694_v50, 0.0 }
 0x305   : > { %650 = vadd.xlane.f32.xlu2 %v649_v36  ;;  %749 = vmax.xlane.f32.xlu1 %v748_v24  ;;  %v877_v36 = vsub.f32 %v1641_v56, %v1684_v28 }
 0x307   : > { %v884_v21 = vmul.f32 1.442695, %v877_v36 }
 0x30d   : > { %653 = vadd.xlane.f32.xlu2 %v652_v38 }
 0x315   : > { %656 = vadd.xlane.f32.xlu2 %v655_v41 }
 0x318   : > { %v671_v42 = vpop.permute.xlu1 %670 }
 0x319   : > { %686 = vmatpush.bf16.msra.mxu3 %v671_v42 }
 0x31d   : > { %743 = vmax.xlane.f32.xlu2 %v742_v45  ;;  %687 = vmatpush.bf16.msra.mxu3 %v669_v46 }
 0x31e   : > { %908 = vrot.lane.b32.xlu1 %v1574_v63, %s1400_s28 }
 0x321   : > { %806 = vmatpush.bf16.msrb.mxu3 %v791_v44 }
 0x326   : > { %v648_v59 = vpop.xlane.xlu0 %647 }
 0x348   : > { %893 = vadd.xlane.f32.xlu1 %v892_v19 }
 0x368   : > { %v888_v20 = vpop.xlane.xlu1 %887 }
 0x369   : > { %1324 = vrcp.f32 %v888_v20 }
 0x36f   : > { %v1325_v60 = vpop.eup %1324 }
 0x370   : > { %v891_v52 = vpop.xlane.xlu2 %890  ;;  %v747_v54 = vpop.xlane.xlu1 %746  ;;  %v1699_v53 = vmul.f32 %v1325_v60, %v1663_v16 }
 0x371   : > { %1326 = vrcp.f32 %v891_v52  ;;  %v755_v55 = vsub.f32 %v739_v23, %v747_v54 }
 0x373   : > { %v760_v58 = vmul.f32 1.442695, %v755_v55 }
 0x375   : > { %1328 = vpow2.f32 %v760_v58 }
 0x376   : > { %1330 = vrcp.f32 %v648_v59 }
 0x377   : > { %v1327_v61 = vpop.eup %1326 }
 0x378   : > { %v1701_v0 = vmul.f32 %v1327_v61, %v1315_v29  ;;  %v651_v1 = vpop.xlane.xlu2 %650  ;;  %v753_v29 = vpop.xlane.xlu0 %752 }
 0x379   : > { %1332 = vrcp.f32 %v651_v1  ;;  %v757_v30 = vsub.f32 %v1659_v6, %v753_v29 }
 0x37a   : > { %v906_v2 = vpack.c.bf16 %v1701_v0, %v1699_v53 }
 0x37b   : > { %v1329_v4 = vpop.eup %1328  ;;  %v764_v8 = vmul.f32 1.442695, %v757_v30 }
 0x37c   : > { %v769_v5 = vsel %vm460_vm0, %v1329_v4, 0.0  ;;  %v1331_v7 = vpop.eup %1330 }
 0x37d   : > { %770 = vadd.xlane.f32.xlu0 %v769_v5  ;;  %v662_v11 = vmul.f32 %v1331_v7, %v1652_v3 }
 0x37f   : > { %v1333_v9 = vpop.eup %1332 }
 0x380   : > { %v654_v10 = vpop.xlane.xlu2 %653  ;;  %v663_v12 = vmul.f32 %v1333_v9, %v1317_v34  ;;  %v750_v34 = vpop.xlane.xlu1 %749 }
 0x381   : > { %1334 = vrcp.f32 %v654_v10  ;;  %v756_v24 = vsub.f32 %v1677_v33, %v750_v34 }
 0x382   : > { %v666_v13 = vpack.c.bf16 %v663_v12, %v662_v11 }
 0x383   : > { %v762_v35 = vmul.f32 1.442695, %v756_v24 }
 0x384   : > { %1190 = vmatmul.msk.bf16.vlgmr.msra.gmra.mxu3 %vm460_vm0, %v666_v13 }
 0x387   : > { %v1335_v15 = vpop.eup %1334 }
 0x388   : > { %v657_v14 = vpop.xlane.xlu2 %656  ;;  %v664_v18 = vmul.f32 %v1335_v15, %v1319_v37 }
 0x389   : > { %1336 = vrcp.f32 %v657_v14 }
 0x38f   : > { %v1337_v16 = vpop.eup %1336 }
 0x390   : > { %v744_v17 = vpop.xlane.xlu2 %743  ;;  %v665_v32 = vmul.f32 %v1337_v16, %v1321_v39  ;;  %v909_v19 = vpop.permute.xlu1 %908 }
 0x391   : > { %v754_v22 = vsub.f32 %v738_v25, %v744_v17  ;;  %788 = vrot.lane.b32.xlu0 %v1574_v63, %s1399_s27 }
 0x392   : > { %v667_v23 = vpack.c.bf16 %v665_v32, %v664_v18 }
 0x393   : > { %v758_v26 = vmul.f32 1.442695, %v754_v22 }
 0x394   : > { %1191 = vmatmul.msk.bf16.gmra.mxu3 %vm460_vm0, %v667_v23 }
 0x395   : > { %1338 = vpow2.f32 %v758_v26 }
 0x396   : > { %1340 = vpow2.f32 %v764_v8 }
 0x397   : > { %1342 = vpow2.f32 %v762_v35 }
 0x398   : > { %1344 = vpow2.f32 %v884_v21 }
 0x39b   : > { %v1339_v3 = vpop.eup %1338 }
 0x39c   : > { %v766_v27 = vsel %vm460_vm0, %v1339_v3, 0.0  ;;  %v1341_v31 = vpop.eup %1340 }
 0x39d   : > { %767 = vadd.xlane.f32.xlu2 %v766_v27  ;;  %v775_v63 = vsel %vm460_vm0, %v1341_v31, 0.0  ;;  %v1343_v37 = vpop.eup %1342 }
 0x39e   : > { %v772_v6 = vsel %vm460_vm0, %v1343_v37, 0.0  ;;  %v1345_v38 = vpop.eup %1344 }
 0x3b5   : > { %910 = vrot.lane.b32.xlu2 %v1571_v62, %s1400_s28  ;;  %v895_v62 = vsel %vm460_vm0, %v1345_v38, 0.0 }
 0x3bb   : > { %776 = vadd.xlane.f32.xlu0 %v775_v63  ;;  %v894_v58 = vpop.xlane.xlu1 %893 }
 0x3de   : > { %773 = vadd.xlane.f32.xlu2 %v772_v6 }
 0x3e6   : > { %896 = vadd.xlane.f32.xlu2 %v895_v62 }
 0x3f0   : > { %v771_v39 = vpop.xlane.xlu0 %770 }
 0x3f1   : > { %1346 = vrcp.f32 %v771_v39 }
 0x3f7   : > { %v1347_v56 = vpop.eup %1346 }
 0x3f8   : > { %v783_v45 = vmul.f32 %v1347_v56, %v1329_v4 }
 0x403   : > { %v789_v40 = vpop.permute.xlu0 %788 }
 0x404   : > { %807 = vmatpush.bf16.msrb.mxu3 %v789_v40 }
 0x407   : > { %v689_v41 = vpop.f32.mrf.mxu3 }
 0x40f   : > { %v691_v33 = vpop.f32.mrf.mxu3 }
 0x410   : > { %v1264_v42 = vpack.i.bf16 %v691_v33, %v689_v41  ;;  %v768_v25 = vpop.xlane.xlu2 %767 }
 0x411   : > { %1348 = vrcp.f32 %v768_v25 }
 0x412   : > { %1265 = vrot.lane.b32.xlu2 %v1264_v42, %s1400_s28 }
 0x417   : > { %v1349_v28 = vpop.eup %1348  ;;  %v694_v44 = vpop.f32.mrf.mxu3 }
 0x418   : > { %v782_v46 = vmul.f32 %v1349_v28, %v1339_v3  ;;  %v911_v48 = vpop.permute.xlu2 %910 }
 0x419   : > { %926 = vmatpush.bf16.msrb.mxu2 %v911_v48 }
 0x41a   : > { %v786_v49 = vpack.c.bf16 %v783_v45, %v782_v46 }
 0x41c   : > { %1194 = vmatmul.msk.bf16.vlgmr.msrb.gmra.mxu3 %vm460_vm0, %v786_v49 }
 0x41d   : > { %927 = vmatpush.bf16.msrb.mxu2 %v909_v19 }
 0x41f   : > { %v696_v20 = vpop.f32.mrf.mxu3 }
 0x420   : > { %v1269_v52 = vpack.i.bf16 %v696_v20, %v694_v44  ;;  %1198 = vmatmul.msk.bf16.vlgmr.msrb.gmra.mxu2 %vm460_vm0, %v906_v2 }
 0x422   : > { %1270 = vrot.lane.b32.xlu0 %v1269_v52, %s1400_s28 }
 0x42e   : > { %v777_v54 = vpop.xlane.xlu0 %776 }
 0x42f   : > { %1350 = vrcp.f32 %v777_v54 }
 0x435   : > { %v1351_v59 = vpop.eup %1350 }
 0x436   : > { %v785_v4 = vmul.f32 %v1351_v59, %v1341_v31 }
 0x451   : > { %v774_v55 = vpop.xlane.xlu2 %773 }
 0x452   : > { %1352 = vrcp.f32 %v774_v55 }
 0x453   : > { %1354 = vrcp.f32 %v894_v58 }
 0x458   : > { %v1353_v60 = vpop.eup %1352 }
 0x459   : > { %v897_v61 = vpop.xlane.xlu2 %896  ;;  %v784_v1 = vmul.f32 %v1353_v60, %v1343_v37  ;;  %v1355_v53 = vpop.eup %1354 }
 0x45a   : > { %1356 = vrcp.f32 %v897_v61  ;;  %v904_v2 = vmul.f32 %v1355_v53, %v1694_v50 }
 0x45b   : > { %v787_v5 = vpack.c.bf16 %v785_v4, %v784_v1 }
 0x45d   : > { %1195 = vmatmul.msk.bf16.gmra.mxu3 %vm460_vm0, %v787_v5 }
 0x460   : > { %v1357_v0 = vpop.eup %1356 }
 0x461   : > { %v905_v7 = vmul.f32 %v1357_v0, %v1345_v38 }
 0x463   : > { %v907_v9 = vpack.c.bf16 %v905_v7, %v904_v2 }
 0x465   : > { %1199 = vmatmul.msk.bf16.gmra.mxu2 %vm460_vm0, %v907_v9 }
 0x46c   : > { %v1266_v26 = vpop.permute.xlu2 %1265 }
 0x46d   : > { %v1268_v27 = vunpack.i.h.bf16 %v1266_v26  ;;  %v1267_v29 = vunpack.i.l.bf16 %v1266_v26 }
 0x46f   : > { %v988_v63 = vsel %vm460_vm0, %v1621_v47, %v1268_v27  ;;  %v987_v34 = vsel %vm460_vm0, %v1615_v43, %v1267_v29 }
 0x494   : > { %v1271_v23 = vpop.permute.xlu0 %1270 }
 0x495   : > { %v1273_v62 = vunpack.i.h.bf16 %v1271_v23  ;;  %v1272_v39 = vunpack.i.l.bf16 %v1271_v23 }
 0x497   : > { %v990_v33 = vsel %vm460_vm0, %v1643_v57, %v1273_v62  ;;  %v989_v42 = vsel %vm460_vm0, %v1627_v51, %v1272_v39 }
 0x49f   : > { %v809_v10 = vpop.f32.mrf.mxu3 }
 0x4a3   : > { %v929_v11 = vpop.f32.mrf.mxu2 }
 0x4a7   : > { %v811_v12 = vpop.f32.mrf.mxu3 }
 0x4a8   : > { %v1274_v13 = vpack.i.bf16 %v811_v12, %v809_v10 }
 0x4aa   : > { %1275 = vrot.lane.b32.xlu1 %v1274_v13, %s1399_s27 }
 0x4ab   : > { %v931_v14 = vpop.f32.mrf.mxu2 }
 0x4ac   : > { %v1284_v15 = vpack.i.bf16 %v931_v14, %v929_v11 }
 0x4ae   : > { %1285 = vrot.lane.b32.xlu0 %v1284_v15, %s1398_s12 }
 0x4e0   : > { %v814_v16 = vpop.f32.mrf.mxu3 }
 0x4e8   : > { %v816_v17 = vpop.f32.mrf.mxu3  ;;  %v934_v18 = vpop.f32.mrf.mxu2 }
 0x4e9   : > { %v1279_v50 = vpack.i.bf16 %v816_v17, %v814_v16 }
 0x4eb   : > { %1280 = vrot.lane.b32.xlu2 %v1279_v50, %s1399_s27 }
 0x4f0   : > { %v936_v32 = vpop.f32.mrf.mxu2 }
 0x4f1   : > { %v1289_v22 = vpack.i.bf16 %v936_v32, %v934_v18 }
 0x4f3   : > { %1290 = vrot.lane.b32.xlu2 %v1289_v22, %s1398_s12 }
 0x51c   : > { %v1276_v3 = vpop.permute.xlu1 %1275 }
 0x51d   : > { %v1278_v30 = vunpack.i.h.bf16 %v1276_v3  ;;  %v1277_v8 = vunpack.i.l.bf16 %v1276_v3 }
 0x51f   : > { %v993_v36 = vsel %vm991_vm5, %v988_v63, %v1278_v30  ;;  %v992_v21 = vsel %vm991_vm5, %v987_v34, %v1277_v8 }
 0x520   : > { %v1286_v31 = vpop.permute.xlu0 %1285 }
 0x521   : > { %v1288_v24 = vunpack.i.h.bf16 %v1286_v31  ;;  %v1287_v35 = vunpack.i.l.bf16 %v1286_v31 }
 0x523   : > { %v997_v37 = vsel %vm996_vm6, %v992_v21, %v1287_v35  ;;  %v998_v6 = vsel %vm996_vm6, %v993_v36, %v1288_v24 }
 0x524   : > { %v1212_v38 = vpack.c.bf16 %v998_v6, %v997_v37 }
 0x526   : > { %1213 = vst [vmem:[%s415_s6] sm:$0xff] %v1212_v38  }
 0x545   : > { %v1281_v47 = vpop.permute.xlu2 %1280 }
 0x546   : > { %v1283_v43 = vunpack.i.h.bf16 %v1281_v47  ;;  %v1282_v40 = vunpack.i.l.bf16 %v1281_v47 }
 0x548   : > { %v995_v28 = vsel %vm991_vm5, %v990_v33, %v1283_v43  ;;  %v994_v44 = vsel %vm991_vm5, %v989_v42, %v1282_v40 }
 0x54d   : > { %v1291_v41 = vpop.permute.xlu2 %1290 }
 0x54e   : > { %v1293_v25 = vunpack.i.h.bf16 %v1291_v41  ;;  %v1292_v56 = vunpack.i.l.bf16 %v1291_v41 }
 0x550   : > { %v1000_v45 = vsel %vm996_vm6, %v995_v28, %v1293_v25  ;;  %v999_v46 = vsel %vm996_vm6, %v994_v44, %v1292_v56 }
 0x551   : > { %v1217_v48 = vpack.c.bf16 %v1000_v45, %v999_v46 }
 0x553   : > { %1219 = vst [vmem:[%s415_s6 + $0x8] sm:$0xff] %v1217_v48  }
 0x554 PF: > { %s13_s16 = sadd.s32 1, %s1396_s16   ;;  %s1776_s12 = smov %s1384_s13 }
 0x555   : > { %p10_p10 = scmp.ge.s32.totalorder %s13_s16, 4   ;;  %s1777_s13 = smov %s1460_s21 }
 0x556   : > { %s1778_s14 = smov %s1392_s15  ;;  %s1779_s15 = smov %s1781_s17 }
 0x557   :  { %12 = sbr.rel (!%p10_p10) target bundleno = 3 (0x3), region = 206 }

// kernel: gpt_forward.20
= control target key start
LH: loop header
LB: loop body
LE: loop exit
PB: predicated region body
PF: predicated region fallthrough
CT: control target
= control target key end

     0   :  { %9 = vsyncpa [#allocation4], 0  ;;  %s1219_s15 = smov 0   ;;  %s1221_s16 = smov 0   ;;  %s1299_s0 = inlined_call_operand.vmem [shape: bf16[64,512], index: 0, kind: input, shape index: {}]   ;;  %s1300_s1 = inlined_call_operand.hbm [shape: bf16[512,128], index: 1, kind: input, shape index: {}]   ;;  %s1301_s2 = inlined_call_operand.vmem [shape: f32[1,128], index: 2, kind: input, shape index: {}]   ;;  %s1302_s3 = inlined_call_operand.vmem [shape: f32[64,128], index: 3, kind: input, shape index: {}]   ;;  %s1303_s4 = inlined_call_operand.vmem [shape: f32[64,128], index: 4, kind: output, shape index: {}]  }
   0x1   :  { %s1223_s17 = smov 0  }
   0x2 LB: > { %s877_s18 = sadd.s32 4294967295, %s1189_s17   ;;  %s34_s19 = sadd.s32 1, %s1185_s16  ;;  %s1189_s17 = sphi %s1223_s17, %s15_s17   ;;  %s1185_s16 = sphi %s1221_s16, %s1305_s16   ;;  %s1181_s15 = sphi %s1219_s15, %s1304_s15  }
   0x3   : > { %p36_p0 = scmp.ge.s32.totalorder %s34_s19, 2  ;;  %p879_p1 = scmp.ge.s32.totalorder %s1189_s17, 1 }
   0x4   : > { %p177_p2 = scmp.lt.s32.totalorder %s1189_s17, 3  ;;  %p1103_p4 = scmp.eq.s32.totalorder %s877_s18, 0 }
   0x5   : > { %s1307_s19 = smov (%p36_p0, %s34_s19), 0  ;;  %s192_s22 = sshll.u32 %s1300_s1, 4  ;;  %s193_s22 = int_to_ptr.hbm [resolvable:$true] %s192_s22 }
   0x6   : > { %p178_p3 = pnand %p879_p1, %p177_p2  ;;  %s1191_s23 = smov [#allocation3]  }
   0x7   : > { %s194_s24 = sshll.u32 %s1191_s23, 4  ;;  %s1192_s25 = smov 64   ;;  %s195_s24 = int_to_ptr.vmem [resolvable:$true] %s194_s24 }
   0x8   : > { %p1099_p5 = pneg %p178_p3  ;;  %s1193_s26 = smov 4  }
   0x9   : > { %243 = sbr.rel (%p178_p3) target bundleno = 214 (0xd6), region = 36 }
   0xa   : > { %p1100_p6 = pnand %p1103_p4, %p1099_p5 }
   0xc   : > { %1102 = dma.hbm_to_vmem [thread:$0]  (!%p1100_p6), %s193_s22, 4096, %s195_s24, [#allocation4], %s1192_s25, %s1192_s25, %s1193_s26  }
   0xe   : > { %1176 = dma.done.wait (%p1103_p4), [#allocation4], 4096  }
   0xf   : > { %1178 = vsyncadd (%p1103_p4), [#allocation4], 4294963200  ;;  %v1070_v0 = vld [vmem:[#allocation3 + $0x38] sm:$0xff]  ;;  %v1069_v4 = vld [vmem:[#allocation3 + $0x30] sm:$0xff]  ;;  %s885_s27 = sshll.u32 %s1181_s15, 2 }
  0x10   : > { %v1078_v1 = vld [vmem:[#allocation3 + $0x78] sm:$0xff]  ;;  %639 = vmatpush.bf16.msra.mxu0 %v1070_v0  ;;  %v1077_v5 = vld [vmem:[#allocation3 + $0x70] sm:$0xff]  ;;  %v1068_v8 = vld [vmem:[#allocation3 + $0x28] sm:$0xff]  ;;  %p291_p7 = scmp.lt.s32.totalorder %s885_s27, 7 }
  0x11   : > { %v1086_v2 = vld [vmem:[#allocation3 + $0xb8] sm:$0xff]  ;;  %658 = vmatpush.bf16.msra.mxu1 %v1078_v1  ;;  %v1085_v6 = vld [vmem:[#allocation3 + $0xb0] sm:$0xff]  ;;  %v1076_v9 = vld [vmem:[#allocation3 + $0x68] sm:$0xff] }
  0x12   : > { %v1094_v3 = vld [vmem:[#allocation3 + $0xf8] sm:$0xff]  ;;  %677 = vmatpush.bf16.msra.mxu2 %v1086_v2  ;;  %v1093_v7 = vld [vmem:[#allocation3 + $0xf0] sm:$0xff]  ;;  %v1084_v10 = vld [vmem:[#allocation3 + $0xa8] sm:$0xff]  ;;  %s1309_s27 = smov (!%p291_p7, %s885_s27), 7 }
  0x13   : > { %696 = vmatpush.bf16.msra.mxu3 %v1094_v3  ;;  %v1092_v11 = vld [vmem:[#allocation3 + $0xe8] sm:$0xff]  ;;  %v1067_v12 = vld [vmem:[#allocation3 + $0x20] sm:$0xff]  ;;  %v1066_v16 = vld [vmem:[#allocation3 + $0x18] sm:$0xff]  ;;  %s1054_s28 = sshll.u32 %s1309_s27, 4  ;;  %s889_s6 = sshll.u32 %s1309_s27, 3 }
  0x14   : > { %640 = vmatpush.bf16.msra.mxu0 %v1069_v4  ;;  %v1075_v13 = vld [vmem:[#allocation3 + $0x60] sm:$0xff]  ;;  %v1074_v17 = vld [vmem:[#allocation3 + $0x58] sm:$0xff]  ;;  %v1065_v20 = vld [vmem:[#allocation3 + $0x10] sm:$0xff]  ;;  %s1250_s5 = scalar_lea.vmem %s1299_s0, %s1054_s28  ;;  %s1272_s9 = scalar_lea.vmem %s1302_s3, %s889_s6 }
  0x15   : > { %659 = vmatpush.bf16.msra.mxu1 %v1077_v5  ;;  %v1083_v14 = vld [vmem:[#allocation3 + $0xa0] sm:$0xff]  ;;  %v1082_v18 = vld [vmem:[#allocation3 + $0x98] sm:$0xff]  ;;  %v1073_v21 = vld [vmem:[#allocation3 + $0x50] sm:$0xff]  ;;  %s1281_s14 = scalar_lea.vmem %s1303_s4, %s889_s6 }
  0x16   : > { %678 = vmatpush.bf16.msra.mxu2 %v1085_v6  ;;  %v1091_v15 = vld [vmem:[#allocation3 + $0xe0] sm:$0xff]  ;;  %v1090_v19 = vld [vmem:[#allocation3 + $0xd8] sm:$0xff]  ;;  %v1081_v22 = vld [vmem:[#allocation3 + $0x90] sm:$0xff] }
  0x17   : > { %697 = vmatpush.bf16.msra.mxu3 %v1093_v7  ;;  %v1089_v23 = vld [vmem:[#allocation3 + $0xd0] sm:$0xff]  ;;  %v1064_v24 = vld [vmem:[#allocation3 + $0x8] sm:$0xff]  ;;  %v1063_v28 = vld [vmem:[#allocation3] sm:$0xff] }
  0x18   : > { %641 = vmatpush.bf16.msra.mxu0 %v1068_v8  ;;  %v1072_v25 = vld [vmem:[#allocation3 + $0x48] sm:$0xff]  ;;  %v1071_v29 = vld [vmem:[#allocation3 + $0x40] sm:$0xff]  ;;  %v1057_v33 = vld [vmem:[%s1250_s5 + $0xc] sm:$0xf0] }
  0x19   : > { %660 = vmatpush.bf16.msra.mxu1 %v1076_v9  ;;  %v1080_v26 = vld [vmem:[#allocation3 + $0x88] sm:$0xff]  ;;  %v1079_v30 = vld [vmem:[#allocation3 + $0x80] sm:$0xff]  ;;  %v896_v35 = vld [vmem:[%s1250_s5 + $0x10] sm:$0xf0] }
  0x1a   : > { %679 = vmatpush.bf16.msra.mxu2 %v1084_v10  ;;  %v1088_v27 = vld [vmem:[#allocation3 + $0xc8] sm:$0xff]  ;;  %v1087_v31 = vld [vmem:[#allocation3 + $0xc0] sm:$0xff]  ;;  %v1058_v37 = vld [vmem:[%s1250_s5 + $0x14] sm:$0xf0] }
  0x1b   : > { %698 = vmatpush.bf16.msra.mxu3 %v1092_v11  ;;  %v894_v32 = vld [vmem:[%s1250_s5] sm:$0xf]  ;;  %v1055_v34 = vld [vmem:[%s1250_s5 + $0x4] sm:$0xf]  ;;  %v902_v36 = vld [vmem:[%s1250_s5 + $0x8] sm:$0xf] }
  0x1c   : > { %642 = vmatpush.bf16.msra.mxu0 %v1067_v12  ;;  %v1056_v38 = vld [vmem:[%s1250_s5 + $0xc] sm:$0xf]  ;;  %v904_v39 = vld [vmem:[%s1250_s5 + $0x18] sm:$0xf0]  ;;  %v895_v40 = vor.u32 %v1057_v33, %v894_v32  ;;  %v899_v41 = vor.u32 %v1055_v34, %v896_v35  ;;  %v903_v42 = vor.u32 %v1058_v37, %v902_v36  ;;  %v910_v44 = vld [vmem:[%s1250_s5 + $0x20] sm:$0xf] }
  0x1d   : > { %661 = vmatpush.bf16.msra.mxu1 %v1075_v13  ;;  %v907_v43 = vor.u32 %v1056_v38, %v904_v39  ;;  %v1061_v45 = vld [vmem:[%s1250_s5 + $0x2c] sm:$0xf0]  ;;  %v1059_v46 = vld [vmem:[%s1250_s5 + $0x24] sm:$0xf]  ;;  %v912_v47 = vld [vmem:[%s1250_s5 + $0x30] sm:$0xf0] }
  0x1e   : > { %680 = vmatpush.bf16.msra.mxu2 %v1083_v14  ;;  %v918_v48 = vld [vmem:[%s1250_s5 + $0x28] sm:$0xf]  ;;  %v1062_v49 = vld [vmem:[%s1250_s5 + $0x34] sm:$0xf0]  ;;  %v1060_v50 = vld [vmem:[%s1250_s5 + $0x2c] sm:$0xf]  ;;  %v911_v52 = vor.u32 %v1061_v45, %v910_v44  ;;  %v915_v53 = vor.u32 %v1059_v46, %v912_v47 }
  0x1f   : > { %699 = vmatpush.bf16.msra.mxu3 %v1091_v15  ;;  %v920_v51 = vld [vmem:[%s1250_s5 + $0x38] sm:$0xf0]  ;;  %v919_v54 = vor.u32 %v1062_v49, %v918_v48  ;;  %v1132_v62 = vld [vmem:[%s1301_s2] ss:$0 sm:$0xff]  ;;  %v739_v12 = vld [vmem:[%s1272_s9 + $0x8] sm:$0xff] }
  0x20   : > { %643 = vmatpush.bf16.msra.mxu0 %v1066_v16  ;;  %v923_v55 = vor.u32 %v1060_v50, %v920_v51  ;;  %v738_v2 = vld [vmem:[%s1272_s9] sm:$0xff] }
  0x21   : > { %662 = vmatpush.bf16.msra.mxu1 %v1074_v17 }
  0x22   : > { %681 = vmatpush.bf16.msra.mxu2 %v1082_v18 }
  0x23   : > { %700 = vmatpush.bf16.msra.mxu3 %v1090_v19 }
  0x24   : > { %644 = vmatpush.bf16.msra.mxu0 %v1065_v20  ;;  %v740_v20 = vld [vmem:[%s1272_s9 + $0x10] sm:$0xff] }
  0x25   : > { %663 = vmatpush.bf16.msra.mxu1 %v1073_v21 }
  0x26   : > { %682 = vmatpush.bf16.msra.mxu2 %v1081_v22 }
  0x27   : > { %701 = vmatpush.bf16.msra.mxu3 %v1089_v23 }
  0x28   : > { %645 = vmatpush.bf16.msra.mxu0 %v1064_v24 }
  0x29   : > { %664 = vmatpush.bf16.msra.mxu1 %v1072_v25 }
  0x2a   : > { %683 = vmatpush.bf16.msra.mxu2 %v1080_v26 }
  0x2b   : > { %702 = vmatpush.bf16.msra.mxu3 %v1088_v27 }
  0x2c   : > { %646 = vmatpush.bf16.msra.mxu0 %v1063_v28 }
  0x2d   : > { %665 = vmatpush.bf16.msra.mxu1 %v1071_v29 }
  0x2e   : > { %684 = vmatpush.bf16.msra.mxu2 %v1079_v30  ;;  %v741_v30 = vld [vmem:[%s1272_s9 + $0x18] sm:$0xff] }
  0x2f   : > { %703 = vmatpush.bf16.msra.mxu3 %v1087_v31  ;;  %647 = vmatmul.bf16.vlgmr.msra.gmra.mxu0 %v895_v40 }
  0x30   : > { %666 = vmatmul.bf16.vlgmr.msra.gmra.mxu1 %v899_v41 }
  0x31   : > { %685 = vmatmul.bf16.vlgmr.msra.gmra.mxu2 %v903_v42 }
  0x32   : > { %704 = vmatmul.bf16.vlgmr.msra.gmra.mxu3 %v907_v43 }
  0x3f   : > { %652 = vmatmul.bf16.gmra.mxu0 %v911_v52 }
  0x40   : > { %671 = vmatmul.bf16.gmra.mxu1 %v915_v53 }
  0x41   : > { %690 = vmatmul.bf16.gmra.mxu2 %v919_v54 }
  0x42   : > { %709 = vmatmul.bf16.gmra.mxu3 %v923_v55 }
  0xac   : > { %v648_v56 = vpop.f32.mrf.mxu0 }
  0xad   : > { %v667_v57 = vpop.f32.mrf.mxu1 }
  0xae   : > { %v668_v58 = vadd.f32 %v667_v57, %v648_v56 }
  0xb4   : > { %v686_v59 = vpop.f32.mrf.mxu2  ;;  %v650_v63 = vpop.f32.mrf.mxu0 }
  0xb5   : > { %v705_v60 = vpop.f32.mrf.mxu3  ;;  %v687_v61 = vadd.f32 %v686_v59, %v668_v58  ;;  %v669_v0 = vpop.f32.mrf.mxu1 }
  0xb6   : > { %v670_v5 = vadd.f32 %v669_v0, %v650_v63 }
  0xb7   : > { %v706_v1 = vadd.f32 %v705_v60, %v687_v61 }
  0xb9   : > { %v734_v3 = vadd.f32 %v1132_v62, %v706_v1 }
  0xbb   : > { %v742_v4 = vadd.f32 %v738_v2, %v734_v3 }
  0xbc   : > { %v688_v6 = vpop.f32.mrf.mxu2  ;;  %v653_v9 = vpop.f32.mrf.mxu0 }
  0xbd   : > { %v707_v7 = vpop.f32.mrf.mxu3  ;;  %746 = vst [vmem:[%s1281_s14] sm:$0xff] %v742_v4  ;;  %v689_v8 = vadd.f32 %v688_v6, %v670_v5  ;;  %v672_v10 = vpop.f32.mrf.mxu1 }
  0xbe   : > { %v673_v14 = vadd.f32 %v672_v10, %v653_v9 }
  0xbf   : > { %v708_v11 = vadd.f32 %v707_v7, %v689_v8 }
  0xc1   : > { %v735_v13 = vadd.f32 %v1132_v62, %v708_v11 }
  0xc3   : > { %v743_v15 = vadd.f32 %v739_v12, %v735_v13 }
  0xc4   : > { %v691_v16 = vpop.f32.mrf.mxu2  ;;  %v655_v21 = vpop.f32.mrf.mxu0 }
  0xc5   : > { %v710_v17 = vpop.f32.mrf.mxu3  ;;  %747 = vst [vmem:[%s1281_s14 + $0x8] sm:$0xff] %v743_v15  ;;  %v692_v18 = vadd.f32 %v691_v16, %v673_v14  ;;  %v674_v22 = vpop.f32.mrf.mxu1 }
  0xc6   : > { %v675_v25 = vadd.f32 %v674_v22, %v655_v21 }
  0xc7   : > { %v711_v19 = vadd.f32 %v710_v17, %v692_v18 }
  0xc9   : > { %v736_v23 = vadd.f32 %v1132_v62, %v711_v19 }
  0xcb   : > { %v744_v24 = vadd.f32 %v740_v20, %v736_v23 }
  0xcc   : > { %v693_v26 = vpop.f32.mrf.mxu2 }
  0xcd   : > { %748 = vst [vmem:[%s1281_s14 + $0x10] sm:$0xff] %v744_v24  ;;  %v694_v27 = vadd.f32 %v693_v26, %v675_v25  ;;  %v712_v28 = vpop.f32.mrf.mxu3 }
  0xcf   : > { %v713_v29 = vadd.f32 %v712_v28, %v694_v27 }
  0xd1   : > { %v737_v31 = vadd.f32 %v1132_v62, %v713_v29 }
  0xd3   : > { %v745_v32 = vadd.f32 %v741_v30, %v737_v31 }
  0xd5   : > { %749 = vst [vmem:[%s1281_s14 + $0x18] sm:$0xff] %v745_v32 }
  0xd6 PF: > { %s15_s17 = sadd.s32 1, %s1189_s17   ;;  %s1304_s15 = smov %s1185_s16 }
  0xd7   : > { %p12_p8 = scmp.ge.s32.totalorder %s15_s17, 4   ;;  %s1305_s16 = smov %s1307_s19 }
  0xd9   :  { %14 = sbr.rel (!%p12_p8) target bundleno = 2 (0x2), region = 86 }
  0xde   :  { %778 = vsyncpa [#allocation4], 1 }
  0xdf   :  { %780 = vsyncpa [#allocation4 + $0x1], 1 }

// kernel: gpt_forward.21
= control target key start
LH: loop header
LB: loop body
LE: loop exit
PB: predicated region body
PF: predicated region fallthrough
CT: control target
= control target key end

     0   :  { %9 = vsyncpa [#allocation3], 0  ;;  %s1282_s0 = inlined_call_operand.vmem [shape: f32[64,128], index: 0, kind: input, shape index: {}]   ;;  %s1283_s1 = inlined_call_operand.vmem [shape: f32[1,128], index: 1, kind: input, shape index: {}]   ;;  %s1284_s2 = inlined_call_operand.vmem [shape: f32[1,128], index: 2, kind: input, shape index: {}]   ;;  %s1285_s3 = inlined_call_operand.hbm [shape: bf16[128,256], index: 3, kind: input, shape index: {}]   ;;  %s1286_s4 = inlined_call_operand.hbm [shape: f32[64,256], index: 4, kind: output, shape index: {}]  }
   0x1   :  { %11 = vsyncpa [#allocation3 + $0x1], 0 }
   0x2   :  { %12 = vsyncpa [#allocation4], 0 }
   0x3   :  { %14 = vsyncpa [#allocation4 + $0x1], 0  ;;  %s987_s15 = smov 0   ;;  %s989_s16 = smov 0  }
   0x4   :  { %s991_s17 = smov 0   ;;  %s993_s18 = smov 0  }
   0x5   :  { %s995_s19 = smov 0   ;;  %s997_s20 = smov 0  }
   0x6 LB: > { %s674_s21 = sadd.s32 4294967295, %s953_s20   ;;  %s675_s22 = sadd.s32 4294967294, %s953_s20   ;;  %s953_s20 = sphi %s997_s20, %s20_s20   ;;  %s949_s19 = sphi %s995_s19, %s1301_s19   ;;  %s945_s18 = sphi %s993_s18, %s1300_s18   ;;  %s941_s17 = sphi %s991_s17, %s1299_s17   ;;  %s937_s16 = sphi %s989_s16, %s1298_s16   ;;  %s933_s15 = sphi %s987_s15, %s1297_s15  }
   0x7   : > { %s29_s23 = sadd.s32 1, %s949_s19  ;;  %s107_s24 = sadd.s32 1, %s941_s17 }
   0x8   : > { %p30_p0 = scmp.ge.s32.totalorder %s29_s23, 2  ;;  %p114_p1 = scmp.ne.s32.totalorder %s941_s17, %s937_s16 }
   0x9   : > { %p115_p2 = scmp.eq.s32.totalorder %s953_s20, 0  ;;  %p120_p3 = scmp.ne.s32.totalorder %s937_s16, %s933_s15 }
   0xa   : > { %s1303_s23 = smov (%p30_p0, %s29_s23), 0  ;;  %p121_p5 = scmp.eq.s32.totalorder %s674_s21, 0 }
   0xb   : > { %p1028_p4 = por %p115_p2, %p114_p1  ;;  %s104_s26 = ssub.s32 %s949_s19, %s1303_s23 }
   0xc   : > { %p146_p6 = scmp.eq.s32.totalorder %s674_s21, 1  ;;  %p105_p7 = scmp.eq.s32.totalorder %s104_s26, 0 }
   0xd   : > { %p1034_p8 = por %p121_p5, %p120_p3  ;;  %p152_p10 = scmp.eq.s32.totalorder %s675_s22, 1 }
   0xe   : > { %p1038_p9 = por %p146_p6, %p114_p1  ;;  %p678_p12 = scmp.ge.s32.totalorder %s953_s20, 2 }
   0xf   : > { %s1043_s29 = scalar_select %p105_p7, %s941_s17, %s107_s24  }
  0x10   : > { %p1045_p11 = por %p152_p10, %p120_p3  ;;  %p764_p13 = scmp.lt.s32.totalorder %s953_s20, 2 }
  0x11   : > { %s187_s5 = sand.u32 1, %s941_s17   ;;  %s680_s7 = sshll.u32 %s949_s19, 2 }
  0x12   : > { %s679_s6 = sshll.u32 %s187_s5, 6  ;;  %s195_s10 = scalar_lea.hbm %s1285_s3, %s680_s7 }
  0x13   : > { %s191_s11 = scalar_lea.vmem [#allocation2], %s679_s6  ;;  %s196_s13 = sshll.u32 %s195_s10, 4  ;;  %s197_s13 = int_to_ptr.hbm [resolvable:$true] %s196_s13 }
  0x14   : > { %s198_s12 = sshll.u32 %s191_s11, 4  ;;  %p757_p0 = pnand %p764_p13, %p1028_p4  ;;  %s199_s12 = int_to_ptr.vmem [resolvable:$true] %s198_s12 }
  0x15   : > { %s188_s14 = scalar_lea.sflag [#allocation3], %s187_s5  ;;  %s955_s21 = smov 128  }
  0x16   : > { %s956_s22 = smov 64   ;;  %s957_s24 = smov 4  }
  0x17   : > { %759 = dma.hbm_to_vmem [thread:$0]  (!%p757_p0), %s197_s13, 1024, %s199_s12, %s188_s14, %s955_s21, %s956_s22, %s957_s24  }
  0x18   : > { %p681_p1 = scmp.ge.s32.totalorder %s953_s20, 1  ;;  %p206_p2 = scmp.lt.s32.totalorder %s953_s20, 3 }
  0x1a   : > { %p207_p3 = pnand %p681_p1, %p206_p2 }
  0x1b   : > { %s1061_s26 = sand.u32 (!%p207_p3), 1, %s937_s16  }
  0x1c   : > { %210 = sbr.rel (%p207_p3) target bundleno = 467 (0x1d3), region = 36  ;;  %s682_s6 = sshll.u32 (!%p207_p3), %s1061_s26, 6 }
  0x1d   : > { %s213_s7 = scalar_lea.sflag (!%p207_p3), [#allocation3], %s1061_s26  ;;  %s1067_s25 = scalar_lea.vmem (!%p207_p3), [#allocation2], %s682_s6 }
  0x21   : > { %924 = dma.done.wait (%p1034_p8), %s213_s7, 1024  }
  0x22   : > { %926 = vsyncadd (%p1034_p8), %s213_s7, 4294966272  ;;  %v260_v0 = vld [vmem:[%s1282_s0 + $0x30] sm:$0xff]  ;;  %v258_v1 = vld [vmem:[%s1282_s0 + $0x20] sm:$0xff]  ;;  %v958_v8 = vmov 128.0   ;;  %s246_s13 = scalar_lea.vmem [#allocation5], %s682_s6  ;;  %s717_s14 = sshll.u32 %s945_s18, 3 }
  0x23   : > { %v254_v2 = vld [vmem:[%s1282_s0] sm:$0xff]  ;;  %274 = vadd.xlane.f32.xlu1 %v260_v0  ;;  %270 = vadd.xlane.f32.xlu0 %v258_v1  ;;  %v261_v3 = vld [vmem:[%s1282_s0 + $0x38] sm:$0xff]  ;;  %v259_v4 = vld [vmem:[%s1282_s0 + $0x28] sm:$0xff]  ;;  %823 = vrcp.f32 %v958_v8  ;;  %s572_s22 = scalar_lea.hbm %s1286_s4, %s717_s14  ;;  %s573_s24 = sshll.u32 %s246_s13, 4  ;;  %s574_s24 = int_to_ptr.vmem [resolvable:$true] %s573_s24 }
  0x24   : > { %262 = vadd.xlane.f32.xlu2 %v254_v2  ;;  %v255_v5 = vld [vmem:[%s1282_s0 + $0x8] sm:$0xff]  ;;  %v256_v6 = vld [vmem:[%s1282_s0 + $0x10] sm:$0xff]  ;;  %v257_v7 = vld [vmem:[%s1282_s0 + $0x18] sm:$0xff]  ;;  %s575_s6 = sshll.u32 %s572_s22, 4  ;;  %s559_s18 = scalar_lea.sflag [#allocation4], %s1061_s26  ;;  %s576_s6 = int_to_ptr.hbm [resolvable:$true] %s575_s6 }
  0x25   : > { %v727_v47 = vld [vmem:[%s1067_s25 + $0x38] sm:$0xff]  ;;  %v726_v48 = vld [vmem:[%s1067_s25 + $0x30] sm:$0xff]  ;;  %v725_v49 = vld [vmem:[%s1067_s25 + $0x28] sm:$0xff]  ;;  %s885_s7 = sshra.s32 %s576_s6, 4  ;;  %s886_s7 = int_to_ptr.hbm [resolvable:$true] %s885_s7 }
  0x26   : > { %729 = vmatpush.bf16.msra.mxu2 %v727_v47  ;;  %730 = vmatpush.bf16.msra.mxu3 %v727_v47  ;;  %v724_v50 = vld [vmem:[%s1067_s25 + $0x20] sm:$0xff]  ;;  %v723_v51 = vld [vmem:[%s1067_s25 + $0x18] sm:$0xff]  ;;  %v722_v52 = vld [vmem:[%s1067_s25 + $0x10] sm:$0xff]  ;;  %s887_s5 = scalar_lea.hbm %s886_s7, 64  ;;  %p892_p7 = scmp.lt.s32.totalorder %s886_s7, %s1286_s4 }
  0x27   : > { %521 = vmatpush.bf16.msra.mxu0 %v727_v47  ;;  %728 = vmatpush.bf16.msra.mxu1 %v727_v47  ;;  %v721_v55 = vld [vmem:[%s1067_s25 + $0x8] sm:$0xff]  ;;  %v720_v60 = vld [vmem:[%s1067_s25] sm:$0xff]  ;;  %p888_p4 = scmp.ne.s32.totalorder %s886_s7, %s887_s5  ;;  %s891_s25 = scalar_lea.hbm %s1286_s4, 128 }
  0x28   : > { %p893_p8 = scmp.lt.s32.totalorder %s891_s25, %s887_s5 }
  0x29   : > { %v824_v9 = vpop.eup %823  ;;  %p889_p5 = pnand %p888_p4, %p1038_p9 }
  0x2a   : > { %v279_v10 = vmul.f32 128.0, %v824_v9  ;;  %vm283_vm0 = vweird.f32 %v824_v9  ;;  %732 = vmatpush.bf16.msra.mxu2 %v726_v48  ;;  %733 = vmatpush.bf16.msra.mxu3 %v726_v48  ;;  %p894_p10 = por %p893_p8, %p892_p7 }
  0x2b   : > { %276 = vadd.xlane.f32.xlu1 %v261_v3  ;;  %272 = vadd.xlane.f32.xlu0 %v259_v4  ;;  %p890_p6 = pneg %p889_p5 }
  0x2c   : > { %264 = vadd.xlane.f32.xlu2 %v255_v5  ;;  %v280_v11 = vsub.f32 1.0, %v279_v10  ;;  %522 = vmatpush.bf16.msra.mxu0 %v726_v48 }
  0x2d   : > { %731 = vmatpush.bf16.msra.mxu1 %v726_v48  ;;  %p895_p13 = pnand %p894_p10, %p890_p6 }
  0x2e   : > { %v281_v12 = vmul.f32 %v824_v9, %v280_v11  ;;  %735 = vmatpush.bf16.msra.mxu2 %v725_v49  ;;  %736 = vmatpush.bf16.msra.mxu3 %v725_v49 }
  0x30   : > { %v282_v13 = vadd.f32 %v824_v9, %v281_v12  ;;  %523 = vmatpush.bf16.msra.mxu0 %v725_v49 }
  0x31   : > { %734 = vmatpush.bf16.msra.mxu1 %v725_v49 }
  0x32   : > { %v1097_v14 = vsel %vm283_vm0, %v824_v9, %v282_v13  ;;  %738 = vmatpush.bf16.msra.mxu2 %v724_v50  ;;  %739 = vmatpush.bf16.msra.mxu3 %v724_v50 }
  0x33   : > { %266 = vadd.xlane.f32.xlu0 %v256_v6  ;;  %268 = vadd.xlane.f32.xlu1 %v257_v7 }
  0x34   : > { %524 = vmatpush.bf16.msra.mxu0 %v724_v50 }
  0x35   : > { %737 = vmatpush.bf16.msra.mxu1 %v724_v50 }
  0x36   : > { %741 = vmatpush.bf16.msra.mxu2 %v723_v51  ;;  %742 = vmatpush.bf16.msra.mxu3 %v723_v51 }
  0x38   : > { %525 = vmatpush.bf16.msra.mxu0 %v723_v51 }
  0x39   : > { %740 = vmatpush.bf16.msra.mxu1 %v723_v51 }
  0x3a   : > { %744 = vmatpush.bf16.msra.mxu2 %v722_v52  ;;  %745 = vmatpush.bf16.msra.mxu3 %v722_v52 }
  0x3c   : > { %526 = vmatpush.bf16.msra.mxu0 %v722_v52 }
  0x3d   : > { %743 = vmatpush.bf16.msra.mxu1 %v722_v52 }
  0x3e   : > { %747 = vmatpush.bf16.msra.mxu2 %v721_v55  ;;  %748 = vmatpush.bf16.msra.mxu3 %v721_v55 }
  0x40   : > { %527 = vmatpush.bf16.msra.mxu0 %v721_v55 }
  0x41   : > { %746 = vmatpush.bf16.msra.mxu1 %v721_v55 }
  0x42   : > { %750 = vmatpush.bf16.msra.mxu2 %v720_v60  ;;  %751 = vmatpush.bf16.msra.mxu3 %v720_v60 }
  0x44   : > { %528 = vmatpush.bf16.msra.mxu0 %v720_v60 }
  0x45   : > { %749 = vmatpush.bf16.msra.mxu1 %v720_v60 }
  0x96   : > { %v275_v15 = vpop.xlane.xlu1 %274  ;;  %v271_v16 = vpop.xlane.xlu0 %270 }
  0x97   : > { %v291_v17 = vmul.f32 %v1097_v14, %v275_v15  ;;  %v289_v18 = vmul.f32 %v1097_v14, %v271_v16  ;;  %v263_v19 = vpop.xlane.xlu2 %262 }
  0x98   : > { %v285_v30 = vmul.f32 %v1097_v14, %v263_v19 }
  0x99   : > { %v1101_v20 = vsub.f32 %v260_v0, %v291_v17  ;;  %v1103_v21 = vsub.f32 %v258_v1, %v289_v18 }
  0x9a   : > { %v1125_v37 = vsub.f32 %v254_v2, %v285_v30 }
  0x9b   : > { %v307_v22 = vmul.f32 %v1101_v20, %v1101_v20  ;;  %v305_v23 = vmul.f32 %v1103_v21, %v1103_v21 }
  0x9c   : > { %v301_v42 = vmul.f32 %v1125_v37, %v1125_v37 }
  0x9d   : > { %321 = vadd.xlane.f32.xlu1 %v307_v22  ;;  %317 = vadd.xlane.f32.xlu2 %v305_v23 }
  0x9e   : > { %v277_v24 = vpop.xlane.xlu1 %276  ;;  %v273_v25 = vpop.xlane.xlu0 %272 }
  0x9f   : > { %v292_v26 = vmul.f32 %v1097_v14, %v277_v24  ;;  %v290_v27 = vmul.f32 %v1097_v14, %v273_v25  ;;  %v265_v28 = vpop.xlane.xlu2 %264 }
  0xa0   : > { %v286_v29 = vmul.f32 %v1097_v14, %v265_v28 }
  0xa1   : > { %v1113_v31 = vsub.f32 %v261_v3, %v292_v26  ;;  %v1115_v32 = vsub.f32 %v259_v4, %v290_v27 }
  0xa2   : > { %v1117_v33 = vsub.f32 %v255_v5, %v286_v29 }
  0xa3   : > { %v306_v34 = vmul.f32 %v1115_v32, %v1115_v32  ;;  %v308_v35 = vmul.f32 %v1113_v31, %v1113_v31 }
  0xa4   : > { %v302_v36 = vmul.f32 %v1117_v33, %v1117_v33 }
  0xa5   : > { %319 = vadd.xlane.f32.xlu0 %v306_v34  ;;  %323 = vadd.xlane.f32.xlu2 %v308_v35 }
  0xa6   : > { %311 = vadd.xlane.f32.xlu1 %v302_v36  ;;  %v267_v38 = vpop.xlane.xlu0 %266  ;;  %v269_v39 = vpop.xlane.xlu1 %268 }
  0xa7   : > { %v287_v40 = vmul.f32 %v1097_v14, %v267_v38  ;;  %v288_v43 = vmul.f32 %v1097_v14, %v269_v39 }
  0xa9   : > { %v1128_v41 = vsub.f32 %v256_v6, %v287_v40  ;;  %v1135_v45 = vsub.f32 %v257_v7, %v288_v43 }
  0xab   : > { %v303_v44 = vmul.f32 %v1128_v41, %v1128_v41  ;;  %v304_v46 = vmul.f32 %v1135_v45, %v1135_v45 }
  0xad   : > { %313 = vadd.xlane.f32.xlu2 %v303_v44  ;;  %309 = vadd.xlane.f32.xlu0 %v301_v42 }
  0xb5   : > { %315 = vadd.xlane.f32.xlu0 %v304_v46 }
 0x110   : > { %v322_v53 = vpop.xlane.xlu1 %321  ;;  %v318_v54 = vpop.xlane.xlu2 %317 }
 0x111   : > { %v331_v56 = vmul.f32 %v322_v53, %v1097_v14  ;;  %v329_v57 = vmul.f32 %v318_v54, %v1097_v14 }
 0x113   : > { %v339_v58 = vadd.f32 1e-05, %v331_v56  ;;  %v337_v59 = vadd.f32 1e-05, %v329_v57 }
 0x115   : > { %825 = vrsqrt.f32 %v339_v58  ;;  %vm407_vm1 = vweird.f32 %v339_v58  ;;  %vm387_vm5 = vweird.f32 %v337_v59 }
 0x116   : > { %827 = vrsqrt.f32 %v337_v59 }
 0x118   : > { %v320_v61 = vpop.xlane.xlu0 %319  ;;  %v324_v62 = vpop.xlane.xlu2 %323 }
 0x119   : > { %v330_v63 = vmul.f32 %v320_v61, %v1097_v14  ;;  %v312_v0 = vpop.xlane.xlu1 %311  ;;  %v332_v1 = vmul.f32 %v324_v62, %v1097_v14  ;;  %v821_v61 = vld [vmem:[%s1283_s1] ss:$0 sm:$0xff] }
 0x11a   : > { %v326_v2 = vmul.f32 %v312_v0, %v1097_v14 }
 0x11b   : > { %v1152_v3 = vpop.eup %825  ;;  %v1154_v4 = vadd.f32 1e-05, %v330_v63  ;;  %v1156_v5 = vadd.f32 1e-05, %v332_v1 }
 0x11c   : > { %v1158_v6 = vpop.eup %827  ;;  %v402_v7 = vmul.f32 %v1152_v3, %v339_v58  ;;  %v334_v8 = vadd.f32 1e-05, %v326_v2  ;;  %vm408_vm2 = vweird.f32 %v1152_v3 }
 0x11d   : > { %v382_v9 = vmul.f32 %v1158_v6, %v337_v59  ;;  %829 = vrsqrt.f32 %v1154_v4  ;;  %vm388_vm3 = vweird.f32 %v1158_v6  ;;  %vm1184_vm4 = vmor %vm407_vm1, %vm408_vm2  ;;  %vm397_vm6 = vweird.f32 %v1154_v4 }
 0x11e   : > { %v403_v10 = vmul.f32 %v1152_v3, %v402_v7  ;;  %831 = vrsqrt.f32 %v334_v8  ;;  %vm1191_vm7 = vmor %vm387_vm5, %vm388_vm3  ;;  %vm357_vm8 = vweird.f32 %v334_v8  ;;  %vm417_vm11 = vweird.f32 %v1156_v5 }
 0x11f   : > { %v383_v11 = vmul.f32 %v1158_v6, %v382_v9  ;;  %833 = vrsqrt.f32 %v1156_v5 }
 0x120   : > { %v404_v12 = vmul.f32 0.5, %v403_v10  ;;  %v310_v13 = vpop.xlane.xlu0 %309  ;;  %v314_v15 = vpop.xlane.xlu2 %313 }
 0x121   : > { %v384_v16 = vmul.f32 0.5, %v383_v11  ;;  %v325_v17 = vmul.f32 %v310_v13, %v1097_v14  ;;  %v327_v18 = vmul.f32 %v314_v15, %v1097_v14 }
 0x122   : > { %v405_v19 = vsub.f32 1.5, %v404_v12 }
 0x123   : > { %v830_v22 = vpop.eup %829  ;;  %v385_v23 = vsub.f32 1.5, %v384_v16  ;;  %v1168_v24 = vadd.f32 1e-05, %v325_v17  ;;  %v1170_v25 = vadd.f32 1e-05, %v327_v18 }
 0x124   : > { %v1172_v26 = vpop.eup %831  ;;  %v392_v27 = vmul.f32 %v830_v22, %v1154_v4  ;;  %v406_v30 = vmul.f32 %v1152_v3, %v405_v19  ;;  %vm398_vm10 = vweird.f32 %v830_v22  ;;  %v822_v4 = vld [vmem:[%s1284_s2] ss:$0 sm:$0xff] }
 0x125   : > { %v834_v28 = vpop.eup %833  ;;  %v352_v29 = vmul.f32 %v1172_v26, %v334_v8  ;;  %835 = vrsqrt.f32 %v1168_v24  ;;  %v386_v34 = vmul.f32 %v1158_v6, %v385_v23  ;;  %vm358_vm9 = vweird.f32 %v1172_v26  ;;  %vm399_vm14 = vmor %vm397_vm6, %vm398_vm10 }
 0x126   : > { %v393_v35 = vmul.f32 %v830_v22, %v392_v27  ;;  %v412_v36 = vmul.f32 %v834_v28, %v1156_v5  ;;  %837 = vrsqrt.f32 %v1170_v25  ;;  %v410_v51 = vsel %vm1184_vm4, %v1152_v3, %v406_v30  ;;  %vm1206_vm12 = vmor %vm357_vm8, %vm358_vm9 }
 0x127   : > { %v353_v38 = vmul.f32 %v1172_v26, %v352_v29  ;;  %v390_v50 = vsel %vm1191_vm7, %v1158_v6, %v386_v34  ;;  %vm418_vm13 = vweird.f32 %v834_v28  ;;  %v427_v62 = vmul.f32 %v410_v51, %v1101_v20 }
 0x128   : > { %v394_v40 = vmul.f32 0.5, %v393_v35  ;;  %v413_v42 = vmul.f32 %v834_v28, %v412_v36  ;;  %v316_v43 = vpop.xlane.xlu0 %315  ;;  %v425_v60 = vmul.f32 %v390_v50, %v1103_v21  ;;  %vm419_vm15 = vmor %vm417_vm11, %vm418_vm13  ;;  %vm347_vm1 = vweird.f32 %v1168_v24 }
 0x129   : > { %v354_v46 = vmul.f32 0.5, %v353_v38  ;;  %v328_v47 = vmul.f32 %v316_v43, %v1097_v14  ;;  %v439_v10 = vmul.f32 %v821_v61, %v427_v62  ;;  %vm367_vm2 = vweird.f32 %v1170_v25 }
 0x12a   : > { %v395_v48 = vsub.f32 1.5, %v394_v40  ;;  %v414_v49 = vmul.f32 0.5, %v413_v42  ;;  %v437_v8 = vmul.f32 %v821_v61, %v425_v60 }
 0x12b   : > { %v836_v52 = vpop.eup %835  ;;  %v355_v53 = vsub.f32 1.5, %v354_v46  ;;  %v1204_v54 = vadd.f32 1e-05, %v328_v47 }
 0x12c   : > { %v396_v55 = vmul.f32 %v830_v22, %v395_v48  ;;  %v415_v56 = vsub.f32 1.5, %v414_v49  ;;  %v342_v57 = vmul.f32 %v836_v52, %v1168_v24  ;;  %v838_v58 = vpop.eup %837  ;;  %vm348_vm0 = vweird.f32 %v836_v52 }
 0x12d   : > { %v356_v59 = vmul.f32 %v1172_v26, %v355_v53  ;;  %839 = vrsqrt.f32 %v1204_v54  ;;  %v362_v1 = vmul.f32 %v838_v58, %v1170_v25  ;;  %vm368_vm3 = vweird.f32 %v838_v58  ;;  %vm349_vm4 = vmor %vm347_vm1, %vm348_vm0 }
 0x12e   : > { %v416_v63 = vmul.f32 %v834_v28, %v415_v56  ;;  %v343_v0 = vmul.f32 %v836_v52, %v342_v57  ;;  %v400_v2 = vsel %vm399_vm14, %v830_v22, %v396_v55  ;;  %v451_v22 = vadd.f32 %v822_v4, %v439_v10  ;;  %vm369_vm5 = vmor %vm367_vm2, %vm368_vm3 }
 0x12f   : > { %v360_v21 = vsel %vm1206_vm12, %v1172_v26, %v356_v59  ;;  %v363_v6 = vmul.f32 %v838_v58, %v362_v1  ;;  %v426_v20 = vmul.f32 %v400_v2, %v1115_v32  ;;  %vm377_vm7 = vweird.f32 %v1204_v54 }
 0x130   : > { %v344_v3 = vmul.f32 0.5, %v343_v0  ;;  %v420_v7 = vsel %vm419_vm15, %v834_v28, %v416_v63  ;;  %v422_v32 = vmul.f32 %v360_v21, %v1117_v33 }
 0x131   : > { %v428_v9 = vmul.f32 %v420_v7, %v1113_v31  ;;  %v364_v11 = vmul.f32 0.5, %v363_v6  ;;  %v438_v12 = vmul.f32 %v821_v61, %v426_v20  ;;  %v449_v31 = vadd.f32 %v822_v4, %v437_v8 }
 0x132   : > { %v345_v5 = vsub.f32 1.5, %v344_v3  ;;  %v434_v30 = vmul.f32 %v821_v61, %v422_v32 }
 0x133   : > { %v840_v13 = vpop.eup %839  ;;  %v440_v15 = vmul.f32 %v821_v61, %v428_v9  ;;  %v365_v17 = vsub.f32 1.5, %v364_v11  ;;  %v450_v19 = vadd.f32 %v822_v4, %v438_v12 }
 0x134   : > { %v346_v16 = vmul.f32 %v836_v52, %v345_v5  ;;  %v372_v18 = vmul.f32 %v840_v13, %v1204_v54  ;;  %vm378_vm6 = vweird.f32 %v840_v13  ;;  %v446_v40 = vadd.f32 %v822_v4, %v434_v30 }
 0x135   : > { %v452_v23 = vadd.f32 %v822_v4, %v440_v15  ;;  %v366_v26 = vmul.f32 %v838_v58, %v365_v17  ;;  %v455_v24 = vpack.c.bf16 %v450_v19, %v449_v31  ;;  %vm379_vm8 = vmor %vm377_vm7, %vm378_vm6 }
 0x136   : > { %v373_v27 = vmul.f32 %v840_v13, %v372_v18  ;;  %v350_v28 = vsel %vm349_vm4, %v836_v52, %v346_v16 }
 0x137   : > { %v456_v29 = vpack.c.bf16 %v452_v23, %v451_v22  ;;  %v421_v33 = vmul.f32 %v350_v28, %v1125_v37  ;;  %v370_v35 = vsel %vm369_vm5, %v838_v58, %v366_v26  ;;  %539 = vmatmul.bf16.vlgmr.msra.gmra.mxu2 %v455_v24 }
 0x138   : > { %v374_v34 = vmul.f32 0.5, %v373_v27  ;;  %v423_v42 = vmul.f32 %v370_v35, %v1128_v41 }
 0x139   : > { %544 = vmatmul.bf16.vlgmr.msra.gmra.mxu3 %v456_v29  ;;  %v433_v36 = vmul.f32 %v821_v61, %v421_v33 }
 0x13a   : > { %v375_v38 = vsub.f32 1.5, %v374_v34  ;;  %v435_v46 = vmul.f32 %v821_v61, %v423_v42 }
 0x13b   : > { %v445_v39 = vadd.f32 %v822_v4, %v433_v36 }
 0x13c   : > { %v376_v43 = vmul.f32 %v840_v13, %v375_v38  ;;  %v447_v48 = vadd.f32 %v822_v4, %v435_v46 }
 0x13d   : > { %v453_v25 = vpack.c.bf16 %v446_v40, %v445_v39 }
 0x13e   : > { %v380_v44 = vsel %vm379_vm8, %v840_v13, %v376_v43 }
 0x13f   : > { %529 = vmatmul.bf16.vlgmr.msra.gmra.mxu0 %v453_v25  ;;  %v424_v37 = vmul.f32 %v380_v44, %v1135_v45 }
 0x141   : > { %v436_v47 = vmul.f32 %v821_v61, %v424_v37 }
 0x143   : > { %v448_v49 = vadd.f32 %v822_v4, %v436_v47 }
 0x145   : > { %v454_v50 = vpack.c.bf16 %v448_v49, %v447_v48 }
 0x147   : > { %534 = vmatmul.bf16.vlgmr.msra.gmra.mxu1 %v454_v50 }
 0x1ba   : > { %v540_v51 = vpop.f32.mrf.mxu2 }
 0x1bb   : > { %554 = vst [vmem:[%s246_s13 + $0x20] sm:$0xff] %v540_v51 }
 0x1bc   : > { %v545_v52 = vpop.f32.mrf.mxu3  ;;  %v530_v41 = vpop.f32.mrf.mxu0 }
 0x1bd   : > { %556 = vst [vmem:[%s246_s13 + $0x30] sm:$0xff] %v545_v52 }
 0x1be   : > { %550 = vst [vmem:[%s246_s13] sm:$0xff] %v530_v41 }
 0x1c2   : > { %v542_v53 = vpop.f32.mrf.mxu2 }
 0x1c3   : > { %555 = vst [vmem:[%s246_s13 + $0x28] sm:$0xff] %v542_v53 }
 0x1c4   : > { %v547_v54 = vpop.f32.mrf.mxu3  ;;  %v532_v45 = vpop.f32.mrf.mxu0 }
 0x1c5   : > { %v535_v55 = vpop.f32.mrf.mxu1  ;;  %557 = vst [vmem:[%s246_s13 + $0x38] sm:$0xff] %v547_v54 }
 0x1c6   : > { %551 = vst [vmem:[%s246_s13 + $0x8] sm:$0xff] %v532_v45 }
 0x1c7   : > { %552 = vst [vmem:[%s246_s13 + $0x10] sm:$0xff] %v535_v55 }
 0x1cd   : > { %v537_v14 = vpop.f32.mrf.mxu1 }
 0x1ce   : > { %553 = vst [vmem:[%s246_s13 + $0x18] sm:$0xff] %v537_v14 }
 0x1cf   : > { %898 = shalt.err (!%p895_p13)
}
 0x1d0   : > { %s959_s26 = smov 128   ;;  %s960_s12 = smov 256  }
 0x1d1   : > { %s961_s13 = smov 8  }
 0x1d2   : > { %754 = dma.vmem_to_hbm [thread:$0]  (%p1038_p9), %s574_s24, 1024, %s576_s6, %s559_s18, %s959_s26, %s960_s12, %s961_s13  }
 0x1d3 PF: > { %s590_s14 = sand.u32 1, %s933_s15   ;;  %p761_p0 = pnand %p678_p12, %p1045_p11 }
 0x1d4   : > { %s591_s27 = scalar_lea.sflag [#allocation4], %s590_s14 }
 0x1d5   : > { %p762_p1 = pneg %p761_p0 }
 0x1d7   : > { %928 = dma.done.wait (%p762_p1), %s591_s27, 1024  }
 0x1d8   : > { %930 = vsyncadd (%p762_p1), %s591_s27, 4294966272  ;;  %s20_s20 = sadd.s32 1, %s953_s20   ;;  %s1297_s15 = smov %s937_s16 }
 0x1d9   : > { %p17_p2 = scmp.ge.s32.totalorder %s20_s20, 4   ;;  %s1298_s16 = smov %s941_s17 }
 0x1da   : > { %s1299_s17 = smov %s1043_s29  ;;  %s1300_s18 = smov %s949_s19 }
 0x1db   : > { %s1301_s19 = smov %s1303_s23  ;;  %19 = sbr.rel (!%p17_p2) target bundleno = 6 (0x6), region = 84 }
 0x1e0   :  { %597 = vsyncpa [#allocation3], 1 }
 0x1e1   :  { %599 = vsyncpa [#allocation3 + $0x1], 1 }
 0x1e2   :  { %600 = vsyncpa [#allocation4], 1 }
 0x1e3   :  { %602 = vsyncpa [#allocation4 + $0x1], 1 }

// kernel: gpt_forward.15
= control target key start
LH: loop header
LB: loop body
LE: loop exit
PB: predicated region body
PF: predicated region fallthrough
CT: control target
= control target key end

     0   :  { %s1174_s15 = smov 0   ;;  %s1176_s16 = smov 0   ;;  %s1346_s0 = inlined_call_operand.vmem [shape: bf16[64,512], index: 0, kind: input, shape index: {}]   ;;  %s1347_s1 = inlined_call_operand.vmem [shape: bf16[512,128], index: 1, kind: input, shape index: {}]   ;;  %s1348_s2 = inlined_call_operand.vmem [shape: f32[1,128], index: 2, kind: input, shape index: {}]   ;;  %s1349_s3 = inlined_call_operand.vmem [shape: f32[64,128], index: 3, kind: input, shape index: {}]   ;;  %s1350_s4 = inlined_call_operand.vmem [shape: f32[64,128], index: 4, kind: output, shape index: {}]  }
   0x1   :  { %s1178_s17 = smov 0  }
   0x2 LB: > { %s33_s18 = sadd.s32 1, %s1143_s16  ;;  %p889_p0 = scmp.ge.s32.totalorder %s1147_s17, 1  ;;  %s1147_s17 = sphi %s1178_s17, %s14_s17   ;;  %s1143_s16 = sphi %s1176_s16, %s1352_s16   ;;  %s1139_s15 = sphi %s1174_s15, %s1351_s15  }
   0x3   : > { %p35_p1 = scmp.ge.s32.totalorder %s33_s18, 2  ;;  %p232_p2 = scmp.lt.s32.totalorder %s1147_s17, 3 }
   0x5   : > { %s1354_s18 = smov (%p35_p1, %s33_s18), 0  ;;  %p233_p3 = pnand %p889_p0, %p232_p2 }
   0x6   : > { %s890_s21 = sshll.u32 (!%p233_p3), %s1139_s15, 2 }
   0x7   : > { %236 = sbr.rel (%p233_p3) target bundleno = 211 (0xd3), region = 36  ;;  %p287_p4 = scmp.lt.s32.totalorder (!%p233_p3), %s890_s21, 7 }
   0xc   : > { %v1075_v0 = vld [vmem:[%s1347_s1 + $0x38] sm:$0xff]  ;;  %v1074_v4 = vld [vmem:[%s1347_s1 + $0x30] sm:$0xff]  ;;  %v1073_v8 = vld [vmem:[%s1347_s1 + $0x28] sm:$0xff]  ;;  %s1356_s21 = smov (!%p287_p4, %s890_s21), 7 }
   0xd   : > { %v1083_v1 = vld [vmem:[%s1347_s1 + $0x78] sm:$0xff]  ;;  %643 = vmatpush.bf16.msra.mxu0 %v1075_v0  ;;  %v1082_v5 = vld [vmem:[%s1347_s1 + $0x70] sm:$0xff]  ;;  %v1081_v9 = vld [vmem:[%s1347_s1 + $0x68] sm:$0xff]  ;;  %s1059_s24 = sshll.u32 %s1356_s21, 4  ;;  %s894_s22 = sshll.u32 %s1356_s21, 3 }
   0xe   : > { %v1091_v2 = vld [vmem:[%s1347_s1 + $0xb8] sm:$0xff]  ;;  %662 = vmatpush.bf16.msra.mxu1 %v1083_v1  ;;  %v1090_v6 = vld [vmem:[%s1347_s1 + $0xb0] sm:$0xff]  ;;  %v1089_v10 = vld [vmem:[%s1347_s1 + $0xa8] sm:$0xff]  ;;  %s1279_s30 = scalar_lea.vmem %s1346_s0, %s1059_s24  ;;  %s1319_s25 = scalar_lea.vmem %s1349_s3, %s894_s22 }
   0xf   : > { %v1099_v3 = vld [vmem:[%s1347_s1 + $0xf8] sm:$0xff]  ;;  %681 = vmatpush.bf16.msra.mxu2 %v1091_v2  ;;  %v1098_v7 = vld [vmem:[%s1347_s1 + $0xf0] sm:$0xff]  ;;  %v1097_v11 = vld [vmem:[%s1347_s1 + $0xe8] sm:$0xff]  ;;  %s1328_s29 = scalar_lea.vmem %s1350_s4, %s894_s22 }
  0x10   : > { %700 = vmatpush.bf16.msra.mxu3 %v1099_v3  ;;  %v1072_v12 = vld [vmem:[%s1347_s1 + $0x20] sm:$0xff]  ;;  %v1071_v16 = vld [vmem:[%s1347_s1 + $0x18] sm:$0xff]  ;;  %v1070_v20 = vld [vmem:[%s1347_s1 + $0x10] sm:$0xff] }
  0x11   : > { %644 = vmatpush.bf16.msra.mxu0 %v1074_v4  ;;  %v1080_v13 = vld [vmem:[%s1347_s1 + $0x60] sm:$0xff]  ;;  %v1079_v17 = vld [vmem:[%s1347_s1 + $0x58] sm:$0xff]  ;;  %v1078_v21 = vld [vmem:[%s1347_s1 + $0x50] sm:$0xff] }
  0x12   : > { %663 = vmatpush.bf16.msra.mxu1 %v1082_v5  ;;  %v1088_v14 = vld [vmem:[%s1347_s1 + $0xa0] sm:$0xff]  ;;  %v1087_v18 = vld [vmem:[%s1347_s1 + $0x98] sm:$0xff]  ;;  %v1086_v22 = vld [vmem:[%s1347_s1 + $0x90] sm:$0xff] }
  0x13   : > { %682 = vmatpush.bf16.msra.mxu2 %v1090_v6  ;;  %v1096_v15 = vld [vmem:[%s1347_s1 + $0xe0] sm:$0xff]  ;;  %v1095_v19 = vld [vmem:[%s1347_s1 + $0xd8] sm:$0xff]  ;;  %v1094_v23 = vld [vmem:[%s1347_s1 + $0xd0] sm:$0xff] }
  0x14   : > { %701 = vmatpush.bf16.msra.mxu3 %v1098_v7  ;;  %v1069_v24 = vld [vmem:[%s1347_s1 + $0x8] sm:$0xff]  ;;  %v1068_v28 = vld [vmem:[%s1347_s1] sm:$0xff]  ;;  %v1062_v33 = vld [vmem:[%s1279_s30 + $0xc] sm:$0xf0] }
  0x15   : > { %645 = vmatpush.bf16.msra.mxu0 %v1073_v8  ;;  %v1077_v25 = vld [vmem:[%s1347_s1 + $0x48] sm:$0xff]  ;;  %v1076_v29 = vld [vmem:[%s1347_s1 + $0x40] sm:$0xff]  ;;  %v901_v35 = vld [vmem:[%s1279_s30 + $0x10] sm:$0xf0] }
  0x16   : > { %664 = vmatpush.bf16.msra.mxu1 %v1081_v9  ;;  %v1085_v26 = vld [vmem:[%s1347_s1 + $0x88] sm:$0xff]  ;;  %v1084_v30 = vld [vmem:[%s1347_s1 + $0x80] sm:$0xff]  ;;  %v1063_v37 = vld [vmem:[%s1279_s30 + $0x14] sm:$0xf0] }
  0x17   : > { %683 = vmatpush.bf16.msra.mxu2 %v1089_v10  ;;  %v1093_v27 = vld [vmem:[%s1347_s1 + $0xc8] sm:$0xff]  ;;  %v1092_v31 = vld [vmem:[%s1347_s1 + $0xc0] sm:$0xff]  ;;  %v909_v39 = vld [vmem:[%s1279_s30 + $0x18] sm:$0xf0] }
  0x18   : > { %702 = vmatpush.bf16.msra.mxu3 %v1097_v11  ;;  %v899_v32 = vld [vmem:[%s1279_s30] sm:$0xf]  ;;  %v1060_v34 = vld [vmem:[%s1279_s30 + $0x4] sm:$0xf]  ;;  %v907_v36 = vld [vmem:[%s1279_s30 + $0x8] sm:$0xf] }
  0x19   : > { %646 = vmatpush.bf16.msra.mxu0 %v1072_v12  ;;  %v1061_v38 = vld [vmem:[%s1279_s30 + $0xc] sm:$0xf]  ;;  %v900_v40 = vor.u32 %v1062_v33, %v899_v32  ;;  %v904_v41 = vor.u32 %v1060_v34, %v901_v35  ;;  %v908_v42 = vor.u32 %v1063_v37, %v907_v36  ;;  %v915_v44 = vld [vmem:[%s1279_s30 + $0x20] sm:$0xf]  ;;  %v1066_v45 = vld [vmem:[%s1279_s30 + $0x2c] sm:$0xf0] }
  0x1a   : > { %665 = vmatpush.bf16.msra.mxu1 %v1080_v13  ;;  %v912_v43 = vor.u32 %v1061_v38, %v909_v39  ;;  %v1064_v46 = vld [vmem:[%s1279_s30 + $0x24] sm:$0xf]  ;;  %v917_v47 = vld [vmem:[%s1279_s30 + $0x30] sm:$0xf0]  ;;  %v923_v48 = vld [vmem:[%s1279_s30 + $0x28] sm:$0xf]  ;;  %v916_v52 = vor.u32 %v1066_v45, %v915_v44 }
  0x1b   : > { %684 = vmatpush.bf16.msra.mxu2 %v1088_v14  ;;  %v1067_v49 = vld [vmem:[%s1279_s30 + $0x34] sm:$0xf0]  ;;  %v1065_v50 = vld [vmem:[%s1279_s30 + $0x2c] sm:$0xf]  ;;  %v925_v51 = vld [vmem:[%s1279_s30 + $0x38] sm:$0xf0]  ;;  %v920_v53 = vor.u32 %v1064_v46, %v917_v47 }
  0x1c   : > { %703 = vmatpush.bf16.msra.mxu3 %v1096_v15  ;;  %v924_v54 = vor.u32 %v1067_v49, %v923_v48  ;;  %v928_v55 = vor.u32 %v1065_v50, %v925_v51  ;;  %v1124_v62 = vld [vmem:[%s1348_s2] ss:$0 sm:$0xff]  ;;  %v743_v12 = vld [vmem:[%s1319_s25 + $0x8] sm:$0xff] }
  0x1d   : > { %647 = vmatpush.bf16.msra.mxu0 %v1071_v16  ;;  %v742_v2 = vld [vmem:[%s1319_s25] sm:$0xff] }
  0x1e   : > { %666 = vmatpush.bf16.msra.mxu1 %v1079_v17 }
  0x1f   : > { %685 = vmatpush.bf16.msra.mxu2 %v1087_v18 }
  0x20   : > { %704 = vmatpush.bf16.msra.mxu3 %v1095_v19 }
  0x21   : > { %648 = vmatpush.bf16.msra.mxu0 %v1070_v20  ;;  %v744_v20 = vld [vmem:[%s1319_s25 + $0x10] sm:$0xff] }
  0x22   : > { %667 = vmatpush.bf16.msra.mxu1 %v1078_v21 }
  0x23   : > { %686 = vmatpush.bf16.msra.mxu2 %v1086_v22 }
  0x24   : > { %705 = vmatpush.bf16.msra.mxu3 %v1094_v23 }
  0x25   : > { %649 = vmatpush.bf16.msra.mxu0 %v1069_v24 }
  0x26   : > { %668 = vmatpush.bf16.msra.mxu1 %v1077_v25 }
  0x27   : > { %687 = vmatpush.bf16.msra.mxu2 %v1085_v26 }
  0x28   : > { %706 = vmatpush.bf16.msra.mxu3 %v1093_v27 }
  0x29   : > { %650 = vmatpush.bf16.msra.mxu0 %v1068_v28 }
  0x2a   : > { %669 = vmatpush.bf16.msra.mxu1 %v1076_v29 }
  0x2b   : > { %688 = vmatpush.bf16.msra.mxu2 %v1084_v30  ;;  %v745_v30 = vld [vmem:[%s1319_s25 + $0x18] sm:$0xff] }
  0x2c   : > { %707 = vmatpush.bf16.msra.mxu3 %v1092_v31  ;;  %651 = vmatmul.bf16.vlgmr.msra.gmra.mxu0 %v900_v40 }
  0x2d   : > { %670 = vmatmul.bf16.vlgmr.msra.gmra.mxu1 %v904_v41 }
  0x2e   : > { %689 = vmatmul.bf16.vlgmr.msra.gmra.mxu2 %v908_v42 }
  0x2f   : > { %708 = vmatmul.bf16.vlgmr.msra.gmra.mxu3 %v912_v43 }
  0x3c   : > { %656 = vmatmul.bf16.gmra.mxu0 %v916_v52 }
  0x3d   : > { %675 = vmatmul.bf16.gmra.mxu1 %v920_v53 }
  0x3e   : > { %694 = vmatmul.bf16.gmra.mxu2 %v924_v54 }
  0x3f   : > { %713 = vmatmul.bf16.gmra.mxu3 %v928_v55 }
  0xa9   : > { %v652_v56 = vpop.f32.mrf.mxu0 }
  0xaa   : > { %v671_v57 = vpop.f32.mrf.mxu1 }
  0xab   : > { %v672_v58 = vadd.f32 %v671_v57, %v652_v56 }
  0xb1   : > { %v690_v59 = vpop.f32.mrf.mxu2  ;;  %v654_v63 = vpop.f32.mrf.mxu0 }
  0xb2   : > { %v709_v60 = vpop.f32.mrf.mxu3  ;;  %v691_v61 = vadd.f32 %v690_v59, %v672_v58  ;;  %v673_v0 = vpop.f32.mrf.mxu1 }
  0xb3   : > { %v674_v5 = vadd.f32 %v673_v0, %v654_v63 }
  0xb4   : > { %v710_v1 = vadd.f32 %v709_v60, %v691_v61 }
  0xb6   : > { %v738_v3 = vadd.f32 %v1124_v62, %v710_v1 }
  0xb8   : > { %v746_v4 = vadd.f32 %v742_v2, %v738_v3 }
  0xb9   : > { %v692_v6 = vpop.f32.mrf.mxu2  ;;  %v657_v9 = vpop.f32.mrf.mxu0 }
  0xba   : > { %v711_v7 = vpop.f32.mrf.mxu3  ;;  %750 = vst [vmem:[%s1328_s29] sm:$0xff] %v746_v4  ;;  %v693_v8 = vadd.f32 %v692_v6, %v674_v5  ;;  %v676_v10 = vpop.f32.mrf.mxu1 }
  0xbb   : > { %v677_v14 = vadd.f32 %v676_v10, %v657_v9 }
  0xbc   : > { %v712_v11 = vadd.f32 %v711_v7, %v693_v8 }
  0xbe   : > { %v739_v13 = vadd.f32 %v1124_v62, %v712_v11 }
  0xc0   : > { %v747_v15 = vadd.f32 %v743_v12, %v739_v13 }
  0xc1   : > { %v695_v16 = vpop.f32.mrf.mxu2  ;;  %v659_v21 = vpop.f32.mrf.mxu0 }
  0xc2   : > { %v714_v17 = vpop.f32.mrf.mxu3  ;;  %751 = vst [vmem:[%s1328_s29 + $0x8] sm:$0xff] %v747_v15  ;;  %v696_v18 = vadd.f32 %v695_v16, %v677_v14  ;;  %v678_v22 = vpop.f32.mrf.mxu1 }
  0xc3   : > { %v679_v25 = vadd.f32 %v678_v22, %v659_v21 }
  0xc4   : > { %v715_v19 = vadd.f32 %v714_v17, %v696_v18 }
  0xc6   : > { %v740_v23 = vadd.f32 %v1124_v62, %v715_v19 }
  0xc8   : > { %v748_v24 = vadd.f32 %v744_v20, %v740_v23 }
  0xc9   : > { %v697_v26 = vpop.f32.mrf.mxu2 }
  0xca   : > { %752 = vst [vmem:[%s1328_s29 + $0x10] sm:$0xff] %v748_v24  ;;  %v698_v27 = vadd.f32 %v697_v26, %v679_v25  ;;  %v716_v28 = vpop.f32.mrf.mxu3 }
  0xcc   : > { %v717_v29 = vadd.f32 %v716_v28, %v698_v27 }
  0xce   : > { %v741_v31 = vadd.f32 %v1124_v62, %v717_v29 }
  0xd0   : > { %v749_v32 = vadd.f32 %v745_v30, %v741_v31 }
  0xd2   : > { %753 = vst [vmem:[%s1328_s29 + $0x18] sm:$0xff] %v749_v32 }
  0xd3 PF: > { %s14_s17 = sadd.s32 1, %s1147_s17   ;;  %s1351_s15 = smov %s1143_s16 }
  0xd4   : > { %p11_p5 = scmp.ge.s32.totalorder %s14_s17, 4   ;;  %s1352_s16 = smov %s1354_s18 }
  0xd6   :  { %13 = sbr.rel (!%p11_p5) target bundleno = 2 (0x2), region = 83 }

</bundles_post_ra>
